<compile_context>
chip_gen: v5e
topology: v5e:2x2
jax: 0.10.0
libtpu: 0.0.40
codegen_flags: <defaults>
</compile_context>

<pallas_src>
import functools

import jax
import jax.numpy as jnp
from jax.experimental import pallas as pl
from jax.experimental.pallas import tpu as pltpu

LEAKY_SLOPE = 0.01  # torch.nn.LeakyReLU default negative_slope


# --------------------------- weight preprocessing ------------------------------

def _band_matrices(w, W, pad):
    """Block-Toeplitz band matrices for a KxK stride-1 conv on a lane-dense image.

    w: (K, K, Cin, Cout) conv taps.
    Returns bf16 (K, Wp*Cin, W*Cout) with Wp = W + 2*pad and
        M[ky, c*Cin + ci, x*Cout + co] = w[ky, c - x, ci, co]   (0 <= c-x < K, else 0)
    so that   out_flat[y] = sum_ky  xpad_flat[y + ky, :] @ M[ky]
    where xpad_flat is the zero-padded image flattened to (Hp, Wp*Cin).
    """
    K, _, Cin, Cout = w.shape
    Wp = W + 2 * pad
    w32 = w.astype(jnp.float32)
    bands = []
    for ky in range(K):
        m4 = jnp.zeros((Wp, Cin, W, Cout), jnp.float32)
        for kx in range(K):
            # indicator[c, x] = 1  iff  c == x + kx
            ind = jnp.eye(Wp, W, k=-kx, dtype=jnp.float32)
            m4 = m4 + ind[:, None, :, None] * w32[ky, kx][None, :, None, :]
        bands.append(m4.reshape(Wp * Cin, W * Cout))
    return jnp.stack(bands, axis=0).astype(jnp.bfloat16)


# ----------------------------- Pallas kernels ----------------------------------

def _double_conv_kernel(x_ref, m1_ref, b1_ref, m2_ref, b2_ref, o_ref,
                        pad1_ref, pad2_ref, *, H, W, Cin, Cmid, Cout, K, P):
    # One batch element.  x_ref: (1, H, W*Cin) bf16, lane-dense.
    # ---- conv1: in-kernel zero pad into VMEM scratch, then K row-band matmuls ----
    pad1_ref[...] = jnp.zeros_like(pad1_ref)
    pad1_ref[P:P + H, P * Cin:(P + W) * Cin] = x_ref[0].astype(jnp.float32)
    acc = jnp.zeros((H, W * Cmid), jnp.float32)
    for ky in range(K):
        band = pad1_ref[ky:ky + H, :].astype(jnp.bfloat16)
        acc = acc + jnp.dot(band, m1_ref[ky], preferred_element_type=jnp.float32)
    acc = acc + b1_ref[...]
    h = jnp.where(acc >= 0, acc, LEAKY_SLOPE * acc)          # LeakyReLU (f32)

    # ---- conv2: intermediate stays in VMEM (fused), same scheme ----
    pad2_ref[...] = jnp.zeros_like(pad2_ref)
    pad2_ref[P:P + H, P * Cmid:(P + W) * Cmid] = h
    acc2 = jnp.zeros((H, W * Cout), jnp.float32)
    for ky in range(K):
        band = pad2_ref[ky:ky + H, :].astype(jnp.bfloat16)
        acc2 = acc2 + jnp.dot(band, m2_ref[ky], preferred_element_type=jnp.float32)
    acc2 = acc2 + b2_ref[...]
    o_ref[0] = jnp.where(acc2 >= 0, acc2, LEAKY_SLOPE * acc2)


def _conv1x1_kernel(x_ref, m_ref, b_ref, o_ref):
    # Pointwise conv as one block-diagonal matmul: (H, W*Cin) @ (W*Cin, W*Cout).
    acc = jnp.dot(x_ref[0], m_ref[...], preferred_element_type=jnp.float32)
    o_ref[0] = acc + b_ref[...]


# ------------------------------ Pallas wrappers ---------------------------------

def double_conv_pallas(x_nhwc, p1, p2):
    """Fused [3x3 conv + LeakyReLU] x 2, stride 1, padding 1 (NHWC in/out, f32)."""
    w1, b1 = p1
    w2, b2 = p2
    N, H, W, Cin = x_nhwc.shape
    Cmid = w1.shape[-1]
    Cout = w2.shape[-1]
    K, P = 3, 1
    Hp, Wp = H + 2 * P, W + 2 * P

    x_flat = x_nhwc.reshape(N, H, W * Cin).astype(jnp.bfloat16)      # lane-dense, bf16 DMA
    m1 = _band_matrices(w1, W, P)                                    # (K, Wp*Cin,  W*Cmid)
    m2 = _band_matrices(w2, W, P)                                    # (K, Wp*Cmid, W*Cout)
    b1t = jnp.tile(b1, W).reshape(1, W * Cmid).astype(jnp.float32)
    b2t = jnp.tile(b2, W).reshape(1, W * Cout).astype(jnp.float32)

    kernel = functools.partial(_double_conv_kernel, H=H, W=W, Cin=Cin,
                               Cmid=Cmid, Cout=Cout, K=K, P=P)
    out_flat = pl.pallas_call(
        kernel,
        out_shape=jax.ShapeDtypeStruct((N, H, W * Cout), jnp.float32),
        grid_spec=pltpu.PrefetchScalarGridSpec(
            num_scalar_prefetch=0,
            grid=(N,),
            in_specs=[
                pl.BlockSpec((1, H, W * Cin), lambda n: (n, 0, 0)),
                pl.BlockSpec((K, Wp * Cin, W * Cmid), lambda n: (0, 0, 0)),
                pl.BlockSpec((1, W * Cmid), lambda n: (0, 0)),
                pl.BlockSpec((K, Wp * Cmid, W * Cout), lambda n: (0, 0, 0)),
                pl.BlockSpec((1, W * Cout), lambda n: (0, 0)),
            ],
            out_specs=pl.BlockSpec((1, H, W * Cout), lambda n: (n, 0, 0)),
            scratch_shapes=[
                pltpu.VMEM((Hp, Wp * Cin), jnp.float32),    # padded input
                pltpu.VMEM((Hp, Wp * Cmid), jnp.float32),   # padded intermediate
            ],
        ),
        compiler_params=pltpu.CompilerParams(
            dimension_semantics=("parallel",)),
    )(x_flat, m1, b1t, m2, b2t)
    return out_flat.reshape(N, H, W, Cout)


def conv1x1_pallas(x_nhwc, w, b):
    """1x1 conv, stride 1, no padding, no activation (NHWC in/out, f32)."""
    N, H, W, Cin = x_nhwc.shape
    Cout = w.shape[-1]
    x_flat = x_nhwc.reshape(N, H, W * Cin).astype(jnp.bfloat16)
    m = _band_matrices(w, W, 0)[0]                                   # (W*Cin, W*Cout)
    bt = jnp.tile(b, W).reshape(1, W * Cout).astype(jnp.float32)
    out_flat = pl.pallas_call(
        _conv1x1_kernel,
        out_shape=jax.ShapeDtypeStruct((N, H, W * Cout), jnp.float32),
        grid_spec=pltpu.PrefetchScalarGridSpec(
            num_scalar_prefetch=0,
            grid=(N,),
            in_specs=[
                pl.BlockSpec((1, H, W * Cin), lambda n: (n, 0, 0)),
                pl.BlockSpec((W * Cin, W * Cout), lambda n: (0, 0)),
                pl.BlockSpec((1, W * Cout), lambda n: (0, 0)),
            ],
            out_specs=pl.BlockSpec((1, H, W * Cout), lambda n: (n, 0, 0)),
        ),
        compiler_params=pltpu.CompilerParams(
            dimension_semantics=("parallel",)),
    )(x_flat, m, bt)
    return out_flat.reshape(N, H, W, Cout)


# ------------------------------- JAX glue ops -----------------------------------

def avg_pool2(x):                        # 2x2 average pool, stride 2 (NHWC)
    N, H, W, C = x.shape
    return x.reshape(N, H // 2, 2, W // 2, 2, C).mean(axis=(2, 4))


def upsample_nearest2(x):                # 2x nearest-neighbour upsample (NHWC)
    return jnp.repeat(jnp.repeat(x, 2, axis=1), 2, axis=2)


# ------------------------------ model definition --------------------------------

def init_conv(key, k, cin, cout):
    kw, kb = jax.random.split(key)
    fan_in = k * k * cin
    w = jax.random.normal(kw, (k, k, cin, cout), jnp.float32) / jnp.sqrt(float(fan_in))
    b = 0.01 * jax.random.normal(kb, (cout,), jnp.float32)
    return (w, b)


def init_params(key, img_ch, output_ch, n_encoder_ch, deep):
    enc_out_ch = [n_encoder_ch * (2 ** i) for i in range(deep)]        # e.g. [8,16,32]
    keys = iter(jax.random.split(key, 64))

    encoder = []
    cin = img_ch
    for cout in enc_out_ch:
        encoder.append([init_conv(next(keys), 3, cin, cout),
                        init_conv(next(keys), 3, cout, cout)])
        cin = cout

    skip = enc_out_ch[::-1]
    skip[0] = 0                                                        # in_ch_features is None
    dec_ch_outs = enc_out_ch[::-1][1:] + [enc_out_ch[0]]               # e.g. [16,8,8]

    decoder = []
    for k in range(deep):
        cin_k = enc_out_ch[-1] if k == 0 else skip[k] + dec_ch_outs[k - 1]
        cout_k = dec_ch_outs[k]
        decoder.append([init_conv(next(keys), 3, cin_k, cout_k),
                        init_conv(next(keys), 3, cout_k, cout_k)])

    conv_out = init_conv(next(keys), 1, dec_ch_outs[-1], output_ch)
    return {"encoder": encoder, "decoder": decoder, "conv_out": conv_out}


def encoder_forward(x, enc_params):
    # use_residual=True: returns [input, f0, f1, ..., f_{deep-1}]
    feats = [x]
    h = x
    for i, blk in enumerate(enc_params):
        if i > 0:
            h = avg_pool2(h)                       # down_pool='avrg_pool'
        h = double_conv_pallas(h, blk[0], blk[1])  # fused double-conv Pallas kernel
        feats.append(h)
    return feats


def decode(dec_feats, dec_params):
    deep = len(dec_params)
    out = None
    for k, blk in enumerate(dec_params):
        inp = dec_feats[k]
        if out is not None:
            inp = jnp.concatenate([inp, out], axis=-1)   # channel concat (dim=1 in NCHW)
        out = double_conv_pallas(inp, blk[0], blk[1])
        if k < deep - 1:
            out = upsample_nearest2(out)                 # up_mode='nearest'
    return out


def unet_forward(x_nchw, params):
    x = jnp.transpose(x_nchw, (0, 2, 3, 1))              # NCHW -> NHWC
    enc_feats = encoder_forward(x, params["encoder"])
    # get_decoder_features with defaults: drop element 0, reverse
    dec_feats = enc_feats[1:][::-1]
    out_features = decode(dec_feats, params["decoder"])
    wo, bo = params["conv_out"]
    x_out = conv1x1_pallas(out_features, wo, bo)
    # back to PyTorch NCHW convention
    x_out = jnp.transpose(x_out, (0, 3, 1, 2))
    enc_nchw = [jnp.transpose(f, (0, 3, 1, 2)) for f in enc_feats]
    dec_nchw = [jnp.transpose(f, (0, 3, 1, 2)) for f in dec_feats]
    return x_out, enc_nchw, dec_nchw, None               # matches (x_out, enc, dec, None)


# ------------------------- pure-JAX reference (for checking) ---------------------

def _conv_ref(x, w, b, act):
    y = jax.lax.conv_general_dilated(
        x.astype(jnp.bfloat16), w.astype(jnp.bfloat16),
        window_strides=(1, 1),
        padding="SAME" if w.shape[0] == 3 else "VALID",
        dimension_numbers=("NHWC", "HWIO", "NHWC"),
        preferred_element_type=jnp.float32)
    y = y + b
    if act:
        y = jnp.where(y >= 0, y, LEAKY_SLOPE * y)
    return y


def unet_forward_ref(x_nchw, params):
    x = jnp.transpose(x_nchw, (0, 2, 3, 1))
    feats = [x]
    h = x
    for i, blk in enumerate(params["encoder"]):
        if i > 0:
            h = avg_pool2(h)
        (w1, b1), (w2, b2) = blk
        h = _conv_ref(_conv_ref(h, w1, b1, True), w2, b2, True)
        feats.append(h)
    dec_feats = feats[1:][::-1]
    out = None
    for k, blk in enumerate(params["decoder"]):
        inp = dec_feats[k]
        if out is not None:
            inp = jnp.concatenate([inp, out], axis=-1)
        (w1, b1), (w2, b2) = blk
        out = _conv_ref(_conv_ref(inp, w1, b1, True), w2, b2, True)
        if k < len(params["decoder"]) - 1:
            out = upsample_nearest2(out)
    wo, bo = params["conv_out"]
    y = _conv_ref(out, wo, bo, False)
    return jnp.transpose(y, (0, 3, 1, 2))


# ----------------------------------- main ----------------------------------------

if __name__ == "__main__":
    B, IMG_CH, IMG_SIZE = 2, 4, 16
    OUTPUT_CH, N_ENC_CH, DEEP = 1, 8, 3

    key = jax.random.PRNGKey(0)
    k_x, k_p = jax.random.split(key)
    x = jax.random.normal(k_x, (B, IMG_CH, IMG_SIZE, IMG_SIZE), jnp.float32)  # NCHW
    params = init_params(k_p, IMG_CH, OUTPUT_CH, N_ENC_CH, DEEP)

    x_out, enc_feats, dec_feats, _ = jax.jit(unet_forward)(x, params)
    jax.block_until_ready(x_out)

    assert x_out.shape == (B, OUTPUT_CH, IMG_SIZE, IMG_SIZE), x_out.shape
    assert len(enc_feats) == DEEP + 1 and len(dec_feats) == DEEP
    assert dec_feats[0].shape[-1] == IMG_SIZE // (2 ** (DEEP - 1))  # n_features_size

    # Numerical cross-check vs an XLA conv reference with identical bf16 casts.
    x_ref = jax.jit(unet_forward_ref)(x, params)
    err = float(jnp.max(jnp.abs(x_out - x_ref)))
    assert err < 2e-2, f"max abs diff vs reference: {err}"

    print("KERNEL_OK")
</pallas_src>

<mosaic_0001>
module attributes {stable_mosaic.version = 11 : i64} {
  func.func @_double_conv_kernel(%arg0: i32, %arg1: memref<1x16x64xbf16, #tpu.memory_space<vmem>>, %arg2: memref<3x72x128xbf16, #tpu.memory_space<vmem>>, %arg3: memref<1x128xf32, #tpu.memory_space<vmem>>, %arg4: memref<3x144x128xbf16, #tpu.memory_space<vmem>>, %arg5: memref<1x128xf32, #tpu.memory_space<vmem>>, %arg6: memref<1x16x128xf32, #tpu.memory_space<vmem>>, %arg7: memref<18x72xf32, #tpu.memory_space<vmem>>, %arg8: memref<18x144xf32, #tpu.memory_space<vmem>>) attributes {dimension_semantics = [#tpu.dimension_semantics<parallel>], iteration_bounds = array<i64: 2>, scalar_prefetch = 0 : i64, scratch_operands = 2 : i64, tpu.core_type = #tpu.core_type<tc>, window_params = [{transform_indices = @transform_0, window_bounds = array<i64: 1, 16, 64>}, {pipeline_mode = #tpu.pipeline_mode<synchronous>, transform_indices = @transform_1, window_bounds = array<i64: 3, 72, 128>}, {pipeline_mode = #tpu.pipeline_mode<synchronous>, transform_indices = @transform_2, window_bounds = array<i64: 1, 128>}, {pipeline_mode = #tpu.pipeline_mode<synchronous>, transform_indices = @transform_3, window_bounds = array<i64: 3, 144, 128>}, {pipeline_mode = #tpu.pipeline_mode<synchronous>, transform_indices = @transform_4, window_bounds = array<i64: 1, 128>}, {transform_indices = @transform_5, window_bounds = array<i64: 1, 16, 128>}]} {
    %cst = arith.constant 0.000000e+00 : f32
    %0 = vector.broadcast %cst : f32 to vector<18x72xf32>
    %c0 = arith.constant 0 : index
    %c0_0 = arith.constant 0 : index
    %1 = vector.load %arg7[%c0, %c0_0] : memref<18x72xf32, #tpu.memory_space<vmem>>, vector<18x72xf32>
    tpu.vector_store %arg7[%c0, %c0_0], %0 {strides = array<i32>} : memref<18x72xf32, #tpu.memory_space<vmem>>, vector<18x72xf32>,
    %c0_1 = arith.constant 0 : index
    %c0_2 = arith.constant 0 : index
    %c0_3 = arith.constant 0 : index
    %2 = vector.load %arg1[%c0_1, %c0_2, %c0_3] : memref<1x16x64xbf16, #tpu.memory_space<vmem>>, vector<1x16x64xbf16>
    %3 = vector.shape_cast %2 : vector<1x16x64xbf16> to vector<16x64xbf16>
    %4 = arith.extf %3 : vector<16x64xbf16> to vector<16x64xf32>
    %c1 = arith.constant 1 : index
    %c4 = arith.constant 4 : index
    %5 = vector.load %arg7[%c1, %c4] : memref<18x72xf32, #tpu.memory_space<vmem>>, vector<16x64xf32>
    tpu.vector_store %arg7[%c1, %c4], %4 {strides = array<i32>} : memref<18x72xf32, #tpu.memory_space<vmem>>, vector<16x64xf32>,
    %cst_4 = arith.constant 0.000000e+00 : f32
    %6 = vector.broadcast %cst_4 : f32 to vector<16x128xf32>
    %c0_5 = arith.constant 0 : index
    %c0_6 = arith.constant 0 : index
    %7 = vector.load %arg7[%c0_5, %c0_6] : memref<18x72xf32, #tpu.memory_space<vmem>>, vector<16x72xf32>
    %8 = arith.truncf %7 : vector<16x72xf32> to vector<16x72xbf16>
    %c0_7 = arith.constant 0 : index
    %c0_8 = arith.constant 0 : index
    %c0_9 = arith.constant 0 : index
    %9 = vector.load %arg2[%c0_7, %c0_8, %c0_9] : memref<3x72x128xbf16, #tpu.memory_space<vmem>>, vector<1x72x128xbf16>
    %10 = vector.shape_cast %9 : vector<1x72x128xbf16> to vector<72x128xbf16>
    %cst_10 = arith.constant dense<0.000000e+00> : vector<16x128xf32>
    %11 = tpu.matmul %8, %10, %cst_10 {dimension_numbers = #tpu.dot_dimension_numbers<[1], [0], [0], [1], [0, 0, 1, 1], [], []>} : vector<16x72xbf16>, vector<72x128xbf16>, vector<16x128xf32> -> vector<16x128xf32>
    %12 = arith.addf %6, %11 : vector<16x128xf32>
    %c1_11 = arith.constant 1 : index
    %c0_12 = arith.constant 0 : index
    %13 = vector.load %arg7[%c1_11, %c0_12] : memref<18x72xf32, #tpu.memory_space<vmem>>, vector<16x72xf32>
    %14 = arith.truncf %13 : vector<16x72xf32> to vector<16x72xbf16>
    %c1_13 = arith.constant 1 : index
    %c0_14 = arith.constant 0 : index
    %c0_15 = arith.constant 0 : index
    %15 = vector.load %arg2[%c1_13, %c0_14, %c0_15] : memref<3x72x128xbf16, #tpu.memory_space<vmem>>, vector<1x72x128xbf16>
    %16 = vector.shape_cast %15 : vector<1x72x128xbf16> to vector<72x128xbf16>
    %cst_16 = arith.constant dense<0.000000e+00> : vector<16x128xf32>
    %17 = tpu.matmul %14, %16, %cst_16 {dimension_numbers = #tpu.dot_dimension_numbers<[1], [0], [0], [1], [0, 0, 1, 1], [], []>} : vector<16x72xbf16>, vector<72x128xbf16>, vector<16x128xf32> -> vector<16x128xf32>
    %18 = arith.addf %12, %17 : vector<16x128xf32>
    %c2 = arith.constant 2 : index
    %c0_17 = arith.constant 0 : index
    %19 = vector.load %arg7[%c2, %c0_17] : memref<18x72xf32, #tpu.memory_space<vmem>>, vector<16x72xf32>
    %20 = arith.truncf %19 : vector<16x72xf32> to vector<16x72xbf16>
    %c2_18 = arith.constant 2 : index
    %c0_19 = arith.constant 0 : index
    %c0_20 = arith.constant 0 : index
    %21 = vector.load %arg2[%c2_18, %c0_19, %c0_20] : memref<3x72x128xbf16, #tpu.memory_space<vmem>>, vector<1x72x128xbf16>
    %22 = vector.shape_cast %21 : vector<1x72x128xbf16> to vector<72x128xbf16>
    %cst_21 = arith.constant dense<0.000000e+00> : vector<16x128xf32>
    %23 = tpu.matmul %20, %22, %cst_21 {dimension_numbers = #tpu.dot_dimension_numbers<[1], [0], [0], [1], [0, 0, 1, 1], [], []>} : vector<16x72xbf16>, vector<72x128xbf16>, vector<16x128xf32> -> vector<16x128xf32>
    %24 = arith.addf %18, %23 : vector<16x128xf32>
    %c0_22 = arith.constant 0 : index
    %c0_23 = arith.constant 0 : index
    %25 = vector.load %arg3[%c0_22, %c0_23] : memref<1x128xf32, #tpu.memory_space<vmem>>, vector<1x128xf32>
    %26 = vector.broadcast %25 : vector<1x128xf32> to vector<16x128xf32>
    %27 = arith.addf %24, %26 : vector<16x128xf32>
    %cst_24 = arith.constant 0.000000e+00 : f32
    %28 = vector.broadcast %cst_24 : f32 to vector<16x128xf32>
    %29 = arith.cmpf oge, %27, %28 : vector<16x128xf32>
    %cst_25 = arith.constant 0.00999999977 : f32
    %30 = vector.broadcast %cst_25 : f32 to vector<16x128xf32>
    %31 = arith.mulf %30, %27 : vector<16x128xf32>
    %32 = arith.select %29, %27, %31 : vector<16x128xi1>, vector<16x128xf32>
    %cst_26 = arith.constant 0.000000e+00 : f32
    %33 = vector.broadcast %cst_26 : f32 to vector<18x144xf32>
    %c0_27 = arith.constant 0 : index
    %c0_28 = arith.constant 0 : index
    %34 = vector.load %arg8[%c0_27, %c0_28] : memref<18x144xf32, #tpu.memory_space<vmem>>, vector<18x144xf32>
    tpu.vector_store %arg8[%c0_27, %c0_28], %33 {strides = array<i32>} : memref<18x144xf32, #tpu.memory_space<vmem>>, vector<18x144xf32>,
    %c1_29 = arith.constant 1 : index
    %c8 = arith.constant 8 : index
    %35 = vector.load %arg8[%c1_29, %c8] : memref<18x144xf32, #tpu.memory_space<vmem>>, vector<16x128xf32>
    tpu.vector_store %arg8[%c1_29, %c8], %32 {strides = array<i32>} : memref<18x144xf32, #tpu.memory_space<vmem>>, vector<16x128xf32>,
    %cst_30 = arith.constant 0.000000e+00 : f32
    %36 = vector.broadcast %cst_30 : f32 to vector<16x128xf32>
    %c0_31 = arith.constant 0 : index
    %c0_32 = arith.constant 0 : index
    %37 = vector.load %arg8[%c0_31, %c0_32] : memref<18x144xf32, #tpu.memory_space<vmem>>, vector<16x144xf32>
    %38 = arith.truncf %37 : vector<16x144xf32> to vector<16x144xbf16>
    %c0_33 = arith.constant 0 : index
    %c0_34 = arith.constant 0 : index
    %c0_35 = arith.constant 0 : index
    %39 = vector.load %arg4[%c0_33, %c0_34, %c0_35] : memref<3x144x128xbf16, #tpu.memory_space<vmem>>, vector<1x144x128xbf16>
    %40 = vector.shape_cast %39 : vector<1x144x128xbf16> to vector<144x128xbf16>
    %cst_36 = arith.constant dense<0.000000e+00> : vector<16x128xf32>
    %41 = tpu.matmul %38, %40, %cst_36 {dimension_numbers = #tpu.dot_dimension_numbers<[1], [0], [0], [1], [0, 0, 1, 1], [], []>} : vector<16x144xbf16>, vector<144x128xbf16>, vector<16x128xf32> -> vector<16x128xf32>
    %42 = arith.addf %36, %41 : vector<16x128xf32>
    %c1_37 = arith.constant 1 : index
    %c0_38 = arith.constant 0 : index
    %43 = vector.load %arg8[%c1_37, %c0_38] : memref<18x144xf32, #tpu.memory_space<vmem>>, vector<16x144xf32>
    %44 = arith.truncf %43 : vector<16x144xf32> to vector<16x144xbf16>
    %c1_39 = arith.constant 1 : index
    %c0_40 = arith.constant 0 : index
    %c0_41 = arith.constant 0 : index
    %45 = vector.load %arg4[%c1_39, %c0_40, %c0_41] : memref<3x144x128xbf16, #tpu.memory_space<vmem>>, vector<1x144x128xbf16>
    %46 = vector.shape_cast %45 : vector<1x144x128xbf16> to vector<144x128xbf16>
    %cst_42 = arith.constant dense<0.000000e+00> : vector<16x128xf32>
    %47 = tpu.matmul %44, %46, %cst_42 {dimension_numbers = #tpu.dot_dimension_numbers<[1], [0], [0], [1], [0, 0, 1, 1], [], []>} : vector<16x144xbf16>, vector<144x128xbf16>, vector<16x128xf32> -> vector<16x128xf32>
    %48 = arith.addf %42, %47 : vector<16x128xf32>
    %c2_43 = arith.constant 2 : index
    %c0_44 = arith.constant 0 : index
    %49 = vector.load %arg8[%c2_43, %c0_44] : memref<18x144xf32, #tpu.memory_space<vmem>>, vector<16x144xf32>
    %50 = arith.truncf %49 : vector<16x144xf32> to vector<16x144xbf16>
    %c2_45 = arith.constant 2 : index
    %c0_46 = arith.constant 0 : index
    %c0_47 = arith.constant 0 : index
    %51 = vector.load %arg4[%c2_45, %c0_46, %c0_47] : memref<3x144x128xbf16, #tpu.memory_space<vmem>>, vector<1x144x128xbf16>
    %52 = vector.shape_cast %51 : vector<1x144x128xbf16> to vector<144x128xbf16>
    %cst_48 = arith.constant dense<0.000000e+00> : vector<16x128xf32>
    %53 = tpu.matmul %50, %52, %cst_48 {dimension_numbers = #tpu.dot_dimension_numbers<[1], [0], [0], [1], [0, 0, 1, 1], [], []>} : vector<16x144xbf16>, vector<144x128xbf16>, vector<16x128xf32> -> vector<16x128xf32>
    %54 = arith.addf %48, %53 : vector<16x128xf32>
    %c0_49 = arith.constant 0 : index
    %c0_50 = arith.constant 0 : index
    %55 = vector.load %arg5[%c0_49, %c0_50] : memref<1x128xf32, #tpu.memory_space<vmem>>, vector<1x128xf32>
    %56 = vector.broadcast %55 : vector<1x128xf32> to vector<16x128xf32>
    %57 = arith.addf %54, %56 : vector<16x128xf32>
    %cst_51 = arith.constant 0.000000e+00 : f32
    %58 = vector.broadcast %cst_51 : f32 to vector<16x128xf32>
    %59 = arith.cmpf oge, %57, %58 : vector<16x128xf32>
    %cst_52 = arith.constant 0.00999999977 : f32
    %60 = vector.broadcast %cst_52 : f32 to vector<16x128xf32>
    %61 = arith.mulf %60, %57 : vector<16x128xf32>
    %62 = arith.select %59, %57, %61 : vector<16x128xi1>, vector<16x128xf32>
    %c0_53 = arith.constant 0 : index
    %c0_54 = arith.constant 0 : index
    %c0_55 = arith.constant 0 : index
    %63 = vector.load %arg6[%c0_53, %c0_54, %c0_55] : memref<1x16x128xf32, #tpu.memory_space<vmem>>, vector<1x16x128xf32>
    %64 = vector.shape_cast %63 : vector<1x16x128xf32> to vector<16x128xf32>
    %65 = vector.shape_cast %62 : vector<16x128xf32> to vector<1x16x128xf32>
    tpu.vector_store %arg6[%c0_53, %c0_54, %c0_55], %65 {strides = array<i32>} : memref<1x16x128xf32, #tpu.memory_space<vmem>>, vector<1x16x128xf32>,
    return
  }
  func.func @transform_0(%arg0: i32) -> (i32, i32, i32) {
    %c0_i32 = arith.constant 0 : i32
    %c0_i32_0 = arith.constant 0 : i32
    %c0_i32_1 = arith.constant 0 : i32
    return %arg0, %c0_i32, %c0_i32_0 : i32, i32, i32
  }
  func.func @transform_1(%arg0: i32) -> (i32, i32, i32) {
    %c0_i32 = arith.constant 0 : i32
    %c0_i32_0 = arith.constant 0 : i32
    %c0_i32_1 = arith.constant 0 : i32
    %c0_i32_2 = arith.constant 0 : i32
    return %c0_i32, %c0_i32_0, %c0_i32_1 : i32, i32, i32
  }
  func.func @transform_2(%arg0: i32) -> (i32, i32) {
    %c0_i32 = arith.constant 0 : i32
    %c0_i32_0 = arith.constant 0 : i32
    %c0_i32_1 = arith.constant 0 : i32
    return %c0_i32, %c0_i32_0 : i32, i32
  }
  func.func @transform_3(%arg0: i32) -> (i32, i32, i32) {
    %c0_i32 = arith.constant 0 : i32
    %c0_i32_0 = arith.constant 0 : i32
    %c0_i32_1 = arith.constant 0 : i32
    %c0_i32_2 = arith.constant 0 : i32
    return %c0_i32, %c0_i32_0, %c0_i32_1 : i32, i32, i32
  }
  func.func @transform_4(%arg0: i32) -> (i32, i32) {
    %c0_i32 = arith.constant 0 : i32
    %c0_i32_0 = arith.constant 0 : i32
    %c0_i32_1 = arith.constant 0 : i32
    return %c0_i32, %c0_i32_0 : i32, i32
  }
  func.func @transform_5(%arg0: i32) -> (i32, i32, i32) {
    %c0_i32 = arith.constant 0 : i32
    %c0_i32_0 = arith.constant 0 : i32
    %c0_i32_1 = arith.constant 0 : i32
    return %arg0, %c0_i32, %c0_i32_0 : i32, i32, i32
  }
}

module attributes {stable_mosaic.version = 11 : i64} {
  func.func @_double_conv_kernel(%arg0: i32, %arg1: memref<1x8x64xbf16, #tpu.memory_space<vmem>>, %arg2: memref<3x80x128xbf16, #tpu.memory_space<vmem>>, %arg3: memref<1x128xf32, #tpu.memory_space<vmem>>, %arg4: memref<3x160x128xbf16, #tpu.memory_space<vmem>>, %arg5: memref<1x128xf32, #tpu.memory_space<vmem>>, %arg6: memref<1x8x128xf32, #tpu.memory_space<vmem>>, %arg7: memref<10x80xf32, #tpu.memory_space<vmem>>, %arg8: memref<10x160xf32, #tpu.memory_space<vmem>>) attributes {dimension_semantics = [#tpu.dimension_semantics<parallel>], iteration_bounds = array<i64: 2>, scalar_prefetch = 0 : i64, scratch_operands = 2 : i64, tpu.core_type = #tpu.core_type<tc>, window_params = [{transform_indices = @transform_0, window_bounds = array<i64: 1, 8, 64>}, {pipeline_mode = #tpu.pipeline_mode<synchronous>, transform_indices = @transform_1, window_bounds = array<i64: 3, 80, 128>}, {pipeline_mode = #tpu.pipeline_mode<synchronous>, transform_indices = @transform_2, window_bounds = array<i64: 1, 128>}, {pipeline_mode = #tpu.pipeline_mode<synchronous>, transform_indices = @transform_3, window_bounds = array<i64: 3, 160, 128>}, {pipeline_mode = #tpu.pipeline_mode<synchronous>, transform_indices = @transform_4, window_bounds = array<i64: 1, 128>}, {transform_indices = @transform_5, window_bounds = array<i64: 1, 8, 128>}]} {
    %cst = arith.constant 0.000000e+00 : f32
    %0 = vector.broadcast %cst : f32 to vector<10x80xf32>
    %c0 = arith.constant 0 : index
    %c0_0 = arith.constant 0 : index
    %1 = vector.load %arg7[%c0, %c0_0] : memref<10x80xf32, #tpu.memory_space<vmem>>, vector<10x80xf32>
    tpu.vector_store %arg7[%c0, %c0_0], %0 {strides = array<i32>} : memref<10x80xf32, #tpu.memory_space<vmem>>, vector<10x80xf32>,
    %c0_1 = arith.constant 0 : index
    %c0_2 = arith.constant 0 : index
    %c0_3 = arith.constant 0 : index
    %2 = vector.load %arg1[%c0_1, %c0_2, %c0_3] : memref<1x8x64xbf16, #tpu.memory_space<vmem>>, vector<1x8x64xbf16>
    %3 = vector.shape_cast %2 : vector<1x8x64xbf16> to vector<8x64xbf16>
    %4 = arith.extf %3 : vector<8x64xbf16> to vector<8x64xf32>
    %c1 = arith.constant 1 : index
    %c8 = arith.constant 8 : index
    %5 = vector.load %arg7[%c1, %c8] : memref<10x80xf32, #tpu.memory_space<vmem>>, vector<8x64xf32>
    tpu.vector_store %arg7[%c1, %c8], %4 {strides = array<i32>} : memref<10x80xf32, #tpu.memory_space<vmem>>, vector<8x64xf32>,
    %cst_4 = arith.constant 0.000000e+00 : f32
    %6 = vector.broadcast %cst_4 : f32 to vector<8x128xf32>
    %c0_5 = arith.constant 0 : index
    %c0_6 = arith.constant 0 : index
    %7 = vector.load %arg7[%c0_5, %c0_6] : memref<10x80xf32, #tpu.memory_space<vmem>>, vector<8x80xf32>
    %8 = arith.truncf %7 : vector<8x80xf32> to vector<8x80xbf16>
    %c0_7 = arith.constant 0 : index
    %c0_8 = arith.constant 0 : index
    %c0_9 = arith.constant 0 : index
    %9 = vector.load %arg2[%c0_7, %c0_8, %c0_9] : memref<3x80x128xbf16, #tpu.memory_space<vmem>>, vector<1x80x128xbf16>
    %10 = vector.shape_cast %9 : vector<1x80x128xbf16> to vector<80x128xbf16>
    %cst_10 = arith.constant dense<0.000000e+00> : vector<8x128xf32>
    %11 = tpu.matmul %8, %10, %cst_10 {dimension_numbers = #tpu.dot_dimension_numbers<[1], [0], [0], [1], [0, 0, 1, 1], [], []>} : vector<8x80xbf16>, vector<80x128xbf16>, vector<8x128xf32> -> vector<8x128xf32>
    %12 = arith.addf %6, %11 : vector<8x128xf32>
    %c1_11 = arith.constant 1 : index
    %c0_12 = arith.constant 0 : index
    %13 = vector.load %arg7[%c1_11, %c0_12] : memref<10x80xf32, #tpu.memory_space<vmem>>, vector<8x80xf32>
    %14 = arith.truncf %13 : vector<8x80xf32> to vector<8x80xbf16>
    %c1_13 = arith.constant 1 : index
    %c0_14 = arith.constant 0 : index
    %c0_15 = arith.constant 0 : index
    %15 = vector.load %arg2[%c1_13, %c0_14, %c0_15] : memref<3x80x128xbf16, #tpu.memory_space<vmem>>, vector<1x80x128xbf16>
    %16 = vector.shape_cast %15 : vector<1x80x128xbf16> to vector<80x128xbf16>
    %cst_16 = arith.constant dense<0.000000e+00> : vector<8x128xf32>
    %17 = tpu.matmul %14, %16, %cst_16 {dimension_numbers = #tpu.dot_dimension_numbers<[1], [0], [0], [1], [0, 0, 1, 1], [], []>} : vector<8x80xbf16>, vector<80x128xbf16>, vector<8x128xf32> -> vector<8x128xf32>
    %18 = arith.addf %12, %17 : vector<8x128xf32>
    %c2 = arith.constant 2 : index
    %c0_17 = arith.constant 0 : index
    %19 = vector.load %arg7[%c2, %c0_17] : memref<10x80xf32, #tpu.memory_space<vmem>>, vector<8x80xf32>
    %20 = arith.truncf %19 : vector<8x80xf32> to vector<8x80xbf16>
    %c2_18 = arith.constant 2 : index
    %c0_19 = arith.constant 0 : index
    %c0_20 = arith.constant 0 : index
    %21 = vector.load %arg2[%c2_18, %c0_19, %c0_20] : memref<3x80x128xbf16, #tpu.memory_space<vmem>>, vector<1x80x128xbf16>
    %22 = vector.shape_cast %21 : vector<1x80x128xbf16> to vector<80x128xbf16>
    %cst_21 = arith.constant dense<0.000000e+00> : vector<8x128xf32>
    %23 = tpu.matmul %20, %22, %cst_21 {dimension_numbers = #tpu.dot_dimension_numbers<[1], [0], [0], [1], [0, 0, 1, 1], [], []>} : vector<8x80xbf16>, vector<80x128xbf16>, vector<8x128xf32> -> vector<8x128xf32>
    %24 = arith.addf %18, %23 : vector<8x128xf32>
    %c0_22 = arith.constant 0 : index
    %c0_23 = arith.constant 0 : index
    %25 = vector.load %arg3[%c0_22, %c0_23] : memref<1x128xf32, #tpu.memory_space<vmem>>, vector<1x128xf32>
    %26 = vector.broadcast %25 : vector<1x128xf32> to vector<8x128xf32>
    %27 = arith.addf %24, %26 : vector<8x128xf32>
    %cst_24 = arith.constant 0.000000e+00 : f32
    %28 = vector.broadcast %cst_24 : f32 to vector<8x128xf32>
    %29 = arith.cmpf oge, %27, %28 : vector<8x128xf32>
    %cst_25 = arith.constant 0.00999999977 : f32
    %30 = vector.broadcast %cst_25 : f32 to vector<8x128xf32>
    %31 = arith.mulf %30, %27 : vector<8x128xf32>
    %32 = arith.select %29, %27, %31 : vector<8x128xi1>, vector<8x128xf32>
    %cst_26 = arith.constant 0.000000e+00 : f32
    %33 = vector.broadcast %cst_26 : f32 to vector<10x160xf32>
    %c0_27 = arith.constant 0 : index
    %c0_28 = arith.constant 0 : index
    %34 = vector.load %arg8[%c0_27, %c0_28] : memref<10x160xf32, #tpu.memory_space<vmem>>, vector<10x160xf32>
    tpu.vector_store %arg8[%c0_27, %c0_28], %33 {strides = array<i32>} : memref<10x160xf32, #tpu.memory_space<vmem>>, vector<10x160xf32>,
    %c1_29 = arith.constant 1 : index
    %c16 = arith.constant 16 : index
    %35 = vector.load %arg8[%c1_29, %c16] : memref<10x160xf32, #tpu.memory_space<vmem>>, vector<8x128xf32>
    tpu.vector_store %arg8[%c1_29, %c16], %32 {strides = array<i32>} : memref<10x160xf32, #tpu.memory_space<vmem>>, vector<8x128xf32>,
    %cst_30 = arith.constant 0.000000e+00 : f32
    %36 = vector.broadcast %cst_30 : f32 to vector<8x128xf32>
    %c0_31 = arith.constant 0 : index
    %c0_32 = arith.constant 0 : index
    %37 = vector.load %arg8[%c0_31, %c0_32] : memref<10x160xf32, #tpu.memory_space<vmem>>, vector<8x160xf32>
    %38 = arith.truncf %37 : vector<8x160xf32> to vector<8x160xbf16>
    %c0_33 = arith.constant 0 : index
    %c0_34 = arith.constant 0 : index
    %c0_35 = arith.constant 0 : index
    %39 = vector.load %arg4[%c0_33, %c0_34, %c0_35] : memref<3x160x128xbf16, #tpu.memory_space<vmem>>, vector<1x160x128xbf16>
    %40 = vector.shape_cast %39 : vector<1x160x128xbf16> to vector<160x128xbf16>
    %cst_36 = arith.constant dense<0.000000e+00> : vector<8x128xf32>
    %41 = tpu.matmul %38, %40, %cst_36 {dimension_numbers = #tpu.dot_dimension_numbers<[1], [0], [0], [1], [0, 0, 1, 1], [], []>} : vector<8x160xbf16>, vector<160x128xbf16>, vector<8x128xf32> -> vector<8x128xf32>
    %42 = arith.addf %36, %41 : vector<8x128xf32>
    %c1_37 = arith.constant 1 : index
    %c0_38 = arith.constant 0 : index
    %43 = vector.load %arg8[%c1_37, %c0_38] : memref<10x160xf32, #tpu.memory_space<vmem>>, vector<8x160xf32>
    %44 = arith.truncf %43 : vector<8x160xf32> to vector<8x160xbf16>
    %c1_39 = arith.constant 1 : index
    %c0_40 = arith.constant 0 : index
    %c0_41 = arith.constant 0 : index
    %45 = vector.load %arg4[%c1_39, %c0_40, %c0_41] : memref<3x160x128xbf16, #tpu.memory_space<vmem>>, vector<1x160x128xbf16>
    %46 = vector.shape_cast %45 : vector<1x160x128xbf16> to vector<160x128xbf16>
    %cst_42 = arith.constant dense<0.000000e+00> : vector<8x128xf32>
    %47 = tpu.matmul %44, %46, %cst_42 {dimension_numbers = #tpu.dot_dimension_numbers<[1], [0], [0], [1], [0, 0, 1, 1], [], []>} : vector<8x160xbf16>, vector<160x128xbf16>, vector<8x128xf32> -> vector<8x128xf32>
    %48 = arith.addf %42, %47 : vector<8x128xf32>
    %c2_43 = arith.constant 2 : index
    %c0_44 = arith.constant 0 : index
    %49 = vector.load %arg8[%c2_43, %c0_44] : memref<10x160xf32, #tpu.memory_space<vmem>>, vector<8x160xf32>
    %50 = arith.truncf %49 : vector<8x160xf32> to vector<8x160xbf16>
    %c2_45 = arith.constant 2 : index
    %c0_46 = arith.constant 0 : index
    %c0_47 = arith.constant 0 : index
    %51 = vector.load %arg4[%c2_45, %c0_46, %c0_47] : memref<3x160x128xbf16, #tpu.memory_space<vmem>>, vector<1x160x128xbf16>
    %52 = vector.shape_cast %51 : vector<1x160x128xbf16> to vector<160x128xbf16>
    %cst_48 = arith.constant dense<0.000000e+00> : vector<8x128xf32>
    %53 = tpu.matmul %50, %52, %cst_48 {dimension_numbers = #tpu.dot_dimension_numbers<[1], [0], [0], [1], [0, 0, 1, 1], [], []>} : vector<8x160xbf16>, vector<160x128xbf16>, vector<8x128xf32> -> vector<8x128xf32>
    %54 = arith.addf %48, %53 : vector<8x128xf32>
    %c0_49 = arith.constant 0 : index
    %c0_50 = arith.constant 0 : index
    %55 = vector.load %arg5[%c0_49, %c0_50] : memref<1x128xf32, #tpu.memory_space<vmem>>, vector<1x128xf32>
    %56 = vector.broadcast %55 : vector<1x128xf32> to vector<8x128xf32>
    %57 = arith.addf %54, %56 : vector<8x128xf32>
    %cst_51 = arith.constant 0.000000e+00 : f32
    %58 = vector.broadcast %cst_51 : f32 to vector<8x128xf32>
    %59 = arith.cmpf oge, %57, %58 : vector<8x128xf32>
    %cst_52 = arith.constant 0.00999999977 : f32
    %60 = vector.broadcast %cst_52 : f32 to vector<8x128xf32>
    %61 = arith.mulf %60, %57 : vector<8x128xf32>
    %62 = arith.select %59, %57, %61 : vector<8x128xi1>, vector<8x128xf32>
    %c0_53 = arith.constant 0 : index
    %c0_54 = arith.constant 0 : index
    %c0_55 = arith.constant 0 : index
    %63 = vector.load %arg6[%c0_53, %c0_54, %c0_55] : memref<1x8x128xf32, #tpu.memory_space<vmem>>, vector<1x8x128xf32>
    %64 = vector.shape_cast %63 : vector<1x8x128xf32> to vector<8x128xf32>
    %65 = vector.shape_cast %62 : vector<8x128xf32> to vector<1x8x128xf32>
    tpu.vector_store %arg6[%c0_53, %c0_54, %c0_55], %65 {strides = array<i32>} : memref<1x8x128xf32, #tpu.memory_space<vmem>>, vector<1x8x128xf32>,
    return
  }
  func.func @transform_0(%arg0: i32) -> (i32, i32, i32) {
    %c0_i32 = arith.constant 0 : i32
    %c0_i32_0 = arith.constant 0 : i32
    %c0_i32_1 = arith.constant 0 : i32
    return %arg0, %c0_i32, %c0_i32_0 : i32, i32, i32
  }
  func.func @transform_1(%arg0: i32) -> (i32, i32, i32) {
    %c0_i32 = arith.constant 0 : i32
    %c0_i32_0 = arith.constant 0 : i32
    %c0_i32_1 = arith.constant 0 : i32
    %c0_i32_2 = arith.constant 0 : i32
    return %c0_i32, %c0_i32_0, %c0_i32_1 : i32, i32, i32
  }
  func.func @transform_2(%arg0: i32) -> (i32, i32) {
    %c0_i32 = arith.constant 0 : i32
    %c0_i32_0 = arith.constant 0 : i32
    %c0_i32_1 = arith.constant 0 : i32
    return %c0_i32, %c0_i32_0 : i32, i32
  }
  func.func @transform_3(%arg0: i32) -> (i32, i32, i32) {
    %c0_i32 = arith.constant 0 : i32
    %c0_i32_0 = arith.constant 0 : i32
    %c0_i32_1 = arith.constant 0 : i32
    %c0_i32_2 = arith.constant 0 : i32
    return %c0_i32, %c0_i32_0, %c0_i32_1 : i32, i32, i32
  }
  func.func @transform_4(%arg0: i32) -> (i32, i32) {
    %c0_i32 = arith.constant 0 : i32
    %c0_i32_0 = arith.constant 0 : i32
    %c0_i32_1 = arith.constant 0 : i32
    return %c0_i32, %c0_i32_0 : i32, i32
  }
  func.func @transform_5(%arg0: i32) -> (i32, i32, i32) {
    %c0_i32 = arith.constant 0 : i32
    %c0_i32_0 = arith.constant 0 : i32
    %c0_i32_1 = arith.constant 0 : i32
    return %arg0, %c0_i32, %c0_i32_0 : i32, i32, i32
  }
}

module attributes {stable_mosaic.version = 11 : i64} {
  func.func @_double_conv_kernel(%arg0: i32, %arg1: memref<1x4x64xbf16, #tpu.memory_space<vmem>>, %arg2: memref<3x96x128xbf16, #tpu.memory_space<vmem>>, %arg3: memref<1x128xf32, #tpu.memory_space<vmem>>, %arg4: memref<3x192x128xbf16, #tpu.memory_space<vmem>>, %arg5: memref<1x128xf32, #tpu.memory_space<vmem>>, %arg6: memref<1x4x128xf32, #tpu.memory_space<vmem>>, %arg7: memref<6x96xf32, #tpu.memory_space<vmem>>, %arg8: memref<6x192xf32, #tpu.memory_space<vmem>>) attributes {dimension_semantics = [#tpu.dimension_semantics<parallel>], iteration_bounds = array<i64: 2>, scalar_prefetch = 0 : i64, scratch_operands = 2 : i64, tpu.core_type = #tpu.core_type<tc>, window_params = [{transform_indices = @transform_0, window_bounds = array<i64: 1, 4, 64>}, {pipeline_mode = #tpu.pipeline_mode<synchronous>, transform_indices = @transform_1, window_bounds = array<i64: 3, 96, 128>}, {pipeline_mode = #tpu.pipeline_mode<synchronous>, transform_indices = @transform_2, window_bounds = array<i64: 1, 128>}, {pipeline_mode = #tpu.pipeline_mode<synchronous>, transform_indices = @transform_3, window_bounds = array<i64: 3, 192, 128>}, {pipeline_mode = #tpu.pipeline_mode<synchronous>, transform_indices = @transform_4, window_bounds = array<i64: 1, 128>}, {transform_indices = @transform_5, window_bounds = array<i64: 1, 4, 128>}]} {
    %cst = arith.constant 0.000000e+00 : f32
    %0 = vector.broadcast %cst : f32 to vector<6x96xf32>
    %c0 = arith.constant 0 : index
    %c0_0 = arith.constant 0 : index
    %1 = vector.load %arg7[%c0, %c0_0] : memref<6x96xf32, #tpu.memory_space<vmem>>, vector<6x96xf32>
    tpu.vector_store %arg7[%c0, %c0_0], %0 {strides = array<i32>} : memref<6x96xf32, #tpu.memory_space<vmem>>, vector<6x96xf32>,
    %c0_1 = arith.constant 0 : index
    %c0_2 = arith.constant 0 : index
    %c0_3 = arith.constant 0 : index
    %2 = vector.load %arg1[%c0_1, %c0_2, %c0_3] : memref<1x4x64xbf16, #tpu.memory_space<vmem>>, vector<1x4x64xbf16>
    %3 = vector.shape_cast %2 : vector<1x4x64xbf16> to vector<4x64xbf16>
    %4 = arith.extf %3 : vector<4x64xbf16> to vector<4x64xf32>
    %c1 = arith.constant 1 : index
    %c16 = arith.constant 16 : index
    %5 = vector.load %arg7[%c1, %c16] : memref<6x96xf32, #tpu.memory_space<vmem>>, vector<4x64xf32>
    tpu.vector_store %arg7[%c1, %c16], %4 {strides = array<i32>} : memref<6x96xf32, #tpu.memory_space<vmem>>, vector<4x64xf32>,
    %cst_4 = arith.constant 0.000000e+00 : f32
    %6 = vector.broadcast %cst_4 : f32 to vector<4x128xf32>
    %c0_5 = arith.constant 0 : index
    %c0_6 = arith.constant 0 : index
    %7 = vector.load %arg7[%c0_5, %c0_6] : memref<6x96xf32, #tpu.memory_space<vmem>>, vector<4x96xf32>
    %8 = arith.truncf %7 : vector<4x96xf32> to vector<4x96xbf16>
    %c0_7 = arith.constant 0 : index
    %c0_8 = arith.constant 0 : index
    %c0_9 = arith.constant 0 : index
    %9 = vector.load %arg2[%c0_7, %c0_8, %c0_9] : memref<3x96x128xbf16, #tpu.memory_space<vmem>>, vector<1x96x128xbf16>
    %10 = vector.shape_cast %9 : vector<1x96x128xbf16> to vector<96x128xbf16>
    %cst_10 = arith.constant dense<0.000000e+00> : vector<4x128xf32>
    %11 = tpu.matmul %8, %10, %cst_10 {dimension_numbers = #tpu.dot_dimension_numbers<[1], [0], [0], [1], [0, 0, 1, 1], [], []>} : vector<4x96xbf16>, vector<96x128xbf16>, vector<4x128xf32> -> vector<4x128xf32>
    %12 = arith.addf %6, %11 : vector<4x128xf32>
    %c1_11 = arith.constant 1 : index
    %c0_12 = arith.constant 0 : index
    %13 = vector.load %arg7[%c1_11, %c0_12] : memref<6x96xf32, #tpu.memory_space<vmem>>, vector<4x96xf32>
    %14 = arith.truncf %13 : vector<4x96xf32> to vector<4x96xbf16>
    %c1_13 = arith.constant 1 : index
    %c0_14 = arith.constant 0 : index
    %c0_15 = arith.constant 0 : index
    %15 = vector.load %arg2[%c1_13, %c0_14, %c0_15] : memref<3x96x128xbf16, #tpu.memory_space<vmem>>, vector<1x96x128xbf16>
    %16 = vector.shape_cast %15 : vector<1x96x128xbf16> to vector<96x128xbf16>
    %cst_16 = arith.constant dense<0.000000e+00> : vector<4x128xf32>
    %17 = tpu.matmul %14, %16, %cst_16 {dimension_numbers = #tpu.dot_dimension_numbers<[1], [0], [0], [1], [0, 0, 1, 1], [], []>} : vector<4x96xbf16>, vector<96x128xbf16>, vector<4x128xf32> -> vector<4x128xf32>
    %18 = arith.addf %12, %17 : vector<4x128xf32>
    %c2 = arith.constant 2 : index
    %c0_17 = arith.constant 0 : index
    %19 = vector.load %arg7[%c2, %c0_17] : memref<6x96xf32, #tpu.memory_space<vmem>>, vector<4x96xf32>
    %20 = arith.truncf %19 : vector<4x96xf32> to vector<4x96xbf16>
    %c2_18 = arith.constant 2 : index
    %c0_19 = arith.constant 0 : index
    %c0_20 = arith.constant 0 : index
    %21 = vector.load %arg2[%c2_18, %c0_19, %c0_20] : memref<3x96x128xbf16, #tpu.memory_space<vmem>>, vector<1x96x128xbf16>
    %22 = vector.shape_cast %21 : vector<1x96x128xbf16> to vector<96x128xbf16>
    %cst_21 = arith.constant dense<0.000000e+00> : vector<4x128xf32>
    %23 = tpu.matmul %20, %22, %cst_21 {dimension_numbers = #tpu.dot_dimension_numbers<[1], [0], [0], [1], [0, 0, 1, 1], [], []>} : vector<4x96xbf16>, vector<96x128xbf16>, vector<4x128xf32> -> vector<4x128xf32>
    %24 = arith.addf %18, %23 : vector<4x128xf32>
    %c0_22 = arith.constant 0 : index
    %c0_23 = arith.constant 0 : index
    %25 = vector.load %arg3[%c0_22, %c0_23] : memref<1x128xf32, #tpu.memory_space<vmem>>, vector<1x128xf32>
    %26 = vector.broadcast %25 : vector<1x128xf32> to vector<4x128xf32>
    %27 = arith.addf %24, %26 : vector<4x128xf32>
    %cst_24 = arith.constant 0.000000e+00 : f32
    %28 = vector.broadcast %cst_24 : f32 to vector<4x128xf32>
    %29 = arith.cmpf oge, %27, %28 : vector<4x128xf32>
    %cst_25 = arith.constant 0.00999999977 : f32
    %30 = vector.broadcast %cst_25 : f32 to vector<4x128xf32>
    %31 = arith.mulf %30, %27 : vector<4x128xf32>
    %32 = arith.select %29, %27, %31 : vector<4x128xi1>, vector<4x128xf32>
    %cst_26 = arith.constant 0.000000e+00 : f32
    %33 = vector.broadcast %cst_26 : f32 to vector<6x192xf32>
    %c0_27 = arith.constant 0 : index
    %c0_28 = arith.constant 0 : index
    %34 = vector.load %arg8[%c0_27, %c0_28] : memref<6x192xf32, #tpu.memory_space<vmem>>, vector<6x192xf32>
    tpu.vector_store %arg8[%c0_27, %c0_28], %33 {strides = array<i32>} : memref<6x192xf32, #tpu.memory_space<vmem>>, vector<6x192xf32>,
    %c1_29 = arith.constant 1 : index
    %c32 = arith.constant 32 : index
    %35 = vector.load %arg8[%c1_29, %c32] : memref<6x192xf32, #tpu.memory_space<vmem>>, vector<4x128xf32>
    tpu.vector_store %arg8[%c1_29, %c32], %32 {strides = array<i32>} : memref<6x192xf32, #tpu.memory_space<vmem>>, vector<4x128xf32>,
    %cst_30 = arith.constant 0.000000e+00 : f32
    %36 = vector.broadcast %cst_30 : f32 to vector<4x128xf32>
    %c0_31 = arith.constant 0 : index
    %c0_32 = arith.constant 0 : index
    %37 = vector.load %arg8[%c0_31, %c0_32] : memref<6x192xf32, #tpu.memory_space<vmem>>, vector<4x192xf32>
    %38 = arith.truncf %37 : vector<4x192xf32> to vector<4x192xbf16>
    %c0_33 = arith.constant 0 : index
    %c0_34 = arith.constant 0 : index
    %c0_35 = arith.constant 0 : index
    %39 = vector.load %arg4[%c0_33, %c0_34, %c0_35] : memref<3x192x128xbf16, #tpu.memory_space<vmem>>, vector<1x192x128xbf16>
    %40 = vector.shape_cast %39 : vector<1x192x128xbf16> to vector<192x128xbf16>
    %cst_36 = arith.constant dense<0.000000e+00> : vector<4x128xf32>
    %41 = tpu.matmul %38, %40, %cst_36 {dimension_numbers = #tpu.dot_dimension_numbers<[1], [0], [0], [1], [0, 0, 1, 1], [], []>} : vector<4x192xbf16>, vector<192x128xbf16>, vector<4x128xf32> -> vector<4x128xf32>
    %42 = arith.addf %36, %41 : vector<4x128xf32>
    %c1_37 = arith.constant 1 : index
    %c0_38 = arith.constant 0 : index
    %43 = vector.load %arg8[%c1_37, %c0_38] : memref<6x192xf32, #tpu.memory_space<vmem>>, vector<4x192xf32>
    %44 = arith.truncf %43 : vector<4x192xf32> to vector<4x192xbf16>
    %c1_39 = arith.constant 1 : index
    %c0_40 = arith.constant 0 : index
    %c0_41 = arith.constant 0 : index
    %45 = vector.load %arg4[%c1_39, %c0_40, %c0_41] : memref<3x192x128xbf16, #tpu.memory_space<vmem>>, vector<1x192x128xbf16>
    %46 = vector.shape_cast %45 : vector<1x192x128xbf16> to vector<192x128xbf16>
    %cst_42 = arith.constant dense<0.000000e+00> : vector<4x128xf32>
    %47 = tpu.matmul %44, %46, %cst_42 {dimension_numbers = #tpu.dot_dimension_numbers<[1], [0], [0], [1], [0, 0, 1, 1], [], []>} : vector<4x192xbf16>, vector<192x128xbf16>, vector<4x128xf32> -> vector<4x128xf32>
    %48 = arith.addf %42, %47 : vector<4x128xf32>
    %c2_43 = arith.constant 2 : index
    %c0_44 = arith.constant 0 : index
    %49 = vector.load %arg8[%c2_43, %c0_44] : memref<6x192xf32, #tpu.memory_space<vmem>>, vector<4x192xf32>
    %50 = arith.truncf %49 : vector<4x192xf32> to vector<4x192xbf16>
    %c2_45 = arith.constant 2 : index
    %c0_46 = arith.constant 0 : index
    %c0_47 = arith.constant 0 : index
    %51 = vector.load %arg4[%c2_45, %c0_46, %c0_47] : memref<3x192x128xbf16, #tpu.memory_space<vmem>>, vector<1x192x128xbf16>
    %52 = vector.shape_cast %51 : vector<1x192x128xbf16> to vector<192x128xbf16>
    %cst_48 = arith.constant dense<0.000000e+00> : vector<4x128xf32>
    %53 = tpu.matmul %50, %52, %cst_48 {dimension_numbers = #tpu.dot_dimension_numbers<[1], [0], [0], [1], [0, 0, 1, 1], [], []>} : vector<4x192xbf16>, vector<192x128xbf16>, vector<4x128xf32> -> vector<4x128xf32>
    %54 = arith.addf %48, %53 : vector<4x128xf32>
    %c0_49 = arith.constant 0 : index
    %c0_50 = arith.constant 0 : index
    %55 = vector.load %arg5[%c0_49, %c0_50] : memref<1x128xf32, #tpu.memory_space<vmem>>, vector<1x128xf32>
    %56 = vector.broadcast %55 : vector<1x128xf32> to vector<4x128xf32>
    %57 = arith.addf %54, %56 : vector<4x128xf32>
    %cst_51 = arith.constant 0.000000e+00 : f32
    %58 = vector.broadcast %cst_51 : f32 to vector<4x128xf32>
    %59 = arith.cmpf oge, %57, %58 : vector<4x128xf32>
    %cst_52 = arith.constant 0.00999999977 : f32
    %60 = vector.broadcast %cst_52 : f32 to vector<4x128xf32>
    %61 = arith.mulf %60, %57 : vector<4x128xf32>
    %62 = arith.select %59, %57, %61 : vector<4x128xi1>, vector<4x128xf32>
    %c0_53 = arith.constant 0 : index
    %c0_54 = arith.constant 0 : index
    %c0_55 = arith.constant 0 : index
    %63 = vector.load %arg6[%c0_53, %c0_54, %c0_55] : memref<1x4x128xf32, #tpu.memory_space<vmem>>, vector<1x4x128xf32>
    %64 = vector.shape_cast %63 : vector<1x4x128xf32> to vector<4x128xf32>
    %65 = vector.shape_cast %62 : vector<4x128xf32> to vector<1x4x128xf32>
    tpu.vector_store %arg6[%c0_53, %c0_54, %c0_55], %65 {strides = array<i32>} : memref<1x4x128xf32, #tpu.memory_space<vmem>>, vector<1x4x128xf32>,
    return
  }
  func.func @transform_0(%arg0: i32) -> (i32, i32, i32) {
    %c0_i32 = arith.constant 0 : i32
    %c0_i32_0 = arith.constant 0 : i32
    %c0_i32_1 = arith.constant 0 : i32
    return %arg0, %c0_i32, %c0_i32_0 : i32, i32, i32
  }
  func.func @transform_1(%arg0: i32) -> (i32, i32, i32) {
    %c0_i32 = arith.constant 0 : i32
    %c0_i32_0 = arith.constant 0 : i32
    %c0_i32_1 = arith.constant 0 : i32
    %c0_i32_2 = arith.constant 0 : i32
    return %c0_i32, %c0_i32_0, %c0_i32_1 : i32, i32, i32
  }
  func.func @transform_2(%arg0: i32) -> (i32, i32) {
    %c0_i32 = arith.constant 0 : i32
    %c0_i32_0 = arith.constant 0 : i32
    %c0_i32_1 = arith.constant 0 : i32
    return %c0_i32, %c0_i32_0 : i32, i32
  }
  func.func @transform_3(%arg0: i32) -> (i32, i32, i32) {
    %c0_i32 = arith.constant 0 : i32
    %c0_i32_0 = arith.constant 0 : i32
    %c0_i32_1 = arith.constant 0 : i32
    %c0_i32_2 = arith.constant 0 : i32
    return %c0_i32, %c0_i32_0, %c0_i32_1 : i32, i32, i32
  }
  func.func @transform_4(%arg0: i32) -> (i32, i32) {
    %c0_i32 = arith.constant 0 : i32
    %c0_i32_0 = arith.constant 0 : i32
    %c0_i32_1 = arith.constant 0 : i32
    return %c0_i32, %c0_i32_0 : i32, i32
  }
  func.func @transform_5(%arg0: i32) -> (i32, i32, i32) {
    %c0_i32 = arith.constant 0 : i32
    %c0_i32_0 = arith.constant 0 : i32
    %c0_i32_1 = arith.constant 0 : i32
    return %arg0, %c0_i32, %c0_i32_0 : i32, i32, i32
  }
}

module attributes {stable_mosaic.version = 11 : i64} {
  func.func @_double_conv_kernel(%arg0: i32, %arg1: memref<1x4x128xbf16, #tpu.memory_space<vmem>>, %arg2: memref<3x192x64xbf16, #tpu.memory_space<vmem>>, %arg3: memref<1x64xf32, #tpu.memory_space<vmem>>, %arg4: memref<3x96x64xbf16, #tpu.memory_space<vmem>>, %arg5: memref<1x64xf32, #tpu.memory_space<vmem>>, %arg6: memref<1x4x64xf32, #tpu.memory_space<vmem>>, %arg7: memref<6x192xf32, #tpu.memory_space<vmem>>, %arg8: memref<6x96xf32, #tpu.memory_space<vmem>>) attributes {dimension_semantics = [#tpu.dimension_semantics<parallel>], iteration_bounds = array<i64: 2>, scalar_prefetch = 0 : i64, scratch_operands = 2 : i64, tpu.core_type = #tpu.core_type<tc>, window_params = [{transform_indices = @transform_0, window_bounds = array<i64: 1, 4, 128>}, {pipeline_mode = #tpu.pipeline_mode<synchronous>, transform_indices = @transform_1, window_bounds = array<i64: 3, 192, 64>}, {pipeline_mode = #tpu.pipeline_mode<synchronous>, transform_indices = @transform_2, window_bounds = array<i64: 1, 64>}, {pipeline_mode = #tpu.pipeline_mode<synchronous>, transform_indices = @transform_3, window_bounds = array<i64: 3, 96, 64>}, {pipeline_mode = #tpu.pipeline_mode<synchronous>, transform_indices = @transform_4, window_bounds = array<i64: 1, 64>}, {transform_indices = @transform_5, window_bounds = array<i64: 1, 4, 64>}]} {
    %cst = arith.constant 0.000000e+00 : f32
    %0 = vector.broadcast %cst : f32 to vector<6x192xf32>
    %c0 = arith.constant 0 : index
    %c0_0 = arith.constant 0 : index
    %1 = vector.load %arg7[%c0, %c0_0] : memref<6x192xf32, #tpu.memory_space<vmem>>, vector<6x192xf32>
    tpu.vector_store %arg7[%c0, %c0_0], %0 {strides = array<i32>} : memref<6x192xf32, #tpu.memory_space<vmem>>, vector<6x192xf32>,
    %c0_1 = arith.constant 0 : index
    %c0_2 = arith.constant 0 : index
    %c0_3 = arith.constant 0 : index
    %2 = vector.load %arg1[%c0_1, %c0_2, %c0_3] : memref<1x4x128xbf16, #tpu.memory_space<vmem>>, vector<1x4x128xbf16>
    %3 = vector.shape_cast %2 : vector<1x4x128xbf16> to vector<4x128xbf16>
    %4 = arith.extf %3 : vector<4x128xbf16> to vector<4x128xf32>
    %c1 = arith.constant 1 : index
    %c32 = arith.constant 32 : index
    %5 = vector.load %arg7[%c1, %c32] : memref<6x192xf32, #tpu.memory_space<vmem>>, vector<4x128xf32>
    tpu.vector_store %arg7[%c1, %c32], %4 {strides = array<i32>} : memref<6x192xf32, #tpu.memory_space<vmem>>, vector<4x128xf32>,
    %cst_4 = arith.constant 0.000000e+00 : f32
    %6 = vector.broadcast %cst_4 : f32 to vector<4x64xf32>
    %c0_5 = arith.constant 0 : index
    %c0_6 = arith.constant 0 : index
    %7 = vector.load %arg7[%c0_5, %c0_6] : memref<6x192xf32, #tpu.memory_space<vmem>>, vector<4x192xf32>
    %8 = arith.truncf %7 : vector<4x192xf32> to vector<4x192xbf16>
    %c0_7 = arith.constant 0 : index
    %c0_8 = arith.constant 0 : index
    %c0_9 = arith.constant 0 : index
    %9 = vector.load %arg2[%c0_7, %c0_8, %c0_9] : memref<3x192x64xbf16, #tpu.memory_space<vmem>>, vector<1x192x64xbf16>
    %10 = vector.shape_cast %9 : vector<1x192x64xbf16> to vector<192x64xbf16>
    %cst_10 = arith.constant dense<0.000000e+00> : vector<4x64xf32>
    %11 = tpu.matmul %8, %10, %cst_10 {dimension_numbers = #tpu.dot_dimension_numbers<[1], [0], [0], [1], [0, 0, 1, 1], [], []>} : vector<4x192xbf16>, vector<192x64xbf16>, vector<4x64xf32> -> vector<4x64xf32>
    %12 = arith.addf %6, %11 : vector<4x64xf32>
    %c1_11 = arith.constant 1 : index
    %c0_12 = arith.constant 0 : index
    %13 = vector.load %arg7[%c1_11, %c0_12] : memref<6x192xf32, #tpu.memory_space<vmem>>, vector<4x192xf32>
    %14 = arith.truncf %13 : vector<4x192xf32> to vector<4x192xbf16>
    %c1_13 = arith.constant 1 : index
    %c0_14 = arith.constant 0 : index
    %c0_15 = arith.constant 0 : index
    %15 = vector.load %arg2[%c1_13, %c0_14, %c0_15] : memref<3x192x64xbf16, #tpu.memory_space<vmem>>, vector<1x192x64xbf16>
    %16 = vector.shape_cast %15 : vector<1x192x64xbf16> to vector<192x64xbf16>
    %cst_16 = arith.constant dense<0.000000e+00> : vector<4x64xf32>
    %17 = tpu.matmul %14, %16, %cst_16 {dimension_numbers = #tpu.dot_dimension_numbers<[1], [0], [0], [1], [0, 0, 1, 1], [], []>} : vector<4x192xbf16>, vector<192x64xbf16>, vector<4x64xf32> -> vector<4x64xf32>
    %18 = arith.addf %12, %17 : vector<4x64xf32>
    %c2 = arith.constant 2 : index
    %c0_17 = arith.constant 0 : index
    %19 = vector.load %arg7[%c2, %c0_17] : memref<6x192xf32, #tpu.memory_space<vmem>>, vector<4x192xf32>
    %20 = arith.truncf %19 : vector<4x192xf32> to vector<4x192xbf16>
    %c2_18 = arith.constant 2 : index
    %c0_19 = arith.constant 0 : index
    %c0_20 = arith.constant 0 : index
    %21 = vector.load %arg2[%c2_18, %c0_19, %c0_20] : memref<3x192x64xbf16, #tpu.memory_space<vmem>>, vector<1x192x64xbf16>
    %22 = vector.shape_cast %21 : vector<1x192x64xbf16> to vector<192x64xbf16>
    %cst_21 = arith.constant dense<0.000000e+00> : vector<4x64xf32>
    %23 = tpu.matmul %20, %22, %cst_21 {dimension_numbers = #tpu.dot_dimension_numbers<[1], [0], [0], [1], [0, 0, 1, 1], [], []>} : vector<4x192xbf16>, vector<192x64xbf16>, vector<4x64xf32> -> vector<4x64xf32>
    %24 = arith.addf %18, %23 : vector<4x64xf32>
    %c0_22 = arith.constant 0 : index
    %c0_23 = arith.constant 0 : index
    %25 = vector.load %arg3[%c0_22, %c0_23] : memref<1x64xf32, #tpu.memory_space<vmem>>, vector<1x64xf32>
    %26 = vector.broadcast %25 : vector<1x64xf32> to vector<4x64xf32>
    %27 = arith.addf %24, %26 : vector<4x64xf32>
    %cst_24 = arith.constant 0.000000e+00 : f32
    %28 = vector.broadcast %cst_24 : f32 to vector<4x64xf32>
    %29 = arith.cmpf oge, %27, %28 : vector<4x64xf32>
    %cst_25 = arith.constant 0.00999999977 : f32
    %30 = vector.broadcast %cst_25 : f32 to vector<4x64xf32>
    %31 = arith.mulf %30, %27 : vector<4x64xf32>
    %32 = arith.select %29, %27, %31 : vector<4x64xi1>, vector<4x64xf32>
    %cst_26 = arith.constant 0.000000e+00 : f32
    %33 = vector.broadcast %cst_26 : f32 to vector<6x96xf32>
    %c0_27 = arith.constant 0 : index
    %c0_28 = arith.constant 0 : index
    %34 = vector.load %arg8[%c0_27, %c0_28] : memref<6x96xf32, #tpu.memory_space<vmem>>, vector<6x96xf32>
    tpu.vector_store %arg8[%c0_27, %c0_28], %33 {strides = array<i32>} : memref<6x96xf32, #tpu.memory_space<vmem>>, vector<6x96xf32>,
    %c1_29 = arith.constant 1 : index
    %c16 = arith.constant 16 : index
    %35 = vector.load %arg8[%c1_29, %c16] : memref<6x96xf32, #tpu.memory_space<vmem>>, vector<4x64xf32>
    tpu.vector_store %arg8[%c1_29, %c16], %32 {strides = array<i32>} : memref<6x96xf32, #tpu.memory_space<vmem>>, vector<4x64xf32>,
    %cst_30 = arith.constant 0.000000e+00 : f32
    %36 = vector.broadcast %cst_30 : f32 to vector<4x64xf32>
    %c0_31 = arith.constant 0 : index
    %c0_32 = arith.constant 0 : index
    %37 = vector.load %arg8[%c0_31, %c0_32] : memref<6x96xf32, #tpu.memory_space<vmem>>, vector<4x96xf32>
    %38 = arith.truncf %37 : vector<4x96xf32> to vector<4x96xbf16>
    %c0_33 = arith.constant 0 : index
    %c0_34 = arith.constant 0 : index
    %c0_35 = arith.constant 0 : index
    %39 = vector.load %arg4[%c0_33, %c0_34, %c0_35] : memref<3x96x64xbf16, #tpu.memory_space<vmem>>, vector<1x96x64xbf16>
    %40 = vector.shape_cast %39 : vector<1x96x64xbf16> to vector<96x64xbf16>
    %cst_36 = arith.constant dense<0.000000e+00> : vector<4x64xf32>
    %41 = tpu.matmul %38, %40, %cst_36 {dimension_numbers = #tpu.dot_dimension_numbers<[1], [0], [0], [1], [0, 0, 1, 1], [], []>} : vector<4x96xbf16>, vector<96x64xbf16>, vector<4x64xf32> -> vector<4x64xf32>
    %42 = arith.addf %36, %41 : vector<4x64xf32>
    %c1_37 = arith.constant 1 : index
    %c0_38 = arith.constant 0 : index
    %43 = vector.load %arg8[%c1_37, %c0_38] : memref<6x96xf32, #tpu.memory_space<vmem>>, vector<4x96xf32>
    %44 = arith.truncf %43 : vector<4x96xf32> to vector<4x96xbf16>
    %c1_39 = arith.constant 1 : index
    %c0_40 = arith.constant 0 : index
    %c0_41 = arith.constant 0 : index
    %45 = vector.load %arg4[%c1_39, %c0_40, %c0_41] : memref<3x96x64xbf16, #tpu.memory_space<vmem>>, vector<1x96x64xbf16>
    %46 = vector.shape_cast %45 : vector<1x96x64xbf16> to vector<96x64xbf16>
    %cst_42 = arith.constant dense<0.000000e+00> : vector<4x64xf32>
    %47 = tpu.matmul %44, %46, %cst_42 {dimension_numbers = #tpu.dot_dimension_numbers<[1], [0], [0], [1], [0, 0, 1, 1], [], []>} : vector<4x96xbf16>, vector<96x64xbf16>, vector<4x64xf32> -> vector<4x64xf32>
    %48 = arith.addf %42, %47 : vector<4x64xf32>
    %c2_43 = arith.constant 2 : index
    %c0_44 = arith.constant 0 : index
    %49 = vector.load %arg8[%c2_43, %c0_44] : memref<6x96xf32, #tpu.memory_space<vmem>>, vector<4x96xf32>
    %50 = arith.truncf %49 : vector<4x96xf32> to vector<4x96xbf16>
    %c2_45 = arith.constant 2 : index
    %c0_46 = arith.constant 0 : index
    %c0_47 = arith.constant 0 : index
    %51 = vector.load %arg4[%c2_45, %c0_46, %c0_47] : memref<3x96x64xbf16, #tpu.memory_space<vmem>>, vector<1x96x64xbf16>
    %52 = vector.shape_cast %51 : vector<1x96x64xbf16> to vector<96x64xbf16>
    %cst_48 = arith.constant dense<0.000000e+00> : vector<4x64xf32>
    %53 = tpu.matmul %50, %52, %cst_48 {dimension_numbers = #tpu.dot_dimension_numbers<[1], [0], [0], [1], [0, 0, 1, 1], [], []>} : vector<4x96xbf16>, vector<96x64xbf16>, vector<4x64xf32> -> vector<4x64xf32>
    %54 = arith.addf %48, %53 : vector<4x64xf32>
    %c0_49 = arith.constant 0 : index
    %c0_50 = arith.constant 0 : index
    %55 = vector.load %arg5[%c0_49, %c0_50] : memref<1x64xf32, #tpu.memory_space<vmem>>, vector<1x64xf32>
    %56 = vector.broadcast %55 : vector<1x64xf32> to vector<4x64xf32>
    %57 = arith.addf %54, %56 : vector<4x64xf32>
    %cst_51 = arith.constant 0.000000e+00 : f32
    %58 = vector.broadcast %cst_51 : f32 to vector<4x64xf32>
    %59 = arith.cmpf oge, %57, %58 : vector<4x64xf32>
    %cst_52 = arith.constant 0.00999999977 : f32
    %60 = vector.broadcast %cst_52 : f32 to vector<4x64xf32>
    %61 = arith.mulf %60, %57 : vector<4x64xf32>
    %62 = arith.select %59, %57, %61 : vector<4x64xi1>, vector<4x64xf32>
    %c0_53 = arith.constant 0 : index
    %c0_54 = arith.constant 0 : index
    %c0_55 = arith.constant 0 : index
    %63 = vector.load %arg6[%c0_53, %c0_54, %c0_55] : memref<1x4x64xf32, #tpu.memory_space<vmem>>, vector<1x4x64xf32>
    %64 = vector.shape_cast %63 : vector<1x4x64xf32> to vector<4x64xf32>
    %65 = vector.shape_cast %62 : vector<4x64xf32> to vector<1x4x64xf32>
    tpu.vector_store %arg6[%c0_53, %c0_54, %c0_55], %65 {strides = array<i32>} : memref<1x4x64xf32, #tpu.memory_space<vmem>>, vector<1x4x64xf32>,
    return
  }
  func.func @transform_0(%arg0: i32) -> (i32, i32, i32) {
    %c0_i32 = arith.constant 0 : i32
    %c0_i32_0 = arith.constant 0 : i32
    %c0_i32_1 = arith.constant 0 : i32
    return %arg0, %c0_i32, %c0_i32_0 : i32, i32, i32
  }
  func.func @transform_1(%arg0: i32) -> (i32, i32, i32) {
    %c0_i32 = arith.constant 0 : i32
    %c0_i32_0 = arith.constant 0 : i32
    %c0_i32_1 = arith.constant 0 : i32
    %c0_i32_2 = arith.constant 0 : i32
    return %c0_i32, %c0_i32_0, %c0_i32_1 : i32, i32, i32
  }
  func.func @transform_2(%arg0: i32) -> (i32, i32) {
    %c0_i32 = arith.constant 0 : i32
    %c0_i32_0 = arith.constant 0 : i32
    %c0_i32_1 = arith.constant 0 : i32
    return %c0_i32, %c0_i32_0 : i32, i32
  }
  func.func @transform_3(%arg0: i32) -> (i32, i32, i32) {
    %c0_i32 = arith.constant 0 : i32
    %c0_i32_0 = arith.constant 0 : i32
    %c0_i32_1 = arith.constant 0 : i32
    %c0_i32_2 = arith.constant 0 : i32
    return %c0_i32, %c0_i32_0, %c0_i32_1 : i32, i32, i32
  }
  func.func @transform_4(%arg0: i32) -> (i32, i32) {
    %c0_i32 = arith.constant 0 : i32
    %c0_i32_0 = arith.constant 0 : i32
    %c0_i32_1 = arith.constant 0 : i32
    return %c0_i32, %c0_i32_0 : i32, i32
  }
  func.func @transform_5(%arg0: i32) -> (i32, i32, i32) {
    %c0_i32 = arith.constant 0 : i32
    %c0_i32_0 = arith.constant 0 : i32
    %c0_i32_1 = arith.constant 0 : i32
    return %arg0, %c0_i32, %c0_i32_0 : i32, i32, i32
  }
}

module attributes {stable_mosaic.version = 11 : i64} {
  func.func @_double_conv_kernel(%arg0: i32, %arg1: memref<1x8x256xbf16, #tpu.memory_space<vmem>>, %arg2: memref<3x320x64xbf16, #tpu.memory_space<vmem>>, %arg3: memref<1x64xf32, #tpu.memory_space<vmem>>, %arg4: memref<3x80x64xbf16, #tpu.memory_space<vmem>>, %arg5: memref<1x64xf32, #tpu.memory_space<vmem>>, %arg6: memref<1x8x64xf32, #tpu.memory_space<vmem>>, %arg7: memref<10x320xf32, #tpu.memory_space<vmem>>, %arg8: memref<10x80xf32, #tpu.memory_space<vmem>>) attributes {dimension_semantics = [#tpu.dimension_semantics<parallel>], iteration_bounds = array<i64: 2>, scalar_prefetch = 0 : i64, scratch_operands = 2 : i64, tpu.core_type = #tpu.core_type<tc>, window_params = [{transform_indices = @transform_0, window_bounds = array<i64: 1, 8, 256>}, {pipeline_mode = #tpu.pipeline_mode<synchronous>, transform_indices = @transform_1, window_bounds = array<i64: 3, 320, 64>}, {pipeline_mode = #tpu.pipeline_mode<synchronous>, transform_indices = @transform_2, window_bounds = array<i64: 1, 64>}, {pipeline_mode = #tpu.pipeline_mode<synchronous>, transform_indices = @transform_3, window_bounds = array<i64: 3, 80, 64>}, {pipeline_mode = #tpu.pipeline_mode<synchronous>, transform_indices = @transform_4, window_bounds = array<i64: 1, 64>}, {transform_indices = @transform_5, window_bounds = array<i64: 1, 8, 64>}]} {
    %cst = arith.constant 0.000000e+00 : f32
    %0 = vector.broadcast %cst : f32 to vector<10x320xf32>
    %c0 = arith.constant 0 : index
    %c0_0 = arith.constant 0 : index
    %1 = vector.load %arg7[%c0, %c0_0] : memref<10x320xf32, #tpu.memory_space<vmem>>, vector<10x320xf32>
    tpu.vector_store %arg7[%c0, %c0_0], %0 {strides = array<i32>} : memref<10x320xf32, #tpu.memory_space<vmem>>, vector<10x320xf32>,
    %c0_1 = arith.constant 0 : index
    %c0_2 = arith.constant 0 : index
    %c0_3 = arith.constant 0 : index
    %2 = vector.load %arg1[%c0_1, %c0_2, %c0_3] : memref<1x8x256xbf16, #tpu.memory_space<vmem>>, vector<1x8x256xbf16>
    %3 = vector.shape_cast %2 : vector<1x8x256xbf16> to vector<8x256xbf16>
    %4 = arith.extf %3 : vector<8x256xbf16> to vector<8x256xf32>
    %c1 = arith.constant 1 : index
    %c32 = arith.constant 32 : index
    %5 = vector.load %arg7[%c1, %c32] : memref<10x320xf32, #tpu.memory_space<vmem>>, vector<8x256xf32>
    tpu.vector_store %arg7[%c1, %c32], %4 {strides = array<i32>} : memref<10x320xf32, #tpu.memory_space<vmem>>, vector<8x256xf32>,
    %cst_4 = arith.constant 0.000000e+00 : f32
    %6 = vector.broadcast %cst_4 : f32 to vector<8x64xf32>
    %c0_5 = arith.constant 0 : index
    %c0_6 = arith.constant 0 : index
    %7 = vector.load %arg7[%c0_5, %c0_6] : memref<10x320xf32, #tpu.memory_space<vmem>>, vector<8x320xf32>
    %8 = arith.truncf %7 : vector<8x320xf32> to vector<8x320xbf16>
    %c0_7 = arith.constant 0 : index
    %c0_8 = arith.constant 0 : index
    %c0_9 = arith.constant 0 : index
    %9 = vector.load %arg2[%c0_7, %c0_8, %c0_9] : memref<3x320x64xbf16, #tpu.memory_space<vmem>>, vector<1x320x64xbf16>
    %10 = vector.shape_cast %9 : vector<1x320x64xbf16> to vector<320x64xbf16>
    %cst_10 = arith.constant dense<0.000000e+00> : vector<8x64xf32>
    %11 = tpu.matmul %8, %10, %cst_10 {dimension_numbers = #tpu.dot_dimension_numbers<[1], [0], [0], [1], [0, 0, 1, 1], [], []>} : vector<8x320xbf16>, vector<320x64xbf16>, vector<8x64xf32> -> vector<8x64xf32>
    %12 = arith.addf %6, %11 : vector<8x64xf32>
    %c1_11 = arith.constant 1 : index
    %c0_12 = arith.constant 0 : index
    %13 = vector.load %arg7[%c1_11, %c0_12] : memref<10x320xf32, #tpu.memory_space<vmem>>, vector<8x320xf32>
    %14 = arith.truncf %13 : vector<8x320xf32> to vector<8x320xbf16>
    %c1_13 = arith.constant 1 : index
    %c0_14 = arith.constant 0 : index
    %c0_15 = arith.constant 0 : index
    %15 = vector.load %arg2[%c1_13, %c0_14, %c0_15] : memref<3x320x64xbf16, #tpu.memory_space<vmem>>, vector<1x320x64xbf16>
    %16 = vector.shape_cast %15 : vector<1x320x64xbf16> to vector<320x64xbf16>
    %cst_16 = arith.constant dense<0.000000e+00> : vector<8x64xf32>
    %17 = tpu.matmul %14, %16, %cst_16 {dimension_numbers = #tpu.dot_dimension_numbers<[1], [0], [0], [1], [0, 0, 1, 1], [], []>} : vector<8x320xbf16>, vector<320x64xbf16>, vector<8x64xf32> -> vector<8x64xf32>
    %18 = arith.addf %12, %17 : vector<8x64xf32>
    %c2 = arith.constant 2 : index
    %c0_17 = arith.constant 0 : index
    %19 = vector.load %arg7[%c2, %c0_17] : memref<10x320xf32, #tpu.memory_space<vmem>>, vector<8x320xf32>
    %20 = arith.truncf %19 : vector<8x320xf32> to vector<8x320xbf16>
    %c2_18 = arith.constant 2 : index
    %c0_19 = arith.constant 0 : index
    %c0_20 = arith.constant 0 : index
    %21 = vector.load %arg2[%c2_18, %c0_19, %c0_20] : memref<3x320x64xbf16, #tpu.memory_space<vmem>>, vector<1x320x64xbf16>
    %22 = vector.shape_cast %21 : vector<1x320x64xbf16> to vector<320x64xbf16>
    %cst_21 = arith.constant dense<0.000000e+00> : vector<8x64xf32>
    %23 = tpu.matmul %20, %22, %cst_21 {dimension_numbers = #tpu.dot_dimension_numbers<[1], [0], [0], [1], [0, 0, 1, 1], [], []>} : vector<8x320xbf16>, vector<320x64xbf16>, vector<8x64xf32> -> vector<8x64xf32>
    %24 = arith.addf %18, %23 : vector<8x64xf32>
    %c0_22 = arith.constant 0 : index
    %c0_23 = arith.constant 0 : index
    %25 = vector.load %arg3[%c0_22, %c0_23] : memref<1x64xf32, #tpu.memory_space<vmem>>, vector<1x64xf32>
    %26 = vector.broadcast %25 : vector<1x64xf32> to vector<8x64xf32>
    %27 = arith.addf %24, %26 : vector<8x64xf32>
    %cst_24 = arith.constant 0.000000e+00 : f32
    %28 = vector.broadcast %cst_24 : f32 to vector<8x64xf32>
    %29 = arith.cmpf oge, %27, %28 : vector<8x64xf32>
    %cst_25 = arith.constant 0.00999999977 : f32
    %30 = vector.broadcast %cst_25 : f32 to vector<8x64xf32>
    %31 = arith.mulf %30, %27 : vector<8x64xf32>
    %32 = arith.select %29, %27, %31 : vector<8x64xi1>, vector<8x64xf32>
    %cst_26 = arith.constant 0.000000e+00 : f32
    %33 = vector.broadcast %cst_26 : f32 to vector<10x80xf32>
    %c0_27 = arith.constant 0 : index
    %c0_28 = arith.constant 0 : index
    %34 = vector.load %arg8[%c0_27, %c0_28] : memref<10x80xf32, #tpu.memory_space<vmem>>, vector<10x80xf32>
    tpu.vector_store %arg8[%c0_27, %c0_28], %33 {strides = array<i32>} : memref<10x80xf32, #tpu.memory_space<vmem>>, vector<10x80xf32>,
    %c1_29 = arith.constant 1 : index
    %c8 = arith.constant 8 : index
    %35 = vector.load %arg8[%c1_29, %c8] : memref<10x80xf32, #tpu.memory_space<vmem>>, vector<8x64xf32>
    tpu.vector_store %arg8[%c1_29, %c8], %32 {strides = array<i32>} : memref<10x80xf32, #tpu.memory_space<vmem>>, vector<8x64xf32>,
    %cst_30 = arith.constant 0.000000e+00 : f32
    %36 = vector.broadcast %cst_30 : f32 to vector<8x64xf32>
    %c0_31 = arith.constant 0 : index
    %c0_32 = arith.constant 0 : index
    %37 = vector.load %arg8[%c0_31, %c0_32] : memref<10x80xf32, #tpu.memory_space<vmem>>, vector<8x80xf32>
    %38 = arith.truncf %37 : vector<8x80xf32> to vector<8x80xbf16>
    %c0_33 = arith.constant 0 : index
    %c0_34 = arith.constant 0 : index
    %c0_35 = arith.constant 0 : index
    %39 = vector.load %arg4[%c0_33, %c0_34, %c0_35] : memref<3x80x64xbf16, #tpu.memory_space<vmem>>, vector<1x80x64xbf16>
    %40 = vector.shape_cast %39 : vector<1x80x64xbf16> to vector<80x64xbf16>
    %cst_36 = arith.constant dense<0.000000e+00> : vector<8x64xf32>
    %41 = tpu.matmul %38, %40, %cst_36 {dimension_numbers = #tpu.dot_dimension_numbers<[1], [0], [0], [1], [0, 0, 1, 1], [], []>} : vector<8x80xbf16>, vector<80x64xbf16>, vector<8x64xf32> -> vector<8x64xf32>
    %42 = arith.addf %36, %41 : vector<8x64xf32>
    %c1_37 = arith.constant 1 : index
    %c0_38 = arith.constant 0 : index
    %43 = vector.load %arg8[%c1_37, %c0_38] : memref<10x80xf32, #tpu.memory_space<vmem>>, vector<8x80xf32>
    %44 = arith.truncf %43 : vector<8x80xf32> to vector<8x80xbf16>
    %c1_39 = arith.constant 1 : index
    %c0_40 = arith.constant 0 : index
    %c0_41 = arith.constant 0 : index
    %45 = vector.load %arg4[%c1_39, %c0_40, %c0_41] : memref<3x80x64xbf16, #tpu.memory_space<vmem>>, vector<1x80x64xbf16>
    %46 = vector.shape_cast %45 : vector<1x80x64xbf16> to vector<80x64xbf16>
    %cst_42 = arith.constant dense<0.000000e+00> : vector<8x64xf32>
    %47 = tpu.matmul %44, %46, %cst_42 {dimension_numbers = #tpu.dot_dimension_numbers<[1], [0], [0], [1], [0, 0, 1, 1], [], []>} : vector<8x80xbf16>, vector<80x64xbf16>, vector<8x64xf32> -> vector<8x64xf32>
    %48 = arith.addf %42, %47 : vector<8x64xf32>
    %c2_43 = arith.constant 2 : index
    %c0_44 = arith.constant 0 : index
    %49 = vector.load %arg8[%c2_43, %c0_44] : memref<10x80xf32, #tpu.memory_space<vmem>>, vector<8x80xf32>
    %50 = arith.truncf %49 : vector<8x80xf32> to vector<8x80xbf16>
    %c2_45 = arith.constant 2 : index
    %c0_46 = arith.constant 0 : index
    %c0_47 = arith.constant 0 : index
    %51 = vector.load %arg4[%c2_45, %c0_46, %c0_47] : memref<3x80x64xbf16, #tpu.memory_space<vmem>>, vector<1x80x64xbf16>
    %52 = vector.shape_cast %51 : vector<1x80x64xbf16> to vector<80x64xbf16>
    %cst_48 = arith.constant dense<0.000000e+00> : vector<8x64xf32>
    %53 = tpu.matmul %50, %52, %cst_48 {dimension_numbers = #tpu.dot_dimension_numbers<[1], [0], [0], [1], [0, 0, 1, 1], [], []>} : vector<8x80xbf16>, vector<80x64xbf16>, vector<8x64xf32> -> vector<8x64xf32>
    %54 = arith.addf %48, %53 : vector<8x64xf32>
    %c0_49 = arith.constant 0 : index
    %c0_50 = arith.constant 0 : index
    %55 = vector.load %arg5[%c0_49, %c0_50] : memref<1x64xf32, #tpu.memory_space<vmem>>, vector<1x64xf32>
    %56 = vector.broadcast %55 : vector<1x64xf32> to vector<8x64xf32>
    %57 = arith.addf %54, %56 : vector<8x64xf32>
    %cst_51 = arith.constant 0.000000e+00 : f32
    %58 = vector.broadcast %cst_51 : f32 to vector<8x64xf32>
    %59 = arith.cmpf oge, %57, %58 : vector<8x64xf32>
    %cst_52 = arith.constant 0.00999999977 : f32
    %60 = vector.broadcast %cst_52 : f32 to vector<8x64xf32>
    %61 = arith.mulf %60, %57 : vector<8x64xf32>
    %62 = arith.select %59, %57, %61 : vector<8x64xi1>, vector<8x64xf32>
    %c0_53 = arith.constant 0 : index
    %c0_54 = arith.constant 0 : index
    %c0_55 = arith.constant 0 : index
    %63 = vector.load %arg6[%c0_53, %c0_54, %c0_55] : memref<1x8x64xf32, #tpu.memory_space<vmem>>, vector<1x8x64xf32>
    %64 = vector.shape_cast %63 : vector<1x8x64xf32> to vector<8x64xf32>
    %65 = vector.shape_cast %62 : vector<8x64xf32> to vector<1x8x64xf32>
    tpu.vector_store %arg6[%c0_53, %c0_54, %c0_55], %65 {strides = array<i32>} : memref<1x8x64xf32, #tpu.memory_space<vmem>>, vector<1x8x64xf32>,
    return
  }
  func.func @transform_0(%arg0: i32) -> (i32, i32, i32) {
    %c0_i32 = arith.constant 0 : i32
    %c0_i32_0 = arith.constant 0 : i32
    %c0_i32_1 = arith.constant 0 : i32
    return %arg0, %c0_i32, %c0_i32_0 : i32, i32, i32
  }
  func.func @transform_1(%arg0: i32) -> (i32, i32, i32) {
    %c0_i32 = arith.constant 0 : i32
    %c0_i32_0 = arith.constant 0 : i32
    %c0_i32_1 = arith.constant 0 : i32
    %c0_i32_2 = arith.constant 0 : i32
    return %c0_i32, %c0_i32_0, %c0_i32_1 : i32, i32, i32
  }
  func.func @transform_2(%arg0: i32) -> (i32, i32) {
    %c0_i32 = arith.constant 0 : i32
    %c0_i32_0 = arith.constant 0 : i32
    %c0_i32_1 = arith.constant 0 : i32
    return %c0_i32, %c0_i32_0 : i32, i32
  }
  func.func @transform_3(%arg0: i32) -> (i32, i32, i32) {
    %c0_i32 = arith.constant 0 : i32
    %c0_i32_0 = arith.constant 0 : i32
    %c0_i32_1 = arith.constant 0 : i32
    %c0_i32_2 = arith.constant 0 : i32
    return %c0_i32, %c0_i32_0, %c0_i32_1 : i32, i32, i32
  }
  func.func @transform_4(%arg0: i32) -> (i32, i32) {
    %c0_i32 = arith.constant 0 : i32
    %c0_i32_0 = arith.constant 0 : i32
    %c0_i32_1 = arith.constant 0 : i32
    return %c0_i32, %c0_i32_0 : i32, i32
  }
  func.func @transform_5(%arg0: i32) -> (i32, i32, i32) {
    %c0_i32 = arith.constant 0 : i32
    %c0_i32_0 = arith.constant 0 : i32
    %c0_i32_1 = arith.constant 0 : i32
    return %arg0, %c0_i32, %c0_i32_0 : i32, i32, i32
  }
}

module attributes {stable_mosaic.version = 11 : i64} {
  func.func @_double_conv_kernel(%arg0: i32, %arg1: memref<1x16x256xbf16, #tpu.memory_space<vmem>>, %arg2: memref<3x288x128xbf16, #tpu.memory_space<vmem>>, %arg3: memref<1x128xf32, #tpu.memory_space<vmem>>, %arg4: memref<3x144x128xbf16, #tpu.memory_space<vmem>>, %arg5: memref<1x128xf32, #tpu.memory_space<vmem>>, %arg6: memref<1x16x128xf32, #tpu.memory_space<vmem>>, %arg7: memref<18x288xf32, #tpu.memory_space<vmem>>, %arg8: memref<18x144xf32, #tpu.memory_space<vmem>>) attributes {dimension_semantics = [#tpu.dimension_semantics<parallel>], iteration_bounds = array<i64: 2>, scalar_prefetch = 0 : i64, scratch_operands = 2 : i64, tpu.core_type = #tpu.core_type<tc>, window_params = [{transform_indices = @transform_0, window_bounds = array<i64: 1, 16, 256>}, {pipeline_mode = #tpu.pipeline_mode<synchronous>, transform_indices = @transform_1, window_bounds = array<i64: 3, 288, 128>}, {pipeline_mode = #tpu.pipeline_mode<synchronous>, transform_indices = @transform_2, window_bounds = array<i64: 1, 128>}, {pipeline_mode = #tpu.pipeline_mode<synchronous>, transform_indices = @transform_3, window_bounds = array<i64: 3, 144, 128>}, {pipeline_mode = #tpu.pipeline_mode<synchronous>, transform_indices = @transform_4, window_bounds = array<i64: 1, 128>}, {transform_indices = @transform_5, window_bounds = array<i64: 1, 16, 128>}]} {
    %cst = arith.constant 0.000000e+00 : f32
    %0 = vector.broadcast %cst : f32 to vector<18x288xf32>
    %c0 = arith.constant 0 : index
    %c0_0 = arith.constant 0 : index
    %1 = vector.load %arg7[%c0, %c0_0] : memref<18x288xf32, #tpu.memory_space<vmem>>, vector<18x288xf32>
    tpu.vector_store %arg7[%c0, %c0_0], %0 {strides = array<i32>} : memref<18x288xf32, #tpu.memory_space<vmem>>, vector<18x288xf32>,
    %c0_1 = arith.constant 0 : index
    %c0_2 = arith.constant 0 : index
    %c0_3 = arith.constant 0 : index
    %2 = vector.load %arg1[%c0_1, %c0_2, %c0_3] : memref<1x16x256xbf16, #tpu.memory_space<vmem>>, vector<1x16x256xbf16>
    %3 = vector.shape_cast %2 : vector<1x16x256xbf16> to vector<16x256xbf16>
    %4 = arith.extf %3 : vector<16x256xbf16> to vector<16x256xf32>
    %c1 = arith.constant 1 : index
    %c16 = arith.constant 16 : index
    %5 = vector.load %arg7[%c1, %c16] : memref<18x288xf32, #tpu.memory_space<vmem>>, vector<16x256xf32>
    tpu.vector_store %arg7[%c1, %c16], %4 {strides = array<i32>} : memref<18x288xf32, #tpu.memory_space<vmem>>, vector<16x256xf32>,
    %cst_4 = arith.constant 0.000000e+00 : f32
    %6 = vector.broadcast %cst_4 : f32 to vector<16x128xf32>
    %c0_5 = arith.constant 0 : index
    %c0_6 = arith.constant 0 : index
    %7 = vector.load %arg7[%c0_5, %c0_6] : memref<18x288xf32, #tpu.memory_space<vmem>>, vector<16x288xf32>
    %8 = arith.truncf %7 : vector<16x288xf32> to vector<16x288xbf16>
    %c0_7 = arith.constant 0 : index
    %c0_8 = arith.constant 0 : index
    %c0_9 = arith.constant 0 : index
    %9 = vector.load %arg2[%c0_7, %c0_8, %c0_9] : memref<3x288x128xbf16, #tpu.memory_space<vmem>>, vector<1x288x128xbf16>
    %10 = vector.shape_cast %9 : vector<1x288x128xbf16> to vector<288x128xbf16>
    %cst_10 = arith.constant dense<0.000000e+00> : vector<16x128xf32>
    %11 = tpu.matmul %8, %10, %cst_10 {dimension_numbers = #tpu.dot_dimension_numbers<[1], [0], [0], [1], [0, 0, 1, 1], [], []>} : vector<16x288xbf16>, vector<288x128xbf16>, vector<16x128xf32> -> vector<16x128xf32>
    %12 = arith.addf %6, %11 : vector<16x128xf32>
    %c1_11 = arith.constant 1 : index
    %c0_12 = arith.constant 0 : index
    %13 = vector.load %arg7[%c1_11, %c0_12] : memref<18x288xf32, #tpu.memory_space<vmem>>, vector<16x288xf32>
    %14 = arith.truncf %13 : vector<16x288xf32> to vector<16x288xbf16>
    %c1_13 = arith.constant 1 : index
    %c0_14 = arith.constant 0 : index
    %c0_15 = arith.constant 0 : index
    %15 = vector.load %arg2[%c1_13, %c0_14, %c0_15] : memref<3x288x128xbf16, #tpu.memory_space<vmem>>, vector<1x288x128xbf16>
    %16 = vector.shape_cast %15 : vector<1x288x128xbf16> to vector<288x128xbf16>
    %cst_16 = arith.constant dense<0.000000e+00> : vector<16x128xf32>
    %17 = tpu.matmul %14, %16, %cst_16 {dimension_numbers = #tpu.dot_dimension_numbers<[1], [0], [0], [1], [0, 0, 1, 1], [], []>} : vector<16x288xbf16>, vector<288x128xbf16>, vector<16x128xf32> -> vector<16x128xf32>
    %18 = arith.addf %12, %17 : vector<16x128xf32>
    %c2 = arith.constant 2 : index
    %c0_17 = arith.constant 0 : index
    %19 = vector.load %arg7[%c2, %c0_17] : memref<18x288xf32, #tpu.memory_space<vmem>>, vector<16x288xf32>
    %20 = arith.truncf %19 : vector<16x288xf32> to vector<16x288xbf16>
    %c2_18 = arith.constant 2 : index
    %c0_19 = arith.constant 0 : index
    %c0_20 = arith.constant 0 : index
    %21 = vector.load %arg2[%c2_18, %c0_19, %c0_20] : memref<3x288x128xbf16, #tpu.memory_space<vmem>>, vector<1x288x128xbf16>
    %22 = vector.shape_cast %21 : vector<1x288x128xbf16> to vector<288x128xbf16>
    %cst_21 = arith.constant dense<0.000000e+00> : vector<16x128xf32>
    %23 = tpu.matmul %20, %22, %cst_21 {dimension_numbers = #tpu.dot_dimension_numbers<[1], [0], [0], [1], [0, 0, 1, 1], [], []>} : vector<16x288xbf16>, vector<288x128xbf16>, vector<16x128xf32> -> vector<16x128xf32>
    %24 = arith.addf %18, %23 : vector<16x128xf32>
    %c0_22 = arith.constant 0 : index
    %c0_23 = arith.constant 0 : index
    %25 = vector.load %arg3[%c0_22, %c0_23] : memref<1x128xf32, #tpu.memory_space<vmem>>, vector<1x128xf32>
    %26 = vector.broadcast %25 : vector<1x128xf32> to vector<16x128xf32>
    %27 = arith.addf %24, %26 : vector<16x128xf32>
    %cst_24 = arith.constant 0.000000e+00 : f32
    %28 = vector.broadcast %cst_24 : f32 to vector<16x128xf32>
    %29 = arith.cmpf oge, %27, %28 : vector<16x128xf32>
    %cst_25 = arith.constant 0.00999999977 : f32
    %30 = vector.broadcast %cst_25 : f32 to vector<16x128xf32>
    %31 = arith.mulf %30, %27 : vector<16x128xf32>
    %32 = arith.select %29, %27, %31 : vector<16x128xi1>, vector<16x128xf32>
    %cst_26 = arith.constant 0.000000e+00 : f32
    %33 = vector.broadcast %cst_26 : f32 to vector<18x144xf32>
    %c0_27 = arith.constant 0 : index
    %c0_28 = arith.constant 0 : index
    %34 = vector.load %arg8[%c0_27, %c0_28] : memref<18x144xf32, #tpu.memory_space<vmem>>, vector<18x144xf32>
    tpu.vector_store %arg8[%c0_27, %c0_28], %33 {strides = array<i32>} : memref<18x144xf32, #tpu.memory_space<vmem>>, vector<18x144xf32>,
    %c1_29 = arith.constant 1 : index
    %c8 = arith.constant 8 : index
    %35 = vector.load %arg8[%c1_29, %c8] : memref<18x144xf32, #tpu.memory_space<vmem>>, vector<16x128xf32>
    tpu.vector_store %arg8[%c1_29, %c8], %32 {strides = array<i32>} : memref<18x144xf32, #tpu.memory_space<vmem>>, vector<16x128xf32>,
    %cst_30 = arith.constant 0.000000e+00 : f32
    %36 = vector.broadcast %cst_30 : f32 to vector<16x128xf32>
    %c0_31 = arith.constant 0 : index
    %c0_32 = arith.constant 0 : index
    %37 = vector.load %arg8[%c0_31, %c0_32] : memref<18x144xf32, #tpu.memory_space<vmem>>, vector<16x144xf32>
    %38 = arith.truncf %37 : vector<16x144xf32> to vector<16x144xbf16>
    %c0_33 = arith.constant 0 : index
    %c0_34 = arith.constant 0 : index
    %c0_35 = arith.constant 0 : index
    %39 = vector.load %arg4[%c0_33, %c0_34, %c0_35] : memref<3x144x128xbf16, #tpu.memory_space<vmem>>, vector<1x144x128xbf16>
    %40 = vector.shape_cast %39 : vector<1x144x128xbf16> to vector<144x128xbf16>
    %cst_36 = arith.constant dense<0.000000e+00> : vector<16x128xf32>
    %41 = tpu.matmul %38, %40, %cst_36 {dimension_numbers = #tpu.dot_dimension_numbers<[1], [0], [0], [1], [0, 0, 1, 1], [], []>} : vector<16x144xbf16>, vector<144x128xbf16>, vector<16x128xf32> -> vector<16x128xf32>
    %42 = arith.addf %36, %41 : vector<16x128xf32>
    %c1_37 = arith.constant 1 : index
    %c0_38 = arith.constant 0 : index
    %43 = vector.load %arg8[%c1_37, %c0_38] : memref<18x144xf32, #tpu.memory_space<vmem>>, vector<16x144xf32>
    %44 = arith.truncf %43 : vector<16x144xf32> to vector<16x144xbf16>
    %c1_39 = arith.constant 1 : index
    %c0_40 = arith.constant 0 : index
    %c0_41 = arith.constant 0 : index
    %45 = vector.load %arg4[%c1_39, %c0_40, %c0_41] : memref<3x144x128xbf16, #tpu.memory_space<vmem>>, vector<1x144x128xbf16>
    %46 = vector.shape_cast %45 : vector<1x144x128xbf16> to vector<144x128xbf16>
    %cst_42 = arith.constant dense<0.000000e+00> : vector<16x128xf32>
    %47 = tpu.matmul %44, %46, %cst_42 {dimension_numbers = #tpu.dot_dimension_numbers<[1], [0], [0], [1], [0, 0, 1, 1], [], []>} : vector<16x144xbf16>, vector<144x128xbf16>, vector<16x128xf32> -> vector<16x128xf32>
    %48 = arith.addf %42, %47 : vector<16x128xf32>
    %c2_43 = arith.constant 2 : index
    %c0_44 = arith.constant 0 : index
    %49 = vector.load %arg8[%c2_43, %c0_44] : memref<18x144xf32, #tpu.memory_space<vmem>>, vector<16x144xf32>
    %50 = arith.truncf %49 : vector<16x144xf32> to vector<16x144xbf16>
    %c2_45 = arith.constant 2 : index
    %c0_46 = arith.constant 0 : index
    %c0_47 = arith.constant 0 : index
    %51 = vector.load %arg4[%c2_45, %c0_46, %c0_47] : memref<3x144x128xbf16, #tpu.memory_space<vmem>>, vector<1x144x128xbf16>
    %52 = vector.shape_cast %51 : vector<1x144x128xbf16> to vector<144x128xbf16>
    %cst_48 = arith.constant dense<0.000000e+00> : vector<16x128xf32>
    %53 = tpu.matmul %50, %52, %cst_48 {dimension_numbers = #tpu.dot_dimension_numbers<[1], [0], [0], [1], [0, 0, 1, 1], [], []>} : vector<16x144xbf16>, vector<144x128xbf16>, vector<16x128xf32> -> vector<16x128xf32>
    %54 = arith.addf %48, %53 : vector<16x128xf32>
    %c0_49 = arith.constant 0 : index
    %c0_50 = arith.constant 0 : index
    %55 = vector.load %arg5[%c0_49, %c0_50] : memref<1x128xf32, #tpu.memory_space<vmem>>, vector<1x128xf32>
    %56 = vector.broadcast %55 : vector<1x128xf32> to vector<16x128xf32>
    %57 = arith.addf %54, %56 : vector<16x128xf32>
    %cst_51 = arith.constant 0.000000e+00 : f32
    %58 = vector.broadcast %cst_51 : f32 to vector<16x128xf32>
    %59 = arith.cmpf oge, %57, %58 : vector<16x128xf32>
    %cst_52 = arith.constant 0.00999999977 : f32
    %60 = vector.broadcast %cst_52 : f32 to vector<16x128xf32>
    %61 = arith.mulf %60, %57 : vector<16x128xf32>
    %62 = arith.select %59, %57, %61 : vector<16x128xi1>, vector<16x128xf32>
    %c0_53 = arith.constant 0 : index
    %c0_54 = arith.constant 0 : index
    %c0_55 = arith.constant 0 : index
    %63 = vector.load %arg6[%c0_53, %c0_54, %c0_55] : memref<1x16x128xf32, #tpu.memory_space<vmem>>, vector<1x16x128xf32>
    %64 = vector.shape_cast %63 : vector<1x16x128xf32> to vector<16x128xf32>
    %65 = vector.shape_cast %62 : vector<16x128xf32> to vector<1x16x128xf32>
    tpu.vector_store %arg6[%c0_53, %c0_54, %c0_55], %65 {strides = array<i32>} : memref<1x16x128xf32, #tpu.memory_space<vmem>>, vector<1x16x128xf32>,
    return
  }
  func.func @transform_0(%arg0: i32) -> (i32, i32, i32) {
    %c0_i32 = arith.constant 0 : i32
    %c0_i32_0 = arith.constant 0 : i32
    %c0_i32_1 = arith.constant 0 : i32
    return %arg0, %c0_i32, %c0_i32_0 : i32, i32, i32
  }
  func.func @transform_1(%arg0: i32) -> (i32, i32, i32) {
    %c0_i32 = arith.constant 0 : i32
    %c0_i32_0 = arith.constant 0 : i32
    %c0_i32_1 = arith.constant 0 : i32
    %c0_i32_2 = arith.constant 0 : i32
    return %c0_i32, %c0_i32_0, %c0_i32_1 : i32, i32, i32
  }
  func.func @transform_2(%arg0: i32) -> (i32, i32) {
    %c0_i32 = arith.constant 0 : i32
    %c0_i32_0 = arith.constant 0 : i32
    %c0_i32_1 = arith.constant 0 : i32
    return %c0_i32, %c0_i32_0 : i32, i32
  }
  func.func @transform_3(%arg0: i32) -> (i32, i32, i32) {
    %c0_i32 = arith.constant 0 : i32
    %c0_i32_0 = arith.constant 0 : i32
    %c0_i32_1 = arith.constant 0 : i32
    %c0_i32_2 = arith.constant 0 : i32
    return %c0_i32, %c0_i32_0, %c0_i32_1 : i32, i32, i32
  }
  func.func @transform_4(%arg0: i32) -> (i32, i32) {
    %c0_i32 = arith.constant 0 : i32
    %c0_i32_0 = arith.constant 0 : i32
    %c0_i32_1 = arith.constant 0 : i32
    return %c0_i32, %c0_i32_0 : i32, i32
  }
  func.func @transform_5(%arg0: i32) -> (i32, i32, i32) {
    %c0_i32 = arith.constant 0 : i32
    %c0_i32_0 = arith.constant 0 : i32
    %c0_i32_1 = arith.constant 0 : i32
    return %arg0, %c0_i32, %c0_i32_0 : i32, i32, i32
  }
}

module attributes {stable_mosaic.version = 11 : i64} {
  func.func @_conv1x1_kernel(%arg0: i32, %arg1: memref<1x16x128xbf16, #tpu.memory_space<vmem>>, %arg2: memref<128x16xbf16, #tpu.memory_space<vmem>>, %arg3: memref<1x16xf32, #tpu.memory_space<vmem>>, %arg4: memref<1x16x16xf32, #tpu.memory_space<vmem>>) attributes {dimension_semantics = [#tpu.dimension_semantics<parallel>], iteration_bounds = array<i64: 2>, scalar_prefetch = 0 : i64, scratch_operands = 0 : i64, tpu.core_type = #tpu.core_type<tc>, window_params = [{transform_indices = @transform_0, window_bounds = array<i64: 1, 16, 128>}, {pipeline_mode = #tpu.pipeline_mode<synchronous>, transform_indices = @transform_1, window_bounds = array<i64: 128, 16>}, {pipeline_mode = #tpu.pipeline_mode<synchronous>, transform_indices = @transform_2, window_bounds = array<i64: 1, 16>}, {transform_indices = @transform_3, window_bounds = array<i64: 1, 16, 16>}]} {
    %c0 = arith.constant 0 : index
    %c0_0 = arith.constant 0 : index
    %c0_1 = arith.constant 0 : index
    %0 = vector.load %arg1[%c0, %c0_0, %c0_1] : memref<1x16x128xbf16, #tpu.memory_space<vmem>>, vector<1x16x128xbf16>
    %1 = vector.shape_cast %0 : vector<1x16x128xbf16> to vector<16x128xbf16>
    %c0_2 = arith.constant 0 : index
    %c0_3 = arith.constant 0 : index
    %2 = vector.load %arg2[%c0_2, %c0_3] : memref<128x16xbf16, #tpu.memory_space<vmem>>, vector<128x16xbf16>
    %cst = arith.constant dense<0.000000e+00> : vector<16x16xf32>
    %3 = tpu.matmul %1, %2, %cst {dimension_numbers = #tpu.dot_dimension_numbers<[1], [0], [0], [1], [0, 0, 1, 1], [], []>} : vector<16x128xbf16>, vector<128x16xbf16>, vector<16x16xf32> -> vector<16x16xf32>
    %c0_4 = arith.constant 0 : index
    %c0_5 = arith.constant 0 : index
    %4 = vector.load %arg3[%c0_4, %c0_5] : memref<1x16xf32, #tpu.memory_space<vmem>>, vector<1x16xf32>
    %5 = vector.broadcast %4 : vector<1x16xf32> to vector<16x16xf32>
    %6 = arith.addf %3, %5 : vector<16x16xf32>
    %c0_6 = arith.constant 0 : index
    %c0_7 = arith.constant 0 : index
    %c0_8 = arith.constant 0 : index
    %7 = vector.load %arg4[%c0_6, %c0_7, %c0_8] : memref<1x16x16xf32, #tpu.memory_space<vmem>>, vector<1x16x16xf32>
    %8 = vector.shape_cast %7 : vector<1x16x16xf32> to vector<16x16xf32>
    %9 = vector.shape_cast %6 : vector<16x16xf32> to vector<1x16x16xf32>
    tpu.vector_store %arg4[%c0_6, %c0_7, %c0_8], %9 {strides = array<i32>} : memref<1x16x16xf32, #tpu.memory_space<vmem>>, vector<1x16x16xf32>,
    return
  }
  func.func @transform_0(%arg0: i32) -> (i32, i32, i32) {
    %c0_i32 = arith.constant 0 : i32
    %c0_i32_0 = arith.constant 0 : i32
    %c0_i32_1 = arith.constant 0 : i32
    return %arg0, %c0_i32, %c0_i32_0 : i32, i32, i32
  }
  func.func @transform_1(%arg0: i32) -> (i32, i32) {
    %c0_i32 = arith.constant 0 : i32
    %c0_i32_0 = arith.constant 0 : i32
    %c0_i32_1 = arith.constant 0 : i32
    return %c0_i32, %c0_i32_0 : i32, i32
  }
  func.func @transform_2(%arg0: i32) -> (i32, i32) {
    %c0_i32 = arith.constant 0 : i32
    %c0_i32_0 = arith.constant 0 : i32
    %c0_i32_1 = arith.constant 0 : i32
    return %c0_i32, %c0_i32_0 : i32, i32
  }
  func.func @transform_3(%arg0: i32) -> (i32, i32, i32) {
    %c0_i32 = arith.constant 0 : i32
    %c0_i32_0 = arith.constant 0 : i32
    %c0_i32_1 = arith.constant 0 : i32
    return %arg0, %c0_i32, %c0_i32_0 : i32, i32, i32
  }
}

</mosaic_0001>

<bundles_post_ra>
// kernel: tile.68
= control target key start
LH: loop header
LB: loop body
LE: loop exit
PB: predicated region body
PF: predicated region fallthrough
CT: control target
= control target key end

     0   :  { %s28_s0 = inlined_call_operand.vmem [shape: f32[8], index: 0, kind: input, shape index: {}]   ;;  %s29_s1 = inlined_call_operand.vmem [shape: f32[16,8], index: 1, kind: output, shape index: {}]  }
   0x1   :  { %v4_v0 = vld [vmem:[%s28_s0] ss:$0 sm:$0xff] }
   0x2   :  { %5 = vst [vmem:[%s29_s1] sm:$0xff] %v4_v0 }
   0x3   :  { %8 = vst [vmem:[%s29_s1 + $0x8] sm:$0xff] %v4_v0 }

// kernel: tile.69
= control target key start
LH: loop header
LB: loop body
LE: loop exit
PB: predicated region body
PF: predicated region fallthrough
CT: control target
= control target key end

     0   :  { %s131_s10 = smov 120   ;;  %s132_s11 = smov 104   ;;  %vm3_vm0 = vcmask 64512   ;;  %vm9_vm1 = vcmask 1048512   ;;  %vm15_vm2 = vcmask 982912   ;;  %vm21_vm3 = vcmask 917312   ;;  %s207_s0 = inlined_call_operand.vmem [shape: f32[16,8], index: 0, kind: input, shape index: {}]   ;;  %s208_s1 = inlined_call_operand.vmem [shape: f32[1,128], index: 1, kind: output, shape index: {}]  }
   0x1   :  { %v101_v0 = vld [vmem:[%s207_s0 + $0xf] sm:$0x1]   ;;  %v103_v1 = vld [vmem:[%s207_s0 + $0xd] sm:$0x1]   ;;  %v105_v2 = vld [vmem:[%s207_s0 + $0xb] sm:$0x1]  }
   0x2   :  { %7 = vrot.lane.b32.xlu0 %v101_v0, %s131_s10  ;;  %19 = vrot.lane.b32.xlu1 %v103_v1, %s132_s11  ;;  %s133_s14 = smov 88   ;;  %v102_v3 = vld [vmem:[%s207_s0 + $0xe] sm:$0x1]   ;;  %v104_v4 = vld [vmem:[%s207_s0 + $0xc] sm:$0x1]   ;;  %s134_s19 = smov 112  }
   0x3   :  { %31 = vrot.lane.b32.xlu2 %v105_v2, %s133_s14  ;;  %s135_s20 = smov 96   ;;  %v106_v5 = vld [vmem:[%s207_s0 + $0xa] sm:$0x1]   ;;  %s136_s23 = smov 80   ;;  %v107_v6 = vld [vmem:[%s207_s0 + $0x9] sm:$0x1]  }
   0x4   :  { %v108_v7 = vld [vmem:[%s207_s0 + $0x8] sm:$0x1]   ;;  %s137_s28 = smov 72   ;;  %s138_s29 = smov 64   ;;  %v109_v8 = vld [vmem:[%s207_s0 + $0x7] sm:$0x1]  }
   0x5   :  { %s139_s3 = smov 56   ;;  %v110_v9 = vld [vmem:[%s207_s0 + $0x6] sm:$0x1]   ;;  %v111_v10 = vld [vmem:[%s207_s0 + $0x5] sm:$0x1]   ;;  %s140_s8 = smov 48  }
   0x6   :  { %s141_s9 = smov 40   ;;  %v112_v11 = vld [vmem:[%s207_s0 + $0x4] sm:$0x1]   ;;  %s142_s12 = smov 32   ;;  %v113_v12 = vld [vmem:[%s207_s0 + $0x3] sm:$0x1]  }
   0x7   :  { %v114_v13 = vld [vmem:[%s207_s0 + $0x2] sm:$0x1]   ;;  %s143_s17 = smov 24   ;;  %s144_s18 = smov 16   ;;  %v115_v14 = vld [vmem:[%s207_s0 + $0x1] sm:$0x1]  }
   0x8   :  { %s145_s21 = smov 8   ;;  %v2_v15 = vld [vmem:[%s207_s0] sm:$0x1]   ;;  %vm27_vm4 = vcmask 851712   ;;  %vm33_vm5 = vcmask 786112   ;;  %vm39_vm6 = vcmask 720512  }
   0x9   :  { %4 = vst.msk [vmem:[#allocation0] sm:$0x1] %vm3_vm0, %v2_v15   ;;  %vm45_vm7 = vcmask 654912   ;;  %vm51_vm8 = vcmask 589312   ;;  %vm57_vm9 = vcmask 523712   ;;  %vm63_vm10 = vcmask 458112  }
   0xa   :  { %13 = vrot.lane.b32.xlu0 %v102_v3, %s134_s19  ;;  %25 = vrot.lane.b32.xlu1 %v104_v4, %s135_s20  ;;  %vm69_vm11 = vcmask 392512   ;;  %vm75_vm12 = vcmask 326912   ;;  %vm81_vm13 = vcmask 261312   ;;  %vm87_vm14 = vcmask 195712  }
   0xb   :  { %37 = vrot.lane.b32.xlu2 %v106_v5, %s136_s23  ;;  %vm93_vm15 = vcmask 130112  }
  0x12   :  { %43 = vrot.lane.b32.xlu0 %v107_v6, %s137_s28  ;;  %49 = vrot.lane.b32.xlu1 %v108_v7, %s138_s29 }
  0x13   :  { %55 = vrot.lane.b32.xlu2 %v109_v8, %s139_s3 }
  0x1a   :  { %61 = vrot.lane.b32.xlu0 %v110_v9, %s140_s8  ;;  %67 = vrot.lane.b32.xlu1 %v111_v10, %s141_s9 }
  0x1b   :  { %73 = vrot.lane.b32.xlu2 %v112_v11, %s142_s12 }
  0x22   :  { %79 = vrot.lane.b32.xlu0 %v113_v12, %s143_s17  ;;  %85 = vrot.lane.b32.xlu1 %v114_v13, %s144_s18 }
  0x23   :  { %91 = vrot.lane.b32.xlu2 %v115_v14, %s145_s21 }
  0x5d   :  { %v32_v16 = vpop.permute.xlu2 %31  }
  0x65   :  { %v38_v17 = vpop.permute.xlu2 %37  }
  0x6d   :  { %v56_v18 = vpop.permute.xlu2 %55  }
  0x74   :  { %v8_v19 = vpop.permute.xlu0 %7   ;;  %v20_v20 = vpop.permute.xlu1 %19  }
  0x75   :  { %10 = vst.msk [vmem:[#allocation0] sm:$0x1] %vm9_vm1, %v8_v19   ;;  %v74_v21 = vpop.permute.xlu2 %73  }
  0x7c   :  { %v14_v22 = vpop.permute.xlu0 %13   ;;  %v26_v23 = vpop.permute.xlu1 %25  }
  0x7d   :  { %16 = vst.msk [vmem:[#allocation0] sm:$0x1] %vm15_vm2, %v14_v22   ;;  %v92_v24 = vpop.permute.xlu2 %91  }
  0x7e   :  { %22 = vst.msk [vmem:[#allocation0] sm:$0x1] %vm21_vm3, %v20_v20  }
  0x7f   :  { %28 = vst.msk [vmem:[#allocation0] sm:$0x1] %vm27_vm4, %v26_v23  }
  0x80   :  { %34 = vst.msk [vmem:[#allocation0] sm:$0x1] %vm33_vm5, %v32_v16  }
  0x81   :  { %40 = vst.msk [vmem:[#allocation0] sm:$0x1] %vm39_vm6, %v38_v17  }
  0x84   :  { %v44_v25 = vpop.permute.xlu0 %43   ;;  %v50_v26 = vpop.permute.xlu1 %49  }
  0x85   :  { %46 = vst.msk [vmem:[#allocation0] sm:$0x1] %vm45_vm7, %v44_v25  }
  0x86   :  { %52 = vst.msk [vmem:[#allocation0] sm:$0x1] %vm51_vm8, %v50_v26  }
  0x87   :  { %58 = vst.msk [vmem:[#allocation0] sm:$0x1] %vm57_vm9, %v56_v18  }
  0x8c   :  { %v62_v27 = vpop.permute.xlu0 %61   ;;  %v68_v28 = vpop.permute.xlu1 %67  }
  0x8d   :  { %64 = vst.msk [vmem:[#allocation0] sm:$0x1] %vm63_vm10, %v62_v27  }
  0x8e   :  { %70 = vst.msk [vmem:[#allocation0] sm:$0x1] %vm69_vm11, %v68_v28  }
  0x8f   :  { %76 = vst.msk [vmem:[#allocation0] sm:$0x1] %vm75_vm12, %v74_v21  }
  0x94   :  { %v80_v29 = vpop.permute.xlu0 %79   ;;  %v86_v30 = vpop.permute.xlu1 %85  }
  0x95   :  { %82 = vst.msk [vmem:[#allocation0] sm:$0x1] %vm81_vm13, %v80_v29  }
  0x96   :  { %88 = vst.msk [vmem:[#allocation0] sm:$0x1] %vm87_vm14, %v86_v30  }
  0x97   :  { %94 = vst.msk [vmem:[#allocation0] sm:$0x1] %vm93_vm15, %v92_v24  }
  0x9e   :  { %v97_v31 = vld [vmem:[#allocation0] sm:$0x1] }
  0x9f   :  { %100 = vst [vmem:[%s208_s1] sm:$0x1] %v97_v31 }

// kernel: unet_forward.7
= control target key start
LH: loop header
LB: loop body
LE: loop exit
PB: predicated region body
PF: predicated region fallthrough
CT: control target
= control target key end

     0   :  { %s1248_s18 = smov 0   ;;  %s1420_s0 = inlined_call_operand.vmem [shape: bf16[2,16,64], index: 0, kind: input, shape index: {}]   ;;  %s1421_s1 = inlined_call_operand.vmem [shape: bf16[3,72,128], index: 1, kind: input, shape index: {}]   ;;  %s1422_s2 = inlined_call_operand.vmem [shape: f32[1,128], index: 2, kind: input, shape index: {}]   ;;  %s1423_s3 = inlined_call_operand.vmem [shape: bf16[3,144,128], index: 3, kind: input, shape index: {}]   ;;  %s1424_s4 = inlined_call_operand.vmem [shape: f32[1,128], index: 4, kind: input, shape index: {}]   ;;  %s1425_s5 = inlined_call_operand.vmem [shape: f32[2,16,128], index: 5, kind: output, shape index: {}]  }
   0x1 LB: > { %s917_s19 = sadd.s32 4294967295, %s1213_s18   ;;  %p921_p0 = scmp.ge.s32.totalorder %s1213_s18, 1  ;;  %s1213_s18 = sphi %s1248_s18, %s15_s18  }
   0x2   : > { %p187_p1 = scmp.lt.s32.totalorder %s1213_s18, 3 }
   0x4   : > { %p188_p2 = pnand %p921_p0, %p187_p1 }
   0x5   : > { %p215_p3 = scmp.lt.s32.totalorder (!%p188_p2), %s917_s19, 1  ;;  %s1215_s11 = smov (!%p188_p2), 4  }
   0x6   : > { %191 = sbr.rel (%p188_p2) target bundleno = 605 (0x25d), region = 40  ;;  %s1217_s23 = smov (!%p188_p2), 8  }
   0xb   : > { %v934_v0 = vld [vmem:[%s1421_s1 + $0x44] sm:$0xf]  ;;  %v257_v2 = vld [vmem:[%s1421_s1 + $0x20] sm:$0xf]  ;;  %v977_v3 = vld [vmem:[%s1421_s1 + $0x68] sm:$0xf] }
   0xc   : > { %v288_v1 = vunpack.c.l.b16 %v934_v0  ;;  %s1427_s19 = smov (!%p215_p3, %s917_s19), 1  ;;  %vm301_vm0 = vcmask 1043456   ;;  %v336_v4 = vunpack.c.l.b16 %v257_v2  ;;  %v396_v5 = vunpack.c.l.b16 %v977_v3  ;;  %v1153_v13 = vld [vmem:[%s1421_s1 + $0x3c] sm:$0xff]  ;;  %v1152_v19 = vld [vmem:[%s1421_s1 + $0x34] sm:$0xff]  ;;  %v1151_v22 = vld [vmem:[%s1421_s1 + $0x2c] sm:$0xff] }
   0xd   : > { %s1144_s26 = sshll.u32 %s1427_s19, 3  ;;  %v1149_v16 = vld [vmem:[%s1421_s1 + $0x18] sm:$0xff]  ;;  %v1157_v17 = vld [vmem:[%s1421_s1 + $0x60] sm:$0xff]  ;;  %v1148_v20 = vld [vmem:[%s1421_s1 + $0x10] sm:$0xff]  ;;  %vm226_vm1 = vcmask 588800   ;;  %vm229_vm2 = vcmask 582656  }
   0xe   : > { %v293_v6 = vpack.c.b16 %v288_v1, %v288_v1  ;;  %v341_v7 = vpack.c.b16 %v336_v4, %v336_v4  ;;  %v401_v8 = vpack.c.b16 %v396_v5, %v396_v5  ;;  %s219_s29 = scalar_lea.vmem %s1420_s0, %s1144_s26  ;;  %v1156_v21 = vld [vmem:[%s1421_s1 + $0x58] sm:$0xff]  ;;  %v1147_v23 = vld [vmem:[%s1421_s1 + $0x8] sm:$0xff]  ;;  %v1216_v24 = vmov 0.0   ;;  %v1155_v25 = vld [vmem:[%s1421_s1 + $0x50] sm:$0xff]  ;;  %s1145_s22 = sshll.u32 %s1427_s19, 4 }
   0xf   : > { %v1186_v10 = vld [vmem:[%s219_s29] sm:$0xff]   ;;  %227 = vst.msk [vmem:[#allocation2] sm:$0xff] %vm226_vm1, %v1216_v24  ;;  %v1154_v28 = vld [vmem:[%s1421_s1 + $0x48] sm:$0xff]  ;;  %vm243_vm3 = vcmask 556064   ;;  %v1165_v44 = vld [vmem:[%s1423_s3 + $0x38] sm:$0xff]  ;;  %vm441_vm4 = vcmask 130048   ;;  %s224_s25 = scalar_lea.vmem %s1425_s5, %s1145_s22 }
  0x10   : > { %v303_v9 = vsel %vm301_vm0, %v293_v6, 0  ;;  %v350_v11 = vsel %vm301_vm0, %v341_v7, 0  ;;  %v410_v12 = vsel %vm301_vm0, %v401_v8, 0  ;;  %v1187_v14 = vunpack.c.l.bf16 %v1186_v10  ;;  %228 = vst.msk [vmem:[#allocation2 + $0x8] sm:$0xff] %vm226_vm1, %v1216_v24  ;;  %v1150_v26 = vld [vmem:[%s1421_s1 + $0x24] sm:$0xff]  ;;  %v1173_v45 = vld [vmem:[%s1423_s3 + $0x78] sm:$0xff] }
  0x11   : > { %308 = vmatpush.bf16.msra.mxu0 %v303_v9  ;;  %v1188_v15 = vunpack.c.h.bf16 %v1186_v10  ;;  %355 = vmatpush.bf16.msra.mxu1 %v350_v11  ;;  %230 = vst.msk [vmem:[#allocation2 + $0x10] sm:$0x3] %vm229_vm2, %v1216_v24  ;;  %v1146_v27 = vld [vmem:[%s1421_s1] sm:$0xff]  ;;  %v1164_v46 = vld [vmem:[%s1423_s3 + $0x30] sm:$0xff]  ;;  %v1163_v52 = vld [vmem:[%s1423_s3 + $0x28] sm:$0xff]  ;;  %vm450_vm7 = vcmask 1040384  }
  0x12   : > { %415 = vmatpush.bf16.msra.mxu2 %v410_v12  ;;  %440 = vst [vmem:[#allocation3] sm:$0xff] %v1216_v24  ;;  %v1174_v43 = vld [vmem:[%s1423_s3 + $0x80] sm:$0xff]  ;;  %v1172_v51 = vld [vmem:[%s1423_s3 + $0x70] sm:$0xff]  ;;  %v1171_v3 = vld [vmem:[%s1423_s3 + $0x68] sm:$0xff]  ;;  %vm446_vm8 = vcmask 123904   ;;  %vm463_vm9 = vcmask 1047617  }
  0x13   : > { %v1200_v18 = vpack.i.bf16 %v1188_v15, %v1187_v14  ;;  %443 = vst [vmem:[#allocation3 + $0x10] sm:$0xff] %v1216_v24  ;;  %609 = vmatpush.bf16.msra.mxu3 %v1174_v43  ;;  %v1205_v48 = vld [vmem:[%s1422_s2] ss:$0 sm:$0xff]  ;;  %v1161_v6 = vld [vmem:[%s1423_s3 + $0x18] sm:$0xff]  ;;  %v1160_v8 = vld [vmem:[%s1423_s3 + $0x10] sm:$0xff]  ;;  %vm465_vm10 = vcmask 64513  }
  0x14   : > { %445 = vst [vmem:[#allocation3 + $0x20] sm:$0x3] %v1216_v24  ;;  %v1162_v4 = vld [vmem:[%s1423_s3 + $0x20] sm:$0xff]  ;;  %v1169_v7 = vld [vmem:[%s1423_s3 + $0x58] sm:$0xff]  ;;  %v1168_v9 = vld [vmem:[%s1423_s3 + $0x50] sm:$0xff]  ;;  %vm467_vm11 = vcmask 1047616  }
  0x15   : > { %309 = vmatpush.bf16.msra.mxu0 %v1153_v13  ;;  %1201 = vrot.lane.b32.xlu0 %v1200_v18, %s1215_s11  ;;  %442 = vst.msk [vmem:[#allocation3 + $0x8] sm:$0xff] %vm441_vm4, %v1216_v24  ;;  %v1170_v5 = vld [vmem:[%s1423_s3 + $0x60] sm:$0xff]  ;;  %v1159_v10 = vld [vmem:[%s1423_s3 + $0x8] sm:$0xff]  ;;  %v1180_v18 = vld [vmem:[%s1423_s3 + $0xb0] sm:$0xff]  ;;  %vm469_vm12 = vcmask 64512   ;;  %vm471_vm13 = vcmask 1040448  }
  0x16   : > { %356 = vmatpush.bf16.msra.mxu1 %v1149_v16  ;;  %416 = vmatpush.bf16.msra.mxu2 %v1157_v17  ;;  %444 = vst.msk [vmem:[#allocation3 + $0x18] sm:$0xff] %vm441_vm4, %v1216_v24  ;;  %v1166_v11 = vld [vmem:[%s1423_s3 + $0x40] sm:$0xff]  ;;  %v1167_v12 = vld [vmem:[%s1423_s3 + $0x48] sm:$0xff]  ;;  %v1181_v17 = vld [vmem:[%s1423_s3 + $0xb8] sm:$0xff]  ;;  %vm473_vm14 = vcmask 57344   ;;  %vm753_vm0 = vcmask 1046528  }
  0x17   : > { %610 = vmatpush.bf16.msra.mxu3 %v1173_v45  ;;  %447 = vst.msk [vmem:[#allocation3 + $0x28] sm:$0x3] %vm446_vm8, %v1216_v24  ;;  %v1158_v13 = vld [vmem:[%s1423_s3] sm:$0xff]  ;;  %v1183_v14 = vld [vmem:[%s1423_s3 + $0xc8] sm:$0xff]  ;;  %vm526_vm15 = vsmask.f32 7424 }
  0x18   : > { %v1182_v15 = vld [vmem:[%s1423_s3 + $0xc0] sm:$0xff]  ;;  %v1175_v16 = vld [vmem:[%s1423_s3 + $0x88] sm:$0xff] }
  0x19   : > { %310 = vmatpush.bf16.msra.mxu0 %v1152_v19 }
  0x1a   : > { %357 = vmatpush.bf16.msra.mxu1 %v1148_v20  ;;  %417 = vmatpush.bf16.msra.mxu2 %v1156_v21  ;;  %v1179_v20 = vld [vmem:[%s1423_s3 + $0xa8] sm:$0xff]  ;;  %v1184_v21 = vld [vmem:[%s1423_s3 + $0xd0] sm:$0xff] }
  0x1b   : > { %611 = vmatpush.bf16.msra.mxu3 %v1172_v51 }
  0x1d   : > { %311 = vmatpush.bf16.msra.mxu0 %v1151_v22  ;;  %v1178_v22 = vld [vmem:[%s1423_s3 + $0xa0] sm:$0xff] }
  0x1e   : > { %358 = vmatpush.bf16.msra.mxu1 %v1147_v23  ;;  %418 = vmatpush.bf16.msra.mxu2 %v1155_v25  ;;  %v1177_v23 = vld [vmem:[%s1423_s3 + $0x98] sm:$0xff]  ;;  %v1176_v25 = vld [vmem:[%s1423_s3 + $0x90] sm:$0xff] }
  0x1f   : > { %612 = vmatpush.bf16.msra.mxu3 %v1171_v3 }
  0x21   : > { %312 = vmatpush.bf16.msra.mxu0 %v1150_v26 }
  0x22   : > { %359 = vmatpush.bf16.msra.mxu1 %v1146_v27  ;;  %419 = vmatpush.bf16.msra.mxu2 %v1154_v28 }
  0x23   : > { %613 = vmatpush.bf16.msra.mxu3 %v1170_v5 }
  0x25   : > { %630 = vmatpush.bf16.msrb.mxu0 %v1175_v16 }
  0x26   : > { %694 = vmatpush.bf16.msrb.mxu1 %v1165_v44  ;;  %715 = vmatpush.bf16.msrb.mxu2 %v1166_v11 }
  0x27   : > { %614 = vmatpush.bf16.msra.mxu3 %v1169_v7 }
  0x2a   : > { %695 = vmatpush.bf16.msrb.mxu1 %v1164_v46 }
  0x2b   : > { %615 = vmatpush.bf16.msra.mxu3 %v1168_v9 }
  0x2e   : > { %696 = vmatpush.bf16.msrb.mxu1 %v1163_v52 }
  0x2f   : > { %616 = vmatpush.bf16.msra.mxu3 %v1167_v12 }
  0x32   : > { %697 = vmatpush.bf16.msrb.mxu1 %v1162_v4 }
  0x33   : > { %818 = vmatpush.bf16.msrb.mxu3 %v1183_v14 }
  0x36   : > { %698 = vmatpush.bf16.msrb.mxu1 %v1161_v6 }
  0x37   : > { %819 = vmatpush.bf16.msrb.mxu3 %v1182_v15 }
  0x3a   : > { %699 = vmatpush.bf16.msrb.mxu1 %v1160_v8 }
  0x3b   : > { %820 = vmatpush.bf16.msrb.mxu3 %v1181_v17 }
  0x3e   : > { %700 = vmatpush.bf16.msrb.mxu1 %v1159_v10 }
  0x3f   : > { %821 = vmatpush.bf16.msrb.mxu3 %v1180_v18  ;;  %v1206_v18 = vld [vmem:[%s1424_s4] ss:$0 sm:$0xff] }
  0x42   : > { %701 = vmatpush.bf16.msrb.mxu1 %v1158_v13 }
  0x43   : > { %822 = vmatpush.bf16.msrb.mxu3 %v1179_v20 }
  0x47   : > { %823 = vmatpush.bf16.msrb.mxu3 %v1178_v22 }
  0x4b   : > { %824 = vmatpush.bf16.msrb.mxu3 %v1177_v23 }
  0x4f   : > { %825 = vmatpush.bf16.msrb.mxu3 %v1176_v25 }
  0x87   : > { %v1202_v29 = vpop.permute.xlu0 %1201 }
  0x88   : > { %v1204_v30 = vunpack.i.h.bf16 %v1202_v29  ;;  %v1203_v31 = vunpack.i.l.bf16 %v1202_v29 }
  0x8a   : > { %244 = vst.msk [vmem:[#allocation2 + $0x1] sm:$0xff] %vm243_vm3, %v1203_v31 }
  0x8b   : > { %245 = vst.msk [vmem:[#allocation2 + $0x9] sm:$0xff] %vm243_vm3, %v1204_v30 }
  0x91   : > { %v258_v32 = vld [vmem:[#allocation2 + $0x1] sm:$0xff] }
  0x92   : > { %v246_v33 = vld [vmem:[#allocation2] sm:$0xff]  ;;  %v259_v34 = vld [vmem:[#allocation2 + $0x9] sm:$0xff] }
  0x93   : > { %v247_v35 = vld [vmem:[#allocation2 + $0x8] sm:$0xff]  ;;  %v260_v37 = vpack.c.bf16 %v259_v34, %v258_v32 }
  0x94   : > { %v366_v36 = vld [vmem:[#allocation2 + $0x2] sm:$0xff]  ;;  %v248_v38 = vpack.c.bf16 %v247_v35, %v246_v33  ;;  %v367_v39 = vld [vmem:[#allocation2 + $0xa] sm:$0xff] }
  0x95   : > { %v368_v40 = vpack.c.bf16 %v367_v39, %v366_v36  ;;  %951 = vmatmul.msk.bf16.vlgmr.msra.gmra.mxu0 %vm226_vm1, %v260_v37 }
  0x96   : > { %968 = vmatmul.msk.bf16.vlgmr.msra.gmra.mxu1 %vm226_vm1, %v248_v38  ;;  %839 = vmatpush.bf16.msra.mxu0 %v1184_v21 }
  0x97   : > { %994 = vmatmul.msk.bf16.vlgmr.msra.gmra.mxu2 %vm226_vm1, %v368_v40 }
 0x112   : > { %v314_v41 = vpop.f32.mrf.mxu0 }
 0x113   : > { %v361_v42 = vpop.f32.mrf.mxu1 }
 0x114   : > { %v362_v47 = vadd.f32 %v361_v42, %v314_v41 }
 0x11a   : > { %v421_v49 = vpop.f32.mrf.mxu2  ;;  %v316_v54 = vpop.f32.mrf.mxu0 }
 0x11b   : > { %v426_v50 = vadd.f32 %v421_v49, %v362_v47  ;;  %v363_v55 = vpop.f32.mrf.mxu1 }
 0x11c   : > { %v364_v57 = vadd.f32 %v363_v55, %v316_v54 }
 0x11d   : > { %v432_v53 = vadd.f32 %v1205_v48, %v426_v50 }
 0x11f   : > { %v436_v56 = vmul.f32 0.01, %v432_v53  ;;  %vm434_vm5 = vcmp.ge.f32.partialorder %v432_v53, 0.0 }
 0x121   : > { %v438_v58 = vsel %vm434_vm5, %v432_v53, %v436_v56 }
 0x122   : > { %v423_v59 = vpop.f32.mrf.mxu2  ;;  %v451_v60 = vrot.slane %v438_v58, 7 }
 0x123   : > { %v427_v61 = vadd.f32 %v423_v59, %v364_v57 }
 0x124   : > { %454 = vrot.lane.b32.xlu0 %v451_v60, %s1217_s23 }
 0x125   : > { %v433_v62 = vadd.f32 %v1205_v48, %v427_v61 }
 0x127   : > { %vm435_vm6 = vcmp.ge.f32.partialorder %v433_v62, 0.0  ;;  %v437_v63 = vmul.f32 0.01, %v433_v62 }
 0x129   : > { %v439_v0 = vsel %vm435_vm6, %v433_v62, %v437_v63 }
 0x12a   : > { %v452_v1 = vrot.slane %v439_v0, 7 }
 0x12c   : > { %v453_v2 = vsel %vm450_vm7, %v451_v60, %v452_v1 }
 0x12d   : > { %456 = vrot.lane.b32.xlu1 %v453_v2, %s1217_s23 }
 0x135   : > { %458 = vrot.lane.b32.xlu1 %v452_v1, %s1217_s23 }
 0x196   : > { %v455_v19 = vpop.permute.xlu0 %454 }
 0x197   : > { %464 = vst.msk [vmem:[#allocation3] sm:$0xfe] %vm463_vm9, %v455_v19 }
 0x198   : > { %466 = vst.msk [vmem:[#allocation3 + $0x8] sm:$0xfe] %vm465_vm10, %v455_v19 }
 0x19e   : > { %v475_v27 = vld [vmem:[#allocation3] sm:$0xff] }
 0x19f   : > { %v457_v24 = vpop.permute.xlu1 %456  ;;  %v499_v29 = vld [vmem:[#allocation3] sm:$0xfe]  ;;  %v476_v32 = vld [vmem:[#allocation3 + $0x8] sm:$0xff] }
 0x1a0   : > { %468 = vst.msk [vmem:[#allocation3 + $0x10] sm:$0xff] %vm467_vm11, %v457_v24  ;;  %v500_v34 = vld [vmem:[#allocation3 + $0x8] sm:$0xfe]  ;;  %v722_v58 = vld [vmem:[#allocation3] sm:$0xfc] }
 0x1a1   : > { %470 = vst.msk [vmem:[#allocation3 + $0x18] sm:$0xff] %vm469_vm12, %v457_v24  ;;  %v723_v61 = vld [vmem:[#allocation3 + $0x8] sm:$0xfc] }
 0x1a7   : > { %v459_v26 = vpop.permute.xlu1 %458  ;;  %v477_v28 = vld [vmem:[#allocation3 + $0x10] sm:$0xff] }
 0x1a8   : > { %472 = vst.msk [vmem:[#allocation3 + $0x20] sm:$0x1] %vm471_vm13, %v459_v26  ;;  %v479_v30 = vpack.c.bf16 %v477_v28, %v475_v27  ;;  %v503_v31 = vpack.c.bf16 %v477_v28, %v499_v29  ;;  %v478_v33 = vld [vmem:[#allocation3 + $0x18] sm:$0xff]  ;;  %v726_v60 = vpack.c.bf16 %v477_v28, %v722_v58 }
 0x1a9   : > { %474 = vst.msk [vmem:[#allocation3 + $0x28] sm:$0x1] %vm473_vm14, %v459_v26  ;;  %v480_v35 = vpack.c.bf16 %v478_v33, %v476_v32  ;;  %v504_v36 = vpack.c.bf16 %v478_v33, %v500_v34  ;;  %v727_v62 = vpack.c.bf16 %v478_v33, %v723_v61 }
 0x1aa   : > { %702 = vmatmul.bf16.vlgmr.msrb.gmra.mxu1 %v479_v30  ;;  %v530_v37 = vshll.u32 %v503_v31, 16  ;;  %v528_v45 = vshrl.u32 %v503_v31, 16  ;;  %v754_v1 = vrot.slane %v726_v60, 1 }
 0x1ab   : > { %1086 = vmatmul.msk.bf16.vlgmr.msrb.gmra.mxu2 %vm441_vm4, %v480_v35  ;;  %v542_v38 = vshll.u32 %v504_v36, 16  ;;  %v540_v47 = vshrl.u32 %v504_v36, 16  ;;  %v757_v2 = vrot.slane %v727_v62, 1 }
 0x1ac   : > { %v532_v41 = vrot.slane %v530_v37, 1 }
 0x1ad   : > { %v544_v44 = vrot.slane %v542_v38, 1 }
 0x1ae   : > { %v533_v49 = vor.u32 %v532_v41, %v528_v45 }
 0x1af   : > { %v501_v39 = vld [vmem:[#allocation3 + $0x20] sm:$0x1]  ;;  %v545_v51 = vor.u32 %v544_v44, %v540_v47 }
 0x1b0   : > { %v505_v40 = vpack.c.bf16 %v501_v39, %v501_v39  ;;  %v502_v42 = vld [vmem:[#allocation3 + $0x28] sm:$0x1]  ;;  %v724_v55 = vld [vmem:[#allocation3 + $0x20] sm:$0x3] }
 0x1b1   : > { %v506_v43 = vpack.c.bf16 %v502_v42, %v502_v42  ;;  %v725_v56 = vld [vmem:[#allocation3 + $0x28] sm:$0x3]  ;;  %v728_v57 = vpack.c.bf16 %v724_v55, %v724_v55 }
 0x1b2   : > { %v535_v46 = vshll.u32 %v505_v40, 16  ;;  %v729_v59 = vpack.c.bf16 %v725_v56, %v725_v56 }
 0x1b3   : > { %v547_v48 = vshll.u32 %v506_v43, 16  ;;  %v755_v63 = vrot.slane %v728_v57, 1 }
 0x1b4   : > { %v537_v50 = vrot.slane %v535_v46, 1  ;;  %v758_v0 = vrot.slane %v729_v59, 1 }
 0x1b5   : > { %v549_v52 = vrot.slane %v547_v48, 1  ;;  %v756_v3 = vsel %vm753_vm0, %v754_v1, %v755_v63 }
 0x1b6   : > { %v538_v53 = vsel %vm526_vm15, %v533_v49, %v537_v50  ;;  %v759_v4 = vsel %vm753_vm0, %v757_v2, %v758_v0 }
 0x1b7   : > { %617 = vmatmul.bf16.vlgmr.msra.gmra.mxu3 %v538_v53  ;;  %v550_v54 = vsel %vm526_vm15, %v545_v51, %v549_v52 }
 0x1b8   : > { %1049 = vmatmul.msk.bf16.vlgmr.msrb.gmra.mxu0 %vm441_vm4, %v550_v54 }
 0x1c7   : > { %826 = vmatmul.bf16.vlgmr.msrb.gmra.mxu3 %v756_v3 }
 0x1c8   : > { %1141 = vmatmul.msk.bf16.vlgmr.msra.gmra.mxu0 %vm441_vm4, %v759_v4 }
 0x227   : > { %v703_v10 = vpop.f32.mrf.mxu1 }
 0x22e   : > { %v717_v11 = vpop.f32.mrf.mxu2 }
 0x22f   : > { %v705_v20 = vpop.f32.mrf.mxu1 }
 0x235   : > { %v632_v5 = vpop.f32.mrf.mxu0 }
 0x236   : > { %v719_v23 = vpop.f32.mrf.mxu2 }
 0x23a   : > { %v618_v6 = vpop.f32.mrf.mxu3 }
 0x23b   : > { %v633_v9 = vadd.f32 %v632_v5, %v618_v6 }
 0x23d   : > { %v634_v7 = vpop.f32.mrf.mxu0  ;;  %v704_v12 = vadd.f32 %v703_v10, %v633_v9 }
 0x23f   : > { %v718_v16 = vadd.f32 %v717_v11, %v704_v12 }
 0x242   : > { %v620_v8 = vpop.f32.mrf.mxu3 }
 0x243   : > { %v635_v15 = vadd.f32 %v634_v7, %v620_v8 }
 0x245   : > { %v841_v13 = vpop.f32.mrf.mxu0  ;;  %v706_v21 = vadd.f32 %v705_v20, %v635_v15 }
 0x247   : > { %v720_v28 = vadd.f32 %v719_v23, %v706_v21 }
 0x24a   : > { %v827_v14 = vpop.f32.mrf.mxu3 }
 0x24b   : > { %v842_v17 = vadd.f32 %v841_v13, %v827_v14 }
 0x24d   : > { %v846_v19 = vadd.f32 %v842_v17, %v718_v16  ;;  %v843_v25 = vpop.f32.mrf.mxu0 }
 0x24f   : > { %v852_v22 = vadd.f32 %v1206_v18, %v846_v19 }
 0x251   : > { %vm854_vm1 = vcmp.ge.f32.partialorder %v852_v22, 0.0  ;;  %v856_v24 = vmul.f32 0.01, %v852_v22 }
 0x252   : > { %v829_v26 = vpop.f32.mrf.mxu3 }
 0x253   : > { %v858_v27 = vsel %vm854_vm1, %v852_v22, %v856_v24  ;;  %v844_v29 = vadd.f32 %v843_v25, %v829_v26 }
 0x254   : > { %860 = vst [vmem:[%s224_s25] sm:$0xff] %v858_v27 }
 0x255   : > { %v847_v30 = vadd.f32 %v844_v29, %v720_v28 }
 0x257   : > { %v853_v31 = vadd.f32 %v1206_v18, %v847_v30 }
 0x259   : > { %vm855_vm2 = vcmp.ge.f32.partialorder %v853_v31, 0.0  ;;  %v857_v32 = vmul.f32 0.01, %v853_v31 }
 0x25b   : > { %v859_v33 = vsel %vm855_vm2, %v853_v31, %v857_v32 }
 0x25c   : > { %861 = vst [vmem:[%s224_s25 + $0x8] sm:$0xff] %v859_v33 }
 0x25d PF: > { %s15_s18 = sadd.s32 1, %s1213_s18  }
 0x25e   : > { %p12_p4 = scmp.ge.s32.totalorder %s15_s18, 4  }
 0x260   :  { %14 = sbr.rel (!%p12_p4) target bundleno = 1 (0x1), region = 74 }

// kernel: tile.78
= control target key start
LH: loop header
LB: loop body
LE: loop exit
PB: predicated region body
PF: predicated region fallthrough
CT: control target
= control target key end

     0   :  { %s22_s0 = inlined_call_operand.vmem [shape: f32[16], index: 0, kind: input, shape index: {}]   ;;  %s23_s1 = inlined_call_operand.vmem [shape: f32[8,16], index: 1, kind: output, shape index: {}]  }
   0x1   :  { %v4_v0 = vld [vmem:[%s22_s0] ss:$0 sm:$0xff] }
   0x2   :  { %5 = vst [vmem:[%s23_s1] sm:$0xff] %v4_v0 }

// kernel: tile.79
= control target key start
LH: loop header
LB: loop body
LE: loop exit
PB: predicated region body
PF: predicated region fallthrough
CT: control target
= control target key end

     0   :  { %s67_s10 = smov 112   ;;  %s68_s11 = smov 80   ;;  %vm3_vm0 = vcmask 130048   ;;  %vm9_vm1 = vcmask 1048448   ;;  %vm15_vm2 = vcmask 917248   ;;  %vm21_vm3 = vcmask 786048   ;;  %s111_s0 = inlined_call_operand.vmem [shape: f32[8,16], index: 0, kind: input, shape index: {}]   ;;  %s112_s1 = inlined_call_operand.vmem [shape: f32[1,128], index: 1, kind: output, shape index: {}]  }
   0x1   :  { %v53_v0 = vld [vmem:[%s111_s0 + $0x7] sm:$0x1]   ;;  %v55_v1 = vld [vmem:[%s111_s0 + $0x5] sm:$0x1]   ;;  %v57_v2 = vld [vmem:[%s111_s0 + $0x3] sm:$0x1]  }
   0x2   :  { %7 = vrot.lane.b32.xlu0 %v53_v0, %s67_s10  ;;  %19 = vrot.lane.b32.xlu1 %v55_v1, %s68_s11  ;;  %s69_s14 = smov 48   ;;  %v54_v3 = vld [vmem:[%s111_s0 + $0x6] sm:$0x1]   ;;  %v56_v4 = vld [vmem:[%s111_s0 + $0x4] sm:$0x1]   ;;  %s70_s21 = smov 96  }
   0x3   :  { %31 = vrot.lane.b32.xlu2 %v57_v2, %s69_s14  ;;  %v58_v5 = vld [vmem:[%s111_s0 + $0x2] sm:$0x1]   ;;  %s71_s22 = smov 64   ;;  %s72_s23 = smov 32   ;;  %v59_v6 = vld [vmem:[%s111_s0 + $0x1] sm:$0x1]  }
   0x4   :  { %s73_s26 = smov 16   ;;  %v2_v7 = vld [vmem:[%s111_s0] sm:$0x1]   ;;  %vm27_vm4 = vcmask 654848   ;;  %vm33_vm5 = vcmask 523648   ;;  %vm39_vm6 = vcmask 392448  }
   0x5   :  { %4 = vst.msk [vmem:[#allocation0] sm:$0x1] %vm3_vm0, %v2_v7   ;;  %vm45_vm7 = vcmask 261248  }
   0xa   :  { %13 = vrot.lane.b32.xlu0 %v54_v3, %s70_s21  ;;  %25 = vrot.lane.b32.xlu1 %v56_v4, %s71_s22 }
   0xb   :  { %37 = vrot.lane.b32.xlu2 %v58_v5, %s72_s23 }
  0x12   :  { %43 = vrot.lane.b32.xlu0 %v59_v6, %s73_s26 }
  0x5d   :  { %v32_v8 = vpop.permute.xlu2 %31  }
  0x65   :  { %v38_v9 = vpop.permute.xlu2 %37  }
  0x74   :  { %v8_v10 = vpop.permute.xlu0 %7   ;;  %v20_v11 = vpop.permute.xlu1 %19  }
  0x75   :  { %10 = vst.msk [vmem:[#allocation0] sm:$0x1] %vm9_vm1, %v8_v10  }
  0x7c   :  { %v14_v12 = vpop.permute.xlu0 %13   ;;  %v26_v13 = vpop.permute.xlu1 %25  }
  0x7d   :  { %16 = vst.msk [vmem:[#allocation0] sm:$0x1] %vm15_vm2, %v14_v12  }
  0x7e   :  { %22 = vst.msk [vmem:[#allocation0] sm:$0x1] %vm21_vm3, %v20_v11  }
  0x7f   :  { %28 = vst.msk [vmem:[#allocation0] sm:$0x1] %vm27_vm4, %v26_v13  }
  0x80   :  { %34 = vst.msk [vmem:[#allocation0] sm:$0x1] %vm33_vm5, %v32_v8  }
  0x81   :  { %40 = vst.msk [vmem:[#allocation0] sm:$0x1] %vm39_vm6, %v38_v9  }
  0x84   :  { %v44_v14 = vpop.permute.xlu0 %43  }
  0x85   :  { %46 = vst.msk [vmem:[#allocation0] sm:$0x1] %vm45_vm7, %v44_v14  }
  0x8c   :  { %v49_v15 = vld [vmem:[#allocation0] sm:$0x1] }
  0x8d   :  { %52 = vst [vmem:[%s112_s1] sm:$0x1] %v49_v15 }

// kernel: unet_forward.8
= control target key start
LH: loop header
LB: loop body
LE: loop exit
PB: predicated region body
PF: predicated region fallthrough
CT: control target
= control target key end

     0   :  { %s1219_s18 = smov 0   ;;  %s1389_s0 = inlined_call_operand.vmem [shape: bf16[2,8,64], index: 0, kind: input, shape index: {}]   ;;  %s1390_s1 = inlined_call_operand.vmem [shape: bf16[3,80,128], index: 1, kind: input, shape index: {}]   ;;  %s1391_s2 = inlined_call_operand.vmem [shape: f32[1,128], index: 2, kind: input, shape index: {}]   ;;  %s1392_s3 = inlined_call_operand.vmem [shape: bf16[3,160,128], index: 3, kind: input, shape index: {}]   ;;  %s1393_s4 = inlined_call_operand.vmem [shape: f32[1,128], index: 4, kind: input, shape index: {}]   ;;  %s1394_s5 = inlined_call_operand.vmem [shape: f32[2,8,128], index: 5, kind: output, shape index: {}]  }
   0x1 LB: > { %s865_s19 = sadd.s32 4294967295, %s1184_s18   ;;  %p869_p0 = scmp.ge.s32.totalorder %s1184_s18, 1  ;;  %s1184_s18 = sphi %s1219_s18, %s15_s18  }
   0x2   : > { %p186_p1 = scmp.lt.s32.totalorder %s1184_s18, 3 }
   0x4   : > { %p187_p2 = pnand %p869_p0, %p186_p1 }
   0x5   : > { %p212_p3 = scmp.lt.s32.totalorder (!%p187_p2), %s865_s19, 1  ;;  %s1187_s17 = smov (!%p187_p2), 8  }
   0x6   : > { %190 = sbr.rel (%p187_p2) target bundleno = 576 (0x240), region = 40  ;;  %s1188_s12 = smov (!%p187_p2), 16  }
   0xb   : > { %v1129_v0 = vld [vmem:[%s1390_s1 + $0x48] sm:$0xff]  ;;  %v1124_v1 = vld [vmem:[%s1390_s1 + $0x20] sm:$0xff]  ;;  %v1134_v2 = vld [vmem:[%s1390_s1 + $0x70] sm:$0xff]  ;;  %vm221_vm0 = vcmask 654336   ;;  %vm223_vm1 = vcmask 648192   ;;  %s1396_s19 = smov (!%p212_p3, %s865_s19), 1 }
   0xc   : > { %294 = vmatpush.bf16.msra.mxu0 %v1129_v0  ;;  %340 = vmatpush.bf16.msra.mxu1 %v1124_v1  ;;  %v1128_v3 = vld [vmem:[%s1390_s1 + $0x40] sm:$0xff]  ;;  %v1123_v4 = vld [vmem:[%s1390_s1 + $0x18] sm:$0xff]  ;;  %v1133_v5 = vld [vmem:[%s1390_s1 + $0x68] sm:$0xff]  ;;  %v1186_v6 = vmov 0.0   ;;  %s870_s7 = sshll.u32 %s1396_s19, 2  ;;  %vm231_vm2 = vcmask 588864  }
   0xd   : > { %222 = vst.msk [vmem:[#allocation2] sm:$0xff] %vm221_vm0, %v1186_v6  ;;  %399 = vmatpush.bf16.msra.mxu2 %v1134_v2  ;;  %s215_s10 = scalar_lea.vmem %s1389_s0, %s870_s7  ;;  %v1127_v8 = vld [vmem:[%s1390_s1 + $0x38] sm:$0xff]  ;;  %v1122_v9 = vld [vmem:[%s1390_s1 + $0x10] sm:$0xff]  ;;  %v1132_v11 = vld [vmem:[%s1390_s1 + $0x60] sm:$0xff]  ;;  %vm419_vm3 = vcmask 261120   ;;  %vm422_vm4 = vcmask 254976  }
   0xe   : > { %224 = vst.msk [vmem:[#allocation2 + $0x8] sm:$0x3] %vm223_vm1, %v1186_v6  ;;  %v225_v7 = vld [vmem:[%s215_s10] sm:$0xf]  ;;  %v1126_v12 = vld [vmem:[%s1390_s1 + $0x30] sm:$0xff]  ;;  %v1121_v13 = vld [vmem:[%s1390_s1 + $0x8] sm:$0xff] }
   0xf   : > { %418 = vst [vmem:[#allocation3] sm:$0xff] %v1186_v6  ;;  %v226_v10 = vunpack.c.l.bf16 %v225_v7  ;;  %v1131_v14 = vld [vmem:[%s1390_s1 + $0x58] sm:$0xff]  ;;  %v1125_v15 = vld [vmem:[%s1390_s1 + $0x28] sm:$0xff]  ;;  %v1120_v16 = vld [vmem:[%s1390_s1] sm:$0xff]  ;;  %vm429_vm6 = vcmask 1047681   ;;  %vm431_vm7 = vcmask 130049  }
  0x10   : > { %421 = vst [vmem:[#allocation3 + $0x10] sm:$0x3] %v1186_v6  ;;  %295 = vmatpush.bf16.msra.mxu0 %v1128_v3  ;;  %341 = vmatpush.bf16.msra.mxu1 %v1123_v4  ;;  %v1130_v17 = vld [vmem:[%s1390_s1 + $0x50] sm:$0xff]  ;;  %v1152_v25 = vld [vmem:[%s1392_s3 + $0x88] sm:$0xff]  ;;  %v1142_v26 = vld [vmem:[%s1392_s3 + $0x38] sm:$0xff]  ;;  %vm433_vm8 = vcmask 1040512  }
  0x11   : > { %400 = vmatpush.bf16.msra.mxu2 %v1133_v5  ;;  %228 = vrot.lane.b32.xlu0 %v226_v10, %s1187_s17  ;;  %420 = vst.msk [vmem:[#allocation3 + $0x8] sm:$0xff] %vm419_vm3, %v1186_v6  ;;  %v1151_v27 = vld [vmem:[%s1392_s3 + $0x80] sm:$0xff]  ;;  %v1141_v28 = vld [vmem:[%s1392_s3 + $0x30] sm:$0xff]  ;;  %v1150_v29 = vld [vmem:[%s1392_s3 + $0x78] sm:$0xff]  ;;  %vm435_vm9 = vcmask 122880   ;;  %s871_s28 = sshll.u32 %s1396_s19, 3 }
  0x12   : > { %566 = vmatpush.bf16.msra.mxu3 %v1152_v25  ;;  %423 = vst.msk [vmem:[#allocation3 + $0x18] sm:$0x3] %vm422_vm4, %v1186_v6  ;;  %v1140_v30 = vld [vmem:[%s1392_s3 + $0x28] sm:$0xff]  ;;  %v1149_v31 = vld [vmem:[%s1392_s3 + $0x70] sm:$0xff]  ;;  %v1139_v32 = vld [vmem:[%s1392_s3 + $0x20] sm:$0xff]  ;;  %s219_s6 = scalar_lea.vmem %s1394_s5, %s871_s28 }
  0x13   : > { %v1148_v33 = vld [vmem:[%s1392_s3 + $0x68] sm:$0xff]  ;;  %v1138_v34 = vld [vmem:[%s1392_s3 + $0x18] sm:$0xff]  ;;  %v1147_v37 = vld [vmem:[%s1392_s3 + $0x60] sm:$0xff] }
  0x14   : > { %296 = vmatpush.bf16.msra.mxu0 %v1127_v8  ;;  %342 = vmatpush.bf16.msra.mxu1 %v1122_v9  ;;  %v1137_v38 = vld [vmem:[%s1392_s3 + $0x10] sm:$0xff]  ;;  %v1176_v40 = vld [vmem:[%s1391_s2] ss:$0 sm:$0xff]  ;;  %v1146_v42 = vld [vmem:[%s1392_s3 + $0x58] sm:$0xff] }
  0x15   : > { %401 = vmatpush.bf16.msra.mxu2 %v1132_v11  ;;  %v1145_v51 = vld [vmem:[%s1392_s3 + $0x50] sm:$0xff]  ;;  %v1162_v52 = vld [vmem:[%s1392_s3 + $0xd8] sm:$0xff]  ;;  %v1136_v53 = vld [vmem:[%s1392_s3 + $0x8] sm:$0xff] }
  0x16   : > { %567 = vmatpush.bf16.msra.mxu3 %v1151_v27  ;;  %v1144_v54 = vld [vmem:[%s1392_s3 + $0x48] sm:$0xff]  ;;  %v1161_v55 = vld [vmem:[%s1392_s3 + $0xd0] sm:$0xff]  ;;  %v1154_v56 = vld [vmem:[%s1392_s3 + $0x98] sm:$0xff] }
  0x17   : > { %v1135_v57 = vld [vmem:[%s1392_s3] sm:$0xff]  ;;  %v1160_v59 = vld [vmem:[%s1392_s3 + $0xc8] sm:$0xff]  ;;  %v1153_v60 = vld [vmem:[%s1392_s3 + $0x90] sm:$0xff] }
  0x18   : > { %297 = vmatpush.bf16.msra.mxu0 %v1126_v12  ;;  %343 = vmatpush.bf16.msra.mxu1 %v1121_v13  ;;  %v1143_v58 = vld [vmem:[%s1392_s3 + $0x40] sm:$0xff]  ;;  %v1158_v62 = vld [vmem:[%s1392_s3 + $0xb8] sm:$0xff]  ;;  %v1164_v63 = vld [vmem:[%s1392_s3 + $0xe8] sm:$0xff] }
  0x19   : > { %402 = vmatpush.bf16.msra.mxu2 %v1131_v14  ;;  %v1159_v61 = vld [vmem:[%s1392_s3 + $0xc0] sm:$0xff]  ;;  %v1157_v0 = vld [vmem:[%s1392_s3 + $0xb0] sm:$0xff]  ;;  %v1156_v2 = vld [vmem:[%s1392_s3 + $0xa8] sm:$0xff] }
  0x1a   : > { %568 = vmatpush.bf16.msra.mxu3 %v1150_v29  ;;  %v1163_v1 = vld [vmem:[%s1392_s3 + $0xe0] sm:$0xff] }
  0x1b   : > { %v1155_v3 = vld [vmem:[%s1392_s3 + $0xa0] sm:$0xff] }
  0x1c   : > { %298 = vmatpush.bf16.msra.mxu0 %v1125_v15  ;;  %344 = vmatpush.bf16.msra.mxu1 %v1120_v16 }
  0x1d   : > { %403 = vmatpush.bf16.msra.mxu2 %v1130_v17 }
  0x1e   : > { %569 = vmatpush.bf16.msra.mxu3 %v1149_v31 }
  0x20   : > { %655 = vmatpush.bf16.msrb.mxu1 %v1142_v26  ;;  %585 = vmatpush.bf16.msrb.mxu0 %v1154_v56 }
  0x21   : > { %674 = vmatpush.bf16.msrb.mxu2 %v1144_v54 }
  0x22   : > { %570 = vmatpush.bf16.msra.mxu3 %v1148_v33 }
  0x24   : > { %656 = vmatpush.bf16.msrb.mxu1 %v1141_v28  ;;  %586 = vmatpush.bf16.msrb.mxu0 %v1153_v60 }
  0x25   : > { %675 = vmatpush.bf16.msrb.mxu2 %v1143_v58 }
  0x26   : > { %571 = vmatpush.bf16.msra.mxu3 %v1147_v37 }
  0x28   : > { %657 = vmatpush.bf16.msrb.mxu1 %v1140_v30 }
  0x2a   : > { %572 = vmatpush.bf16.msra.mxu3 %v1146_v42 }
  0x2c   : > { %658 = vmatpush.bf16.msrb.mxu1 %v1139_v32 }
  0x2e   : > { %573 = vmatpush.bf16.msra.mxu3 %v1145_v51 }
  0x30   : > { %659 = vmatpush.bf16.msrb.mxu1 %v1138_v34 }
  0x32   : > { %776 = vmatpush.bf16.msrb.mxu3 %v1162_v52 }
  0x34   : > { %660 = vmatpush.bf16.msrb.mxu1 %v1137_v38 }
  0x36   : > { %777 = vmatpush.bf16.msrb.mxu3 %v1161_v55 }
  0x38   : > { %661 = vmatpush.bf16.msrb.mxu1 %v1136_v53 }
  0x3a   : > { %778 = vmatpush.bf16.msrb.mxu3 %v1160_v59 }
  0x3c   : > { %662 = vmatpush.bf16.msrb.mxu1 %v1135_v57 }
  0x3e   : > { %779 = vmatpush.bf16.msrb.mxu3 %v1159_v61 }
  0x42   : > { %780 = vmatpush.bf16.msrb.mxu3 %v1158_v62 }
  0x46   : > { %781 = vmatpush.bf16.msrb.mxu3 %v1157_v0 }
  0x4a   : > { %782 = vmatpush.bf16.msrb.mxu3 %v1156_v2 }
  0x4e   : > { %783 = vmatpush.bf16.msrb.mxu3 %v1155_v3 }
  0x83   : > { %v229_v18 = vpop.permute.xlu0 %228 }
  0x84   : > { %232 = vst.msk [vmem:[#allocation2 + $0x1] sm:$0xff] %vm231_vm2, %v229_v18 }
  0x8b   : > { %v245_v19 = vld [vmem:[#allocation2 + $0x1] sm:$0xff] }
  0x8c   : > { %v233_v20 = vld [vmem:[#allocation2] sm:$0xff]  ;;  %v246_v22 = vpack.c.bf16 %v245_v19, %v245_v19 }
  0x8d   : > { %v350_v21 = vld [vmem:[#allocation2 + $0x2] sm:$0xff]  ;;  %v234_v23 = vpack.c.bf16 %v233_v20, %v233_v20 }
  0x8e   : > { %v351_v24 = vpack.c.bf16 %v350_v21, %v350_v21  ;;  %902 = vmatmul.msk.bf16.vlgmr.msra.gmra.mxu0 %vm221_vm0, %v246_v22 }
  0x8f   : > { %923 = vmatmul.msk.bf16.vlgmr.msra.gmra.mxu1 %vm221_vm0, %v234_v23  ;;  %795 = vmatpush.bf16.msra.mxu0 %v1164_v63 }
  0x90   : > { %954 = vmatmul.msk.bf16.vlgmr.msra.gmra.mxu2 %vm221_vm0, %v351_v24 }
  0x93   : > { %796 = vmatpush.bf16.msra.mxu0 %v1163_v1 }
 0x10b   : > { %v300_v35 = vpop.f32.mrf.mxu0 }
 0x10c   : > { %v346_v36 = vpop.f32.mrf.mxu1 }
 0x10d   : > { %v347_v39 = vadd.f32 %v346_v36, %v300_v35 }
 0x113   : > { %v405_v41 = vpop.f32.mrf.mxu2  ;;  %v302_v44 = vpop.f32.mrf.mxu0 }
 0x114   : > { %v409_v43 = vadd.f32 %v405_v41, %v347_v39  ;;  %v348_v45 = vpop.f32.mrf.mxu1 }
 0x115   : > { %v1177_v45 = vld [vmem:[%s1393_s4] ss:$0 sm:$0xff] }
 0x116   : > { %v414_v46 = vadd.f32 %v1176_v40, %v409_v43 }
 0x118   : > { %v416_v47 = vmul.f32 0.01, %v414_v46  ;;  %vm415_vm5 = vcmp.ge.f32.partialorder %v414_v46, 0.0 }
 0x11a   : > { %v417_v48 = vsel %vm415_vm5, %v414_v46, %v416_v47 }
 0x11b   : > { %v407_v49 = vpop.f32.mrf.mxu2  ;;  %v425_v50 = vrot.slane %v417_v48, 7 }
 0x11d   : > { %426 = vrot.lane.b32.xlu0 %v425_v50, %s1188_s12 }
 0x18f   : > { %v427_v4 = vpop.permute.xlu0 %426 }
 0x190   : > { %430 = vst.msk [vmem:[#allocation3] sm:$0xfe] %vm429_vm6, %v427_v4 }
 0x191   : > { %432 = vst.msk [vmem:[#allocation3 + $0x8] sm:$0xfe] %vm431_vm7, %v427_v4 }
 0x192   : > { %434 = vst.msk [vmem:[#allocation3 + $0x10] sm:$0x1] %vm433_vm8, %v427_v4 }
 0x193   : > { %436 = vst.msk [vmem:[#allocation3 + $0x18] sm:$0x1] %vm435_vm9, %v427_v4 }
 0x197   : > { %v437_v5 = vld [vmem:[#allocation3] sm:$0xff] }
 0x198   : > { %v461_v6 = vld [vmem:[#allocation3] sm:$0xfe]  ;;  %v439_v7 = vpack.c.bf16 %v437_v5, %v437_v5  ;;  %v438_v8 = vld [vmem:[#allocation3 + $0x8] sm:$0xff] }
 0x199   : > { %v462_v9 = vld [vmem:[#allocation3 + $0x8] sm:$0xfe]  ;;  %v440_v10 = vpack.c.bf16 %v438_v8, %v438_v8  ;;  %v463_v11 = vld [vmem:[#allocation3 + $0x10] sm:$0x1]  ;;  %v681_v23 = vld [vmem:[#allocation3] sm:$0xfc] }
 0x19a   : > { %663 = vmatmul.bf16.vlgmr.msrb.gmra.mxu1 %v439_v7  ;;  %v465_v12 = vpack.c.bf16 %v463_v11, %v461_v6  ;;  %v464_v13 = vld [vmem:[#allocation3 + $0x18] sm:$0x1]  ;;  %v683_v24 = vld [vmem:[#allocation3 + $0x10] sm:$0x3]  ;;  %v682_v25 = vld [vmem:[#allocation3 + $0x8] sm:$0xfc] }
 0x19b   : > { %1056 = vmatmul.msk.bf16.vlgmr.msrb.gmra.mxu2 %vm419_vm3, %v440_v10  ;;  %v466_v14 = vpack.c.bf16 %v464_v13, %v462_v9  ;;  %v684_v26 = vld [vmem:[#allocation3 + $0x18] sm:$0x3]  ;;  %v685_v27 = vpack.c.bf16 %v683_v24, %v681_v23 }
 0x19c   : > { %v491_v15 = vshll.u32 %v465_v12, 16  ;;  %v489_v17 = vshrl.u32 %v465_v12, 16  ;;  %v686_v28 = vpack.c.bf16 %v684_v26, %v682_v25 }
 0x19d   : > { %v498_v16 = vshll.u32 %v466_v14, 16  ;;  %v496_v19 = vshrl.u32 %v466_v14, 16  ;;  %v710_v29 = vrot.slane %v685_v27, 1 }
 0x19e   : > { %v493_v18 = vrot.slane %v491_v15, 1  ;;  %v711_v30 = vrot.slane %v686_v28, 1 }
 0x19f   : > { %v500_v20 = vrot.slane %v498_v16, 1 }
 0x1a0   : > { %v494_v21 = vor.u32 %v493_v18, %v489_v17 }
 0x1a1   : > { %v501_v22 = vor.u32 %v500_v20, %v496_v19 }
 0x1a2   : > { %574 = vmatmul.bf16.vlgmr.msra.gmra.mxu3 %v494_v21 }
 0x1a3   : > { %1015 = vmatmul.msk.bf16.vlgmr.msrb.gmra.mxu0 %vm419_vm3, %v501_v22 }
 0x1b2   : > { %784 = vmatmul.bf16.vlgmr.msrb.gmra.mxu3 %v710_v29 }
 0x1b3   : > { %1117 = vmatmul.msk.bf16.vlgmr.msra.gmra.mxu0 %vm419_vm3, %v711_v30 }
 0x217   : > { %v664_v31 = vpop.f32.mrf.mxu1 }
 0x21e   : > { %v677_v32 = vpop.f32.mrf.mxu2 }
 0x21f   : > { %v666_v33 = vpop.f32.mrf.mxu1 }
 0x220   : > { %v588_v34 = vpop.f32.mrf.mxu0 }
 0x225   : > { %v575_v35 = vpop.f32.mrf.mxu3 }
 0x226   : > { %v679_v36 = vpop.f32.mrf.mxu2  ;;  %v589_v39 = vadd.f32 %v588_v34, %v575_v35 }
 0x228   : > { %v590_v37 = vpop.f32.mrf.mxu0  ;;  %v665_v41 = vadd.f32 %v664_v31, %v589_v39 }
 0x22a   : > { %v678_v43 = vadd.f32 %v677_v32, %v665_v41 }
 0x22d   : > { %v577_v38 = vpop.f32.mrf.mxu3 }
 0x230   : > { %v798_v40 = vpop.f32.mrf.mxu0 }
 0x235   : > { %v785_v42 = vpop.f32.mrf.mxu3 }
 0x236   : > { %v799_v44 = vadd.f32 %v798_v40, %v785_v42 }
 0x238   : > { %v802_v46 = vadd.f32 %v799_v44, %v678_v43  ;;  %v800_v47 = vpop.f32.mrf.mxu0 }
 0x23a   : > { %v807_v48 = vadd.f32 %v1177_v45, %v802_v46 }
 0x23c   : > { %vm808_vm10 = vcmp.ge.f32.partialorder %v807_v48, 0.0  ;;  %v809_v49 = vmul.f32 0.01, %v807_v48 }
 0x23d   : > { %v787_v50 = vpop.f32.mrf.mxu3 }
 0x23e   : > { %v810_v51 = vsel %vm808_vm10, %v807_v48, %v809_v49 }
 0x23f   : > { %811 = vst [vmem:[%s219_s6] sm:$0xff] %v810_v51 }
 0x240 PF: > { %s15_s18 = sadd.s32 1, %s1184_s18  }
 0x241   : > { %p12_p4 = scmp.ge.s32.totalorder %s15_s18, 4  }
 0x243   :  { %14 = sbr.rel (!%p12_p4) target bundleno = 1 (0x1), region = 74 }

// kernel: tile.88
= control target key start
LH: loop header
LB: loop body
LE: loop exit
PB: predicated region body
PF: predicated region fallthrough
CT: control target
= control target key end

     0   :  { %s22_s0 = inlined_call_operand.vmem [shape: f32[32], index: 0, kind: input, shape index: {}]   ;;  %s23_s1 = inlined_call_operand.vmem [shape: f32[4,32], index: 1, kind: output, shape index: {}]  }
   0x1   :  { %v4_v0 = vld [vmem:[%s22_s0] ss:$0 sm:$0xff] }
   0x2   :  { %5 = vst [vmem:[%s23_s1] sm:$0xf] %v4_v0 }

// kernel: tile.89
= control target key start
LH: loop header
LB: loop body
LE: loop exit
PB: predicated region body
PF: predicated region fallthrough
CT: control target
= control target key end

     0   :  { %s37_s8 = smov 32   ;;  %s38_s9 = smov 64   ;;  %vm7_vm0 = vcmask 261120   ;;  %vm13_vm1 = vcmask 1048320   ;;  %vm19_vm2 = vcmask 785920   ;;  %vm25_vm3 = vcmask 523520   ;;  %s55_s0 = inlined_call_operand.vmem [shape: f32[4,32], index: 0, kind: input, shape index: {}]   ;;  %s56_s1 = inlined_call_operand.vmem [shape: f32[1,128], index: 1, kind: output, shape index: {}]  }
   0x1   :  { %v4_v0 = vld [vmem:[%s55_s0] sm:$0xf]  ;;  %s36_s0 = smov 96  }
   0x2   :  { %5 = vst [vmem:[#allocation1] sm:$0xf] %v4_v0 }
   0x9   :  { %v10_v1 = vld [vmem:[#allocation1 + $0x3] sm:$0x1]   ;;  %v22_v2 = vld [vmem:[#allocation1 + $0x1] sm:$0x1]   ;;  %v16_v3 = vld [vmem:[#allocation1 + $0x2] sm:$0x1]  }
   0xa   :  { %11 = vrot.lane.b32.xlu0 %v10_v1, %s36_s0  ;;  %23 = vrot.lane.b32.xlu1 %v22_v2, %s37_s8  ;;  %v6_v4 = vld [vmem:[#allocation1] sm:$0x1]  }
   0xb   :  { %8 = vst.msk [vmem:[#allocation0] sm:$0x1] %vm7_vm0, %v6_v4  }
  0x12   :  { %17 = vrot.lane.b32.xlu0 %v16_v3, %s38_s9 }
  0x7c   :  { %v12_v5 = vpop.permute.xlu0 %11   ;;  %v24_v6 = vpop.permute.xlu1 %23  }
  0x7d   :  { %14 = vst.msk [vmem:[#allocation0] sm:$0x1] %vm13_vm1, %v12_v5  }
  0x84   :  { %v18_v7 = vpop.permute.xlu0 %17  }
  0x85   :  { %20 = vst.msk [vmem:[#allocation0] sm:$0x1] %vm19_vm2, %v18_v7  }
  0x86   :  { %26 = vst.msk [vmem:[#allocation0] sm:$0x1] %vm25_vm3, %v24_v6  }
  0x8d   :  { %v29_v8 = vld [vmem:[#allocation0] sm:$0x1] }
  0x8e   :  { %32 = vst [vmem:[%s56_s1] sm:$0x1] %v29_v8 }

// kernel: unet_forward.9
= control target key start
LH: loop header
LB: loop body
LE: loop exit
PB: predicated region body
PF: predicated region fallthrough
CT: control target
= control target key end

     0   :  { %s1339_s18 = smov 0   ;;  %s1531_s0 = inlined_call_operand.vmem [shape: bf16[2,4,64], index: 0, kind: input, shape index: {}]   ;;  %s1532_s1 = inlined_call_operand.vmem [shape: bf16[3,96,128], index: 1, kind: input, shape index: {}]   ;;  %s1533_s2 = inlined_call_operand.vmem [shape: f32[1,128], index: 2, kind: input, shape index: {}]   ;;  %s1534_s3 = inlined_call_operand.vmem [shape: bf16[3,192,128], index: 3, kind: input, shape index: {}]   ;;  %s1535_s4 = inlined_call_operand.vmem [shape: f32[1,128], index: 4, kind: input, shape index: {}]   ;;  %s1536_s5 = inlined_call_operand.vmem [shape: f32[2,4,128], index: 5, kind: output, shape index: {}]  }
   0x1 LB: > { %s928_s19 = sadd.s32 4294967295, %s1304_s18   ;;  %p932_p0 = scmp.ge.s32.totalorder %s1304_s18, 1  ;;  %s1304_s18 = sphi %s1339_s18, %s15_s18  }
   0x2   : > { %p186_p1 = scmp.lt.s32.totalorder %s1304_s18, 3 }
   0x4   : > { %p187_p2 = pnand %p932_p0, %p186_p1 }
   0x5   : > { %p212_p3 = scmp.lt.s32.totalorder (!%p187_p2), %s928_s19, 1  ;;  %s1307_s25 = smov (!%p187_p2), 16  }
   0x6   : > { %190 = sbr.rel (%p187_p2) target bundleno = 583 (0x247), region = 40  ;;  %s1308_s24 = smov (!%p187_p2), 32  }
   0xb   : > { %v1242_v0 = vld [vmem:[%s1532_s1 + $0x58] sm:$0xff]  ;;  %v1236_v1 = vld [vmem:[%s1532_s1 + $0x28] sm:$0xff]  ;;  %vm221_vm0 = vcmask 783360   ;;  %s1538_s19 = smov (!%p212_p3, %s928_s19), 1  ;;  %v1241_v3 = vld [vmem:[%s1532_s1 + $0x50] sm:$0xff]  ;;  %v1306_v5 = vmov 0.0  }
   0xc   : > { %v1248_v2 = vld [vmem:[%s1532_s1 + $0x88] sm:$0xff]  ;;  %304 = vmatpush.bf16.msra.mxu0 %v1242_v0  ;;  %356 = vmatpush.bf16.msra.mxu1 %v1236_v1  ;;  %v1235_v4 = vld [vmem:[%s1532_s1 + $0x20] sm:$0xff]  ;;  %222 = vst.msk [vmem:[#allocation2] sm:$0x3f] %vm221_vm0, %v1306_v5  ;;  %s933_s7 = sshll.u32 %s1538_s19, 1  ;;  %v1234_v9 = vld [vmem:[%s1532_s1 + $0x18] sm:$0xff] }
   0xd   : > { %423 = vmatpush.bf16.msra.mxu2 %v1248_v2  ;;  %v1247_v6 = vld [vmem:[%s1532_s1 + $0x80] sm:$0xff]  ;;  %443 = vst [vmem:[#allocation3] sm:$0x3f] %v1306_v5  ;;  %s215_s10 = scalar_lea.vmem %s1531_s0, %s933_s7  ;;  %v1240_v8 = vld [vmem:[%s1532_s1 + $0x48] sm:$0xff]  ;;  %v1246_v11 = vld [vmem:[%s1532_s1 + $0x78] sm:$0xff]  ;;  %vm231_vm1 = vcmask 650368  }
   0xe   : > { %v223_v7 = vld [vmem:[%s215_s10] sm:$0x3]  ;;  %v1233_v13 = vld [vmem:[%s1532_s1 + $0x10] sm:$0xff]  ;;  %v1238_v16 = vld [vmem:[%s1532_s1 + $0x38] sm:$0xff]  ;;  %vm298_vm2 = vcmask 785408   ;;  %vm444_vm3 = vcmask 521216  }
   0xf   : > { %v224_v10 = vunpack.c.l.bf16 %v223_v7  ;;  %v1239_v12 = vld [vmem:[%s1532_s1 + $0x40] sm:$0xff]  ;;  %v1245_v14 = vld [vmem:[%s1532_s1 + $0x70] sm:$0xff]  ;;  %v1232_v17 = vld [vmem:[%s1532_s1 + $0x8] sm:$0xff]  ;;  %445 = vst.msk [vmem:[#allocation3 + $0x8] sm:$0x3f] %vm444_vm3, %v1306_v5  ;;  %vm451_vm5 = vcmask 1044737  }
  0x10   : > { %305 = vmatpush.bf16.msra.mxu0 %v1241_v3  ;;  %357 = vmatpush.bf16.msra.mxu1 %v1235_v4  ;;  %v1244_v18 = vld [vmem:[%s1532_s1 + $0x68] sm:$0xff]  ;;  %v1237_v19 = vld [vmem:[%s1532_s1 + $0x30] sm:$0xff]  ;;  %v1231_v20 = vld [vmem:[%s1532_s1] sm:$0xff]  ;;  %vm453_vm6 = vcmask 258049   ;;  %vm599_vm7 = vcmask 523264   ;;  %s934_s23 = sshll.u32 %s1538_s19, 2 }
  0x11   : > { %424 = vmatpush.bf16.msra.mxu2 %v1247_v6  ;;  %226 = vst [vmem:[#allocation1] ss:$2 sm:$0xff] %v224_v10  ;;  %v1243_v21 = vld [vmem:[%s1532_s1 + $0x60] sm:$0xff]  ;;  %v1268_v29 = vld [vmem:[%s1534_s3 + $0x98] sm:$0xff]  ;;  %v1267_v31 = vld [vmem:[%s1534_s3 + $0x90] sm:$0xff]  ;;  %s219_s26 = scalar_lea.vmem %s1536_s5, %s934_s23 }
  0x12   : > { %v1256_v30 = vld [vmem:[%s1534_s3 + $0x38] sm:$0xff]  ;;  %603 = vmatpush.bf16.msra.mxu3 %v1268_v29  ;;  %v1255_v32 = vld [vmem:[%s1534_s3 + $0x30] sm:$0xff]  ;;  %v1266_v35 = vld [vmem:[%s1534_s3 + $0x88] sm:$0xff] }
  0x13   : > { %v1260_v33 = vld [vmem:[%s1534_s3 + $0x58] sm:$0xff]  ;;  %v1259_v34 = vld [vmem:[%s1534_s3 + $0x50] sm:$0xff]  ;;  %v1254_v36 = vld [vmem:[%s1534_s3 + $0x28] sm:$0xff] }
  0x14   : > { %306 = vmatpush.bf16.msra.mxu0 %v1240_v8  ;;  %358 = vmatpush.bf16.msra.mxu1 %v1234_v9  ;;  %v1265_v37 = vld [vmem:[%s1534_s3 + $0x80] sm:$0xff]  ;;  %v1264_v39 = vld [vmem:[%s1534_s3 + $0x78] sm:$0xff]  ;;  %v1263_v43 = vld [vmem:[%s1534_s3 + $0x70] sm:$0xff] }
  0x15   : > { %425 = vmatpush.bf16.msra.mxu2 %v1246_v11  ;;  %v1253_v38 = vld [vmem:[%s1534_s3 + $0x20] sm:$0xff]  ;;  %v1252_v40 = vld [vmem:[%s1534_s3 + $0x18] sm:$0xff]  ;;  %v1251_v44 = vld [vmem:[%s1534_s3 + $0x10] sm:$0xff] }
  0x16   : > { %604 = vmatpush.bf16.msra.mxu3 %v1267_v31  ;;  %v1296_v46 = vld [vmem:[%s1533_s2] ss:$0 sm:$0xff]  ;;  %v1262_v48 = vld [vmem:[%s1534_s3 + $0x68] sm:$0xff]  ;;  %v1272_v58 = vld [vmem:[%s1534_s3 + $0xb8] sm:$0xff] }
  0x17   : > { %v1261_v57 = vld [vmem:[%s1534_s3 + $0x60] sm:$0xff]  ;;  %v1280_v59 = vld [vmem:[%s1534_s3 + $0xf8] sm:$0xff]  ;;  %v1250_v60 = vld [vmem:[%s1534_s3 + $0x8] sm:$0xff] }
  0x18   : > { %307 = vmatpush.bf16.msra.mxu0 %v1239_v12  ;;  %359 = vmatpush.bf16.msra.mxu1 %v1233_v13  ;;  %v227_v15 = vld.sshfl [vmem:[#allocation1] sm:$0xff pattern:$0x75316420]  ;;  %v1258_v61 = vld [vmem:[%s1534_s3 + $0x48] sm:$0xff]  ;;  %v1271_v62 = vld [vmem:[%s1534_s3 + $0xb0] sm:$0xff] }
  0x19   : > { %426 = vmatpush.bf16.msra.mxu2 %v1245_v14  ;;  %228 = vrot.lane.b32.xlu0 %v227_v15, %s1307_s25  ;;  %v1279_v63 = vld [vmem:[%s1534_s3 + $0xf0] sm:$0xff]  ;;  %v1249_v0 = vld [vmem:[%s1534_s3] sm:$0xff]  ;;  %v1270_v2 = vld [vmem:[%s1534_s3 + $0xa8] sm:$0xff] }
  0x1a   : > { %605 = vmatpush.bf16.msra.mxu3 %v1266_v35  ;;  %v1257_v1 = vld [vmem:[%s1534_s3 + $0x40] sm:$0xff]  ;;  %v1278_v3 = vld [vmem:[%s1534_s3 + $0xe8] sm:$0xff]  ;;  %v1276_v6 = vld [vmem:[%s1534_s3 + $0xd8] sm:$0xff] }
  0x1b   : > { %v1269_v4 = vld [vmem:[%s1534_s3 + $0xa0] sm:$0xff]  ;;  %v1284_v7 = vld [vmem:[%s1534_s3 + $0x118] sm:$0xff]  ;;  %v1275_v8 = vld [vmem:[%s1534_s3 + $0xd0] sm:$0xff] }
  0x1c   : > { %308 = vmatpush.bf16.msra.mxu0 %v1238_v16  ;;  %360 = vmatpush.bf16.msra.mxu1 %v1232_v17  ;;  %v1277_v5 = vld [vmem:[%s1534_s3 + $0xe0] sm:$0xff]  ;;  %v1283_v9 = vld [vmem:[%s1534_s3 + $0x110] sm:$0xff]  ;;  %v1274_v10 = vld [vmem:[%s1534_s3 + $0xc8] sm:$0xff] }
  0x1d   : > { %427 = vmatpush.bf16.msra.mxu2 %v1244_v18  ;;  %v1282_v11 = vld [vmem:[%s1534_s3 + $0x108] sm:$0xff]  ;;  %v1273_v12 = vld [vmem:[%s1534_s3 + $0xc0] sm:$0xff] }
  0x1e   : > { %606 = vmatpush.bf16.msra.mxu3 %v1265_v37  ;;  %v1281_v13 = vld [vmem:[%s1534_s3 + $0x100] sm:$0xff] }
  0x20   : > { %309 = vmatpush.bf16.msra.mxu0 %v1237_v19  ;;  %361 = vmatpush.bf16.msra.mxu1 %v1231_v20 }
  0x21   : > { %428 = vmatpush.bf16.msra.mxu2 %v1243_v21 }
  0x22   : > { %607 = vmatpush.bf16.msra.mxu3 %v1264_v39 }
  0x24   : > { %704 = vmatpush.bf16.msrb.mxu1 %v1256_v30  ;;  %620 = vmatpush.bf16.msrb.mxu0 %v1272_v58 }
  0x25   : > { %721 = vmatpush.bf16.msrb.mxu2 %v1260_v33 }
  0x26   : > { %608 = vmatpush.bf16.msra.mxu3 %v1263_v43 }
  0x28   : > { %705 = vmatpush.bf16.msrb.mxu1 %v1255_v32  ;;  %621 = vmatpush.bf16.msrb.mxu0 %v1271_v62 }
  0x29   : > { %722 = vmatpush.bf16.msrb.mxu2 %v1259_v34 }
  0x2a   : > { %609 = vmatpush.bf16.msra.mxu3 %v1262_v48 }
  0x2c   : > { %706 = vmatpush.bf16.msrb.mxu1 %v1254_v36  ;;  %622 = vmatpush.bf16.msrb.mxu0 %v1270_v2 }
  0x2d   : > { %723 = vmatpush.bf16.msrb.mxu2 %v1258_v61 }
  0x2e   : > { %610 = vmatpush.bf16.msra.mxu3 %v1261_v57 }
  0x30   : > { %707 = vmatpush.bf16.msrb.mxu1 %v1253_v38  ;;  %623 = vmatpush.bf16.msrb.mxu0 %v1269_v4 }
  0x31   : > { %724 = vmatpush.bf16.msrb.mxu2 %v1257_v1 }
  0x32   : > { %839 = vmatpush.bf16.msrb.mxu3 %v1280_v59 }
  0x34   : > { %708 = vmatpush.bf16.msrb.mxu1 %v1252_v40 }
  0x36   : > { %840 = vmatpush.bf16.msrb.mxu3 %v1279_v63 }
  0x38   : > { %709 = vmatpush.bf16.msrb.mxu1 %v1251_v44 }
  0x3a   : > { %841 = vmatpush.bf16.msrb.mxu3 %v1278_v3 }
  0x3c   : > { %710 = vmatpush.bf16.msrb.mxu1 %v1250_v60 }
  0x3e   : > { %842 = vmatpush.bf16.msrb.mxu3 %v1277_v5 }
  0x40   : > { %711 = vmatpush.bf16.msrb.mxu1 %v1249_v0 }
  0x42   : > { %843 = vmatpush.bf16.msrb.mxu3 %v1276_v6 }
  0x46   : > { %844 = vmatpush.bf16.msrb.mxu3 %v1275_v8 }
  0x4a   : > { %845 = vmatpush.bf16.msrb.mxu3 %v1274_v10 }
  0x4e   : > { %846 = vmatpush.bf16.msrb.mxu3 %v1273_v12 }
  0x8b   : > { %v229_v22 = vpop.permute.xlu0 %228 }
  0x8c   : > { %232 = vst.msk [vmem:[#allocation2 + $0x1] sm:$0xf] %vm231_vm1, %v229_v22 }
  0x93   : > { %v247_v23 = vld [vmem:[#allocation2 + $0x1] sm:$0xf] }
  0x94   : > { %v233_v24 = vld [vmem:[#allocation2] sm:$0xf]  ;;  %v248_v26 = vpack.c.bf16 %v247_v23, %v247_v23 }
  0x95   : > { %v367_v25 = vld [vmem:[#allocation2 + $0x2] sm:$0xf]  ;;  %v234_v27 = vpack.c.bf16 %v233_v24, %v233_v24 }
  0x96   : > { %v368_v28 = vpack.c.bf16 %v367_v25, %v367_v25  ;;  %971 = vmatmul.msk.bf16.vlgmr.msra.gmra.mxu0 %vm298_vm2, %v248_v26 }
  0x97   : > { %996 = vmatmul.msk.bf16.vlgmr.msra.gmra.mxu1 %vm298_vm2, %v234_v27  ;;  %856 = vmatpush.bf16.msra.mxu0 %v1284_v7 }
  0x98   : > { %1033 = vmatmul.msk.bf16.vlgmr.msra.gmra.mxu2 %vm298_vm2, %v368_v28 }
  0x9b   : > { %857 = vmatpush.bf16.msra.mxu0 %v1283_v9 }
  0x9f   : > { %858 = vmatpush.bf16.msra.mxu0 %v1282_v11 }
  0xa3   : > { %859 = vmatpush.bf16.msra.mxu0 %v1281_v13 }
 0x113   : > { %v311_v41 = vpop.f32.mrf.mxu0 }
 0x114   : > { %v363_v42 = vpop.f32.mrf.mxu1 }
 0x115   : > { %v364_v45 = vadd.f32 %v363_v42, %v311_v41 }
 0x11b   : > { %v430_v47 = vpop.f32.mrf.mxu2  ;;  %v313_v50 = vpop.f32.mrf.mxu0 }
 0x11c   : > { %v434_v49 = vadd.f32 %v430_v47, %v364_v45  ;;  %v365_v51 = vpop.f32.mrf.mxu1 }
 0x11d   : > { %v1297_v51 = vld [vmem:[%s1535_s4] ss:$0 sm:$0xff] }
 0x11e   : > { %v439_v52 = vadd.f32 %v1296_v46, %v434_v49 }
 0x120   : > { %v441_v53 = vmul.f32 0.01, %v439_v52  ;;  %vm440_vm4 = vcmp.ge.f32.partialorder %v439_v52, 0.0 }
 0x122   : > { %v442_v54 = vsel %vm440_vm4, %v439_v52, %v441_v53 }
 0x123   : > { %v432_v55 = vpop.f32.mrf.mxu2  ;;  %v447_v56 = vrot.slane %v442_v54, 7 }
 0x125   : > { %448 = vrot.lane.b32.xlu0 %v447_v56, %s1308_s24 }
 0x197   : > { %v449_v14 = vpop.permute.xlu0 %448 }
 0x198   : > { %452 = vst.msk [vmem:[#allocation3] sm:$0x1e] %vm451_vm5, %v449_v14 }
 0x199   : > { %454 = vst.msk [vmem:[#allocation3 + $0x8] sm:$0x1e] %vm453_vm6, %v449_v14 }
 0x19f   : > { %v455_v15 = vld [vmem:[#allocation3] sm:$0xf] }
 0x1a0   : > { %v483_v16 = vld [vmem:[#allocation3] sm:$0x1e]  ;;  %v457_v17 = vpack.c.bf16 %v455_v15, %v455_v15  ;;  %v456_v18 = vld [vmem:[#allocation3 + $0x8] sm:$0xf] }
 0x1a1   : > { %v485_v19 = vpack.c.bf16 %v483_v16, %v483_v16  ;;  %v484_v20 = vld [vmem:[#allocation3 + $0x8] sm:$0x1e]  ;;  %v458_v21 = vpack.c.bf16 %v456_v18, %v456_v18  ;;  %v730_v31 = vld [vmem:[#allocation3] sm:$0x3c] }
 0x1a2   : > { %v486_v22 = vpack.c.bf16 %v484_v20, %v484_v20  ;;  %712 = vmatmul.bf16.vlgmr.msrb.gmra.mxu1 %v457_v17  ;;  %v731_v32 = vld [vmem:[#allocation3 + $0x8] sm:$0x3c]  ;;  %v732_v33 = vpack.c.bf16 %v730_v31, %v730_v31 }
 0x1a3   : > { %v515_v23 = vshll.u32 %v485_v19, 16  ;;  %1155 = vmatmul.msk.bf16.vlgmr.msrb.gmra.mxu2 %vm599_vm7, %v458_v21  ;;  %v513_v25 = vshrl.u32 %v485_v19, 16  ;;  %v733_v34 = vpack.c.bf16 %v731_v32, %v731_v32 }
 0x1a4   : > { %v522_v24 = vshll.u32 %v486_v22, 16  ;;  %v520_v27 = vshrl.u32 %v486_v22, 16  ;;  %v761_v35 = vrot.slane %v732_v33, 1 }
 0x1a5   : > { %v517_v26 = vrot.slane %v515_v23, 1  ;;  %v762_v36 = vrot.slane %v733_v34, 1 }
 0x1a6   : > { %v524_v28 = vrot.slane %v522_v24, 1 }
 0x1a7   : > { %v518_v29 = vor.u32 %v517_v26, %v513_v25 }
 0x1a8   : > { %v525_v30 = vor.u32 %v524_v28, %v520_v27 }
 0x1a9   : > { %611 = vmatmul.bf16.vlgmr.msra.gmra.mxu3 %v518_v29 }
 0x1aa   : > { %1106 = vmatmul.msk.bf16.vlgmr.msrb.gmra.mxu0 %vm599_vm7, %v525_v30 }
 0x1b9   : > { %847 = vmatmul.bf16.vlgmr.msrb.gmra.mxu3 %v761_v35 }
 0x1ba   : > { %1228 = vmatmul.msk.bf16.vlgmr.msra.gmra.mxu0 %vm599_vm7, %v762_v36 }
 0x21f   : > { %v713_v37 = vpop.f32.mrf.mxu1 }
 0x226   : > { %v726_v39 = vpop.f32.mrf.mxu2 }
 0x227   : > { %v625_v38 = vpop.f32.mrf.mxu0  ;;  %v715_v40 = vpop.f32.mrf.mxu1 }
 0x22c   : > { %v612_v41 = vpop.f32.mrf.mxu3 }
 0x22d   : > { %v626_v45 = vadd.f32 %v625_v38, %v612_v41 }
 0x22e   : > { %v728_v43 = vpop.f32.mrf.mxu2 }
 0x22f   : > { %v627_v42 = vpop.f32.mrf.mxu0  ;;  %v714_v47 = vadd.f32 %v713_v37, %v626_v45 }
 0x231   : > { %v727_v49 = vadd.f32 %v726_v39, %v714_v47 }
 0x234   : > { %v614_v44 = vpop.f32.mrf.mxu3 }
 0x237   : > { %v861_v46 = vpop.f32.mrf.mxu0 }
 0x23c   : > { %v848_v48 = vpop.f32.mrf.mxu3 }
 0x23d   : > { %v862_v50 = vadd.f32 %v861_v46, %v848_v48 }
 0x23f   : > { %v865_v52 = vadd.f32 %v862_v50, %v727_v49  ;;  %v863_v53 = vpop.f32.mrf.mxu0 }
 0x241   : > { %v870_v54 = vadd.f32 %v1297_v51, %v865_v52 }
 0x243   : > { %vm871_vm8 = vcmp.ge.f32.partialorder %v870_v54, 0.0  ;;  %v872_v55 = vmul.f32 0.01, %v870_v54 }
 0x244   : > { %v850_v56 = vpop.f32.mrf.mxu3 }
 0x245   : > { %v873_v57 = vsel %vm871_vm8, %v870_v54, %v872_v55 }
 0x246   : > { %874 = vst [vmem:[%s219_s26] sm:$0xf] %v873_v57 }
 0x247 PF: > { %s15_s18 = sadd.s32 1, %s1304_s18  }
 0x248   : > { %p12_p4 = scmp.ge.s32.totalorder %s15_s18, 4  }
 0x24a   :  { %14 = sbr.rel (!%p12_p4) target bundleno = 1 (0x1), region = 74 }

// kernel: tile.103
= control target key start
LH: loop header
LB: loop body
LE: loop exit
PB: predicated region body
PF: predicated region fallthrough
CT: control target
= control target key end

     0   :  { %s22_s0 = inlined_call_operand.vmem [shape: f32[16], index: 0, kind: input, shape index: {}]   ;;  %s23_s1 = inlined_call_operand.vmem [shape: f32[4,16], index: 1, kind: output, shape index: {}]  }
   0x1   :  { %v4_v0 = vld [vmem:[%s22_s0] ss:$0 sm:$0xff] }
   0x2   :  { %5 = vst [vmem:[%s23_s1] sm:$0xf] %v4_v0 }

// kernel: tile.104
= control target key start
LH: loop header
LB: loop body
LE: loop exit
PB: predicated region body
PF: predicated region fallthrough
CT: control target
= control target key end

     0   :  { %s37_s8 = smov 16   ;;  %s38_s9 = smov 32   ;;  %vm7_vm0 = vcmask 130048   ;;  %vm13_vm1 = vcmask 523648   ;;  %vm19_vm2 = vcmask 392448   ;;  %vm25_vm3 = vcmask 261248   ;;  %s55_s0 = inlined_call_operand.vmem [shape: f32[4,16], index: 0, kind: input, shape index: {}]   ;;  %s56_s1 = inlined_call_operand.vmem [shape: f32[1,64], index: 1, kind: output, shape index: {}]  }
   0x1   :  { %v4_v0 = vld [vmem:[%s55_s0] sm:$0xf]  ;;  %s36_s0 = smov 48  }
   0x2   :  { %5 = vst [vmem:[#allocation1] sm:$0xf] %v4_v0 }
   0x9   :  { %v10_v1 = vld [vmem:[#allocation1 + $0x3] sm:$0x1]   ;;  %v22_v2 = vld [vmem:[#allocation1 + $0x1] sm:$0x1]   ;;  %v16_v3 = vld [vmem:[#allocation1 + $0x2] sm:$0x1]  }
   0xa   :  { %11 = vrot.lane.b32.xlu0 %v10_v1, %s36_s0  ;;  %23 = vrot.lane.b32.xlu1 %v22_v2, %s37_s8  ;;  %v6_v4 = vld [vmem:[#allocation1] sm:$0x1]  }
   0xb   :  { %8 = vst.msk [vmem:[#allocation0] sm:$0x1] %vm7_vm0, %v6_v4  }
  0x12   :  { %17 = vrot.lane.b32.xlu0 %v16_v3, %s38_s9 }
  0x7c   :  { %v12_v5 = vpop.permute.xlu0 %11   ;;  %v24_v6 = vpop.permute.xlu1 %23  }
  0x7d   :  { %14 = vst.msk [vmem:[#allocation0] sm:$0x1] %vm13_vm1, %v12_v5  }
  0x84   :  { %v18_v7 = vpop.permute.xlu0 %17  }
  0x85   :  { %20 = vst.msk [vmem:[#allocation0] sm:$0x1] %vm19_vm2, %v18_v7  }
  0x86   :  { %26 = vst.msk [vmem:[#allocation0] sm:$0x1] %vm25_vm3, %v24_v6  }
  0x8d   :  { %v29_v8 = vld [vmem:[#allocation0] sm:$0x1] }
  0x8e   :  { %32 = vst [vmem:[%s56_s1] sm:$0x1] %v29_v8 }

// kernel: unet_forward.10
= control target key start
LH: loop header
LB: loop body
LE: loop exit
PB: predicated region body
PF: predicated region fallthrough
CT: control target
= control target key end

     0   :  { %s1340_s18 = smov 0   ;;  %s1535_s0 = inlined_call_operand.vmem [shape: bf16[2,4,128], index: 0, kind: input, shape index: {}]   ;;  %s1536_s1 = inlined_call_operand.vmem [shape: bf16[3,192,64], index: 1, kind: input, shape index: {}]   ;;  %s1537_s2 = inlined_call_operand.vmem [shape: f32[1,64], index: 2, kind: input, shape index: {}]   ;;  %s1538_s3 = inlined_call_operand.vmem [shape: bf16[3,96,64], index: 3, kind: input, shape index: {}]   ;;  %s1539_s4 = inlined_call_operand.vmem [shape: f32[1,64], index: 4, kind: input, shape index: {}]   ;;  %s1540_s5 = inlined_call_operand.vmem [shape: f32[2,4,64], index: 5, kind: output, shape index: {}]  }
   0x1 LB: > { %s929_s19 = sadd.s32 4294967295, %s1305_s18   ;;  %p933_p0 = scmp.ge.s32.totalorder %s1305_s18, 1  ;;  %s1305_s18 = sphi %s1340_s18, %s15_s18  }
   0x2   : > { %p186_p1 = scmp.lt.s32.totalorder %s1305_s18, 3 }
   0x4   : > { %p187_p2 = pnand %p933_p0, %p186_p1 }
   0x5   : > { %p212_p3 = scmp.lt.s32.totalorder (!%p187_p2), %s929_s19, 1  ;;  %s1308_s6 = smov (!%p187_p2), 32  }
   0x6   : > { %190 = sbr.rel (%p187_p2) target bundleno = 579 (0x243), region = 40 }
   0xb   : > { %v1239_v0 = vld [vmem:[%s1536_s1 + $0x38] sm:$0xff]  ;;  %v1307_v3 = vmov 0.0   ;;  %vm222_vm0 = vcmask 521216   ;;  %s1542_s19 = smov (!%p212_p3, %s929_s19), 1  ;;  %v1238_v4 = vld [vmem:[%s1536_s1 + $0x30] sm:$0xff]  ;;  %v1237_v10 = vld [vmem:[%s1536_s1 + $0x28] sm:$0xff] }
   0xc   : > { %v1251_v1 = vld [vmem:[%s1536_s1 + $0x98] sm:$0xff]  ;;  %221 = vst [vmem:[#allocation2] sm:$0x3f] %v1307_v3  ;;  %486 = vmatpush.bf16.msra.mxu2 %v1239_v0  ;;  %v1250_v5 = vld [vmem:[%s1536_s1 + $0x90] sm:$0xff]  ;;  %s934_s9 = sshll.u32 %s1542_s19, 1  ;;  %v1249_v11 = vld [vmem:[%s1536_s1 + $0x88] sm:$0xff] }
   0xd   : > { %v1255_v2 = vld [vmem:[%s1536_s1 + $0xb8] sm:$0xff]  ;;  %385 = vmatpush.bf16.msra.mxu0 %v1251_v1  ;;  %223 = vst.msk [vmem:[#allocation2 + $0x8] sm:$0x3f] %vm222_vm0, %v1307_v3  ;;  %v1254_v6 = vld [vmem:[%s1536_s1 + $0xb0] sm:$0xff]  ;;  %s215_s12 = scalar_lea.vmem %s1535_s0, %s934_s9  ;;  %v1253_v13 = vld [vmem:[%s1536_s1 + $0xa8] sm:$0xff]  ;;  %vm233_vm1 = vcmask 1044737  }
   0xe   : > { %402 = vmatpush.bf16.msra.mxu1 %v1255_v2  ;;  %v1243_v7 = vld [vmem:[%s1536_s1 + $0x58] sm:$0xff]  ;;  %v1242_v8 = vld [vmem:[%s1536_s1 + $0x50] sm:$0xff]  ;;  %v224_v9 = vld [vmem:[%s215_s12] sm:$0x3]  ;;  %vm235_vm2 = vcmask 258049   ;;  %vm381_vm3 = vcmask 523264  }
   0xf   : > { %503 = vmatpush.bf16.msra.mxu3 %v1243_v7  ;;  %v225_v12 = vunpack.c.l.bf16 %v224_v9  ;;  %v1236_v14 = vld [vmem:[%s1536_s1 + $0x20] sm:$0xff]  ;;  %v1235_v16 = vld [vmem:[%s1536_s1 + $0x18] sm:$0xff]  ;;  %v1234_v19 = vld [vmem:[%s1536_s1 + $0x10] sm:$0xff]  ;;  %vm656_vm4 = vcmask 783360   ;;  %vm662_vm6 = vcmask 650368   ;;  %vm729_vm7 = vcmask 785408  }
  0x10   : > { %487 = vmatpush.bf16.msra.mxu2 %v1238_v4  ;;  %v1248_v15 = vld [vmem:[%s1536_s1 + $0x80] sm:$0xff]  ;;  %v1247_v21 = vld [vmem:[%s1536_s1 + $0x78] sm:$0xff]  ;;  %v1233_v23 = vld [vmem:[%s1536_s1 + $0x8] sm:$0xff]  ;;  %657 = vst.msk [vmem:[#allocation3] sm:$0x3f] %vm656_vm4, %v1307_v3  ;;  %s935_s23 = sshll.u32 %s1542_s19, 2 }
  0x11   : > { %386 = vmatpush.bf16.msra.mxu0 %v1250_v5  ;;  %227 = vst [vmem:[#allocation1] ss:$2 sm:$0xff] %v225_v12  ;;  %v1252_v20 = vld [vmem:[%s1536_s1 + $0xa0] sm:$0xff]  ;;  %v1263_v22 = vld [vmem:[%s1536_s1 + $0xf8] sm:$0xff]  ;;  %v1241_v24 = vld [vmem:[%s1536_s1 + $0x48] sm:$0xff]  ;;  %s219_s26 = scalar_lea.vmem %s1540_s5, %s935_s23  ;;  %vm874_vm9 = vcmask 519168  }
  0x12   : > { %403 = vmatpush.bf16.msra.mxu1 %v1254_v6  ;;  %v1246_v25 = vld [vmem:[%s1536_s1 + $0x70] sm:$0xff]  ;;  %v1232_v27 = vld [vmem:[%s1536_s1] sm:$0xff]  ;;  %v1245_v29 = vld [vmem:[%s1536_s1 + $0x68] sm:$0xff] }
  0x13   : > { %504 = vmatpush.bf16.msra.mxu3 %v1242_v8  ;;  %v1262_v26 = vld [vmem:[%s1536_s1 + $0xf0] sm:$0xff]  ;;  %v1240_v28 = vld [vmem:[%s1536_s1 + $0x40] sm:$0xff]  ;;  %v1261_v30 = vld [vmem:[%s1536_s1 + $0xe8] sm:$0xff] }
  0x14   : > { %488 = vmatpush.bf16.msra.mxu2 %v1237_v10  ;;  %v1267_v31 = vld [vmem:[%s1536_s1 + $0x118] sm:$0xff]  ;;  %v1244_v32 = vld [vmem:[%s1536_s1 + $0x60] sm:$0xff]  ;;  %v1266_v34 = vld [vmem:[%s1536_s1 + $0x110] sm:$0xff] }
  0x15   : > { %387 = vmatpush.bf16.msra.mxu0 %v1249_v11  ;;  %v1260_v33 = vld [vmem:[%s1536_s1 + $0xe0] sm:$0xff]  ;;  %v1259_v35 = vld [vmem:[%s1536_s1 + $0xd8] sm:$0xff]  ;;  %v1265_v36 = vld [vmem:[%s1536_s1 + $0x108] sm:$0xff] }
  0x16   : > { %404 = vmatpush.bf16.msra.mxu1 %v1253_v13  ;;  %v1258_v37 = vld [vmem:[%s1536_s1 + $0xd0] sm:$0xff]  ;;  %v1264_v38 = vld [vmem:[%s1536_s1 + $0x100] sm:$0xff]  ;;  %v1257_v39 = vld [vmem:[%s1536_s1 + $0xc8] sm:$0xff] }
  0x17   : > { %505 = vmatpush.bf16.msra.mxu3 %v1241_v24  ;;  %v1256_v40 = vld [vmem:[%s1536_s1 + $0xc0] sm:$0xff]  ;;  %v1279_v0 = vld [vmem:[%s1538_s3 + $0x58] sm:$0xff]  ;;  %v1273_v1 = vld [vmem:[%s1538_s3 + $0x28] sm:$0xff] }
  0x18   : > { %489 = vmatpush.bf16.msra.mxu2 %v1236_v14  ;;  %v228_v17 = vld.sshfl [vmem:[#allocation1] sm:$0xff pattern:$0x75316420]  ;;  %v1285_v2 = vld [vmem:[%s1538_s3 + $0x88] sm:$0xff]  ;;  %v1278_v4 = vld [vmem:[%s1538_s3 + $0x50] sm:$0xff] }
  0x19   : > { %388 = vmatpush.bf16.msra.mxu0 %v1248_v15  ;;  %v229_v18 = vrot.slane %v228_v17, 7  ;;  %v1272_v5 = vld [vmem:[%s1538_s3 + $0x20] sm:$0xff]  ;;  %v1277_v3 = vld [vmem:[%s1538_s3 + $0x48] sm:$0xff]  ;;  %v1271_v11 = vld [vmem:[%s1538_s3 + $0x18] sm:$0xff] }
  0x1a   : > { %405 = vmatpush.bf16.msra.mxu1 %v1252_v20  ;;  %v1284_v6 = vld [vmem:[%s1538_s3 + $0x80] sm:$0xff]  ;;  %v1283_v12 = vld [vmem:[%s1538_s3 + $0x78] sm:$0xff]  ;;  %v1270_v14 = vld [vmem:[%s1538_s3 + $0x10] sm:$0xff] }
  0x1b   : > { %230 = vrot.lane.b32.xlu0 %v229_v18, %s1308_s6  ;;  %506 = vmatpush.bf16.msra.mxu3 %v1240_v28  ;;  %v1276_v13 = vld [vmem:[%s1538_s3 + $0x40] sm:$0xff]  ;;  %v1282_v15 = vld [vmem:[%s1538_s3 + $0x70] sm:$0xff]  ;;  %s1309_s6 = smov 16  }
  0x1c   : > { %490 = vmatpush.bf16.msra.mxu2 %v1235_v16 }
  0x1d   : > { %389 = vmatpush.bf16.msra.mxu0 %v1247_v21 }
  0x1e   : > { %621 = vmatpush.bf16.msrb.mxu1 %v1263_v22 }
  0x1f   : > { %638 = vmatpush.bf16.msrb.mxu3 %v1267_v31 }
  0x20   : > { %491 = vmatpush.bf16.msra.mxu2 %v1234_v19 }
  0x21   : > { %390 = vmatpush.bf16.msra.mxu0 %v1246_v25 }
  0x22   : > { %622 = vmatpush.bf16.msrb.mxu1 %v1262_v26  ;;  %v1297_v26 = vld [vmem:[%s1537_s2] ss:$0 sm:$0xff] }
  0x23   : > { %639 = vmatpush.bf16.msrb.mxu3 %v1266_v34  ;;  %v1269_v34 = vld [vmem:[%s1538_s3 + $0x8] sm:$0xff] }
  0x24   : > { %492 = vmatpush.bf16.msra.mxu2 %v1233_v23 }
  0x25   : > { %391 = vmatpush.bf16.msra.mxu0 %v1245_v29 }
  0x26   : > { %623 = vmatpush.bf16.msrb.mxu1 %v1261_v30 }
  0x27   : > { %640 = vmatpush.bf16.msrb.mxu3 %v1265_v36  ;;  %v1274_v36 = vld [vmem:[%s1538_s3 + $0x30] sm:$0xff] }
  0x28   : > { %493 = vmatpush.bf16.msra.mxu2 %v1232_v27 }
  0x29   : > { %392 = vmatpush.bf16.msra.mxu0 %v1244_v32 }
  0x2a   : > { %624 = vmatpush.bf16.msrb.mxu1 %v1260_v33  ;;  %v1275_v33 = vld [vmem:[%s1538_s3 + $0x38] sm:$0xff] }
  0x2b   : > { %641 = vmatpush.bf16.msrb.mxu3 %v1264_v38  ;;  %v1280_v38 = vld [vmem:[%s1538_s3 + $0x60] sm:$0xff] }
  0x2c   : > { %787 = vmatpush.bf16.msrb.mxu2 %v1273_v1 }
  0x2d   : > { %735 = vmatpush.bf16.msrb.mxu0 %v1279_v0 }
  0x2e   : > { %625 = vmatpush.bf16.msrb.mxu1 %v1259_v35  ;;  %v1281_v35 = vld [vmem:[%s1538_s3 + $0x68] sm:$0xff] }
  0x30   : > { %788 = vmatpush.bf16.msrb.mxu2 %v1272_v5 }
  0x31   : > { %736 = vmatpush.bf16.msrb.mxu0 %v1278_v4 }
  0x32   : > { %626 = vmatpush.bf16.msrb.mxu1 %v1258_v37  ;;  %v1268_v37 = vld [vmem:[%s1538_s3] sm:$0xff] }
  0x34   : > { %789 = vmatpush.bf16.msrb.mxu2 %v1271_v11 }
  0x35   : > { %737 = vmatpush.bf16.msrb.mxu0 %v1277_v3 }
  0x36   : > { %627 = vmatpush.bf16.msrb.mxu1 %v1257_v39 }
  0x38   : > { %790 = vmatpush.bf16.msrb.mxu2 %v1270_v14 }
  0x39   : > { %738 = vmatpush.bf16.msrb.mxu0 %v1276_v13 }
  0x3a   : > { %628 = vmatpush.bf16.msrb.mxu1 %v1256_v40 }
  0x3c   : > { %791 = vmatpush.bf16.msrb.mxu2 %v1269_v34 }
  0x3d   : > { %739 = vmatpush.bf16.msrb.mxu0 %v1275_v33 }
  0x40   : > { %792 = vmatpush.bf16.msrb.mxu2 %v1268_v37 }
  0x41   : > { %740 = vmatpush.bf16.msrb.mxu0 %v1274_v36 }
  0x8d   : > { %v231_v41 = vpop.permute.xlu0 %230 }
  0x8e   : > { %234 = vst.msk [vmem:[#allocation2] sm:$0x1e] %vm233_vm1, %v231_v41 }
  0x8f   : > { %236 = vst.msk [vmem:[#allocation2 + $0x8] sm:$0x1e] %vm235_vm2, %v231_v41 }
  0x95   : > { %v237_v42 = vld [vmem:[#allocation2] sm:$0xf] }
  0x96   : > { %v265_v43 = vld [vmem:[#allocation2] sm:$0x1e]  ;;  %v239_v44 = vpack.c.bf16 %v237_v42, %v237_v42  ;;  %v238_v45 = vld [vmem:[#allocation2 + $0x8] sm:$0xf] }
  0x97   : > { %v267_v46 = vpack.c.bf16 %v265_v43, %v265_v43  ;;  %v266_v47 = vld [vmem:[#allocation2 + $0x8] sm:$0x1e]  ;;  %v240_v48 = vpack.c.bf16 %v238_v45, %v238_v45  ;;  %v512_v60 = vld [vmem:[#allocation2] sm:$0x3c] }
  0x98   : > { %v268_v49 = vpack.c.bf16 %v266_v47, %v266_v47  ;;  %494 = vmatmul.bf16.vlgmr.msra.gmra.mxu2 %v239_v44  ;;  %v513_v58 = vld [vmem:[#allocation2 + $0x8] sm:$0x3c]  ;;  %v514_v62 = vpack.c.bf16 %v512_v60, %v512_v60 }
  0x99   : > { %v297_v50 = vshll.u32 %v267_v46, 16  ;;  %1057 = vmatmul.msk.bf16.vlgmr.msra.gmra.mxu3 %vm381_vm3, %v240_v48  ;;  %v295_v52 = vshrl.u32 %v267_v46, 16  ;;  %v515_v59 = vpack.c.bf16 %v513_v58, %v513_v58 }
  0x9a   : > { %v304_v51 = vshll.u32 %v268_v49, 16  ;;  %v302_v54 = vshrl.u32 %v268_v49, 16  ;;  %v543_v63 = vrot.slane %v514_v62, 1  ;;  %854 = vmatpush.bf16.msra.mxu3 %v1285_v2 }
  0x9b   : > { %v299_v53 = vrot.slane %v297_v50, 1  ;;  %v544_v61 = vrot.slane %v515_v59, 1  ;;  %v1298_v50 = vld [vmem:[%s1539_s4] ss:$0 sm:$0xff] }
  0x9c   : > { %v306_v55 = vrot.slane %v304_v51, 1 }
  0x9d   : > { %v300_v56 = vor.u32 %v299_v53, %v295_v52 }
  0x9e   : > { %v307_v57 = vor.u32 %v306_v55, %v302_v54  ;;  %855 = vmatpush.bf16.msra.mxu3 %v1284_v6 }
  0x9f   : > { %393 = vmatmul.bf16.vlgmr.msra.gmra.mxu0 %v300_v56 }
  0xa0   : > { %1008 = vmatmul.msk.bf16.vlgmr.msra.gmra.mxu1 %vm381_vm3, %v307_v57 }
  0xa2   : > { %856 = vmatpush.bf16.msra.mxu3 %v1283_v12 }
  0xa6   : > { %857 = vmatpush.bf16.msra.mxu3 %v1282_v15 }
  0xa9   : > { %1130 = vmatmul.msk.bf16.vlgmr.msrb.gmra.mxu3 %vm381_vm3, %v544_v61 }
  0xaa   : > { %858 = vmatpush.bf16.msra.mxu3 %v1281_v35 }
  0xae   : > { %859 = vmatpush.bf16.msra.mxu3 %v1280_v38 }
  0xb0   : > { %629 = vmatmul.bf16.vlgmr.msrb.gmra.mxu1 %v543_v63 }
 0x11b   : > { %v495_v8 = vpop.f32.mrf.mxu2 }
 0x11c   : > { %v394_v7 = vpop.f32.mrf.mxu0  ;;  %v508_v10 = vpop.f32.mrf.mxu3 }
 0x11d   : > { %v407_v9 = vpop.f32.mrf.mxu1 }
 0x11e   : > { %v408_v20 = vadd.f32 %v407_v9, %v394_v7 }
 0x120   : > { %v496_v21 = vadd.f32 %v495_v8, %v408_v20 }
 0x122   : > { %v509_v24 = vadd.f32 %v508_v10, %v496_v21 }
 0x123   : > { %v497_v17 = vpop.f32.mrf.mxu2 }
 0x124   : > { %v396_v16 = vpop.f32.mrf.mxu0  ;;  %v510_v19 = vpop.f32.mrf.mxu3 }
 0x125   : > { %v409_v18 = vpop.f32.mrf.mxu1 }
 0x12c   : > { %v643_v23 = vpop.f32.mrf.mxu3 }
 0x12d   : > { %v630_v22 = vpop.f32.mrf.mxu1 }
 0x12e   : > { %v644_v25 = vadd.f32 %v643_v23, %v630_v22 }
 0x130   : > { %v647_v27 = vadd.f32 %v644_v25, %v509_v24 }
 0x132   : > { %v652_v28 = vadd.f32 %v1297_v26, %v647_v27 }
 0x134   : > { %vm653_vm5 = vcmp.ge.f32.partialorder %v652_v28, 0.0  ;;  %v654_v29 = vmul.f32 0.01, %v652_v28  ;;  %v645_v31 = vpop.f32.mrf.mxu3 }
 0x135   : > { %v632_v30 = vpop.f32.mrf.mxu1 }
 0x136   : > { %v655_v32 = vsel %vm653_vm5, %v652_v28, %v654_v29 }
 0x137   : > { %659 = vrot.lane.b32.xlu0 %v655_v32, %s1309_s6 }
 0x1a9   : > { %v660_v39 = vpop.permute.xlu0 %659 }
 0x1aa   : > { %663 = vst.msk [vmem:[#allocation3 + $0x1] sm:$0xf] %vm662_vm6, %v660_v39 }
 0x1b1   : > { %v678_v40 = vld [vmem:[#allocation3 + $0x1] sm:$0xf] }
 0x1b2   : > { %v664_v41 = vld [vmem:[#allocation3] sm:$0xf]  ;;  %v679_v43 = vpack.c.bf16 %v678_v40, %v678_v40 }
 0x1b3   : > { %v798_v42 = vld [vmem:[#allocation3 + $0x2] sm:$0xf]  ;;  %v665_v44 = vpack.c.bf16 %v664_v41, %v664_v41 }
 0x1b4   : > { %v799_v45 = vpack.c.bf16 %v798_v42, %v798_v42  ;;  %1167 = vmatmul.msk.bf16.vlgmr.msrb.gmra.mxu0 %vm729_vm7, %v679_v43 }
 0x1b5   : > { %1192 = vmatmul.msk.bf16.vlgmr.msrb.gmra.mxu2 %vm729_vm7, %v665_v44 }
 0x1b6   : > { %1229 = vmatmul.msk.bf16.vlgmr.msra.gmra.mxu3 %vm729_vm7, %v799_v45 }
 0x231   : > { %v742_v46 = vpop.f32.mrf.mxu0 }
 0x238   : > { %v794_v47 = vpop.f32.mrf.mxu2 }
 0x239   : > { %v795_v48 = vadd.f32 %v794_v47, %v742_v46  ;;  %v861_v49 = vpop.f32.mrf.mxu3  ;;  %v744_v51 = vpop.f32.mrf.mxu0 }
 0x23b   : > { %v865_v52 = vadd.f32 %v861_v49, %v795_v48 }
 0x23d   : > { %v870_v53 = vadd.f32 %v1298_v50, %v865_v52 }
 0x23f   : > { %vm871_vm8 = vcmp.ge.f32.partialorder %v870_v53, 0.0  ;;  %v872_v54 = vmul.f32 0.01, %v870_v53 }
 0x240   : > { %v796_v55 = vpop.f32.mrf.mxu2 }
 0x241   : > { %v873_v56 = vsel %vm871_vm8, %v870_v53, %v872_v54  ;;  %v863_v57 = vpop.f32.mrf.mxu3 }
 0x242   : > { %875 = vst.msk [vmem:[%s219_s26] sm:$0xf] %vm874_vm9, %v873_v56 }
 0x243 PF: > { %s15_s18 = sadd.s32 1, %s1305_s18  }
 0x244   : > { %p12_p4 = scmp.ge.s32.totalorder %s15_s18, 4  }
 0x246   :  { %14 = sbr.rel (!%p12_p4) target bundleno = 1 (0x1), region = 74 }

// kernel: tile.108
= control target key start
LH: loop header
LB: loop body
LE: loop exit
PB: predicated region body
PF: predicated region fallthrough
CT: control target
= control target key end

     0   :  { %s22_s0 = inlined_call_operand.vmem [shape: f32[8], index: 0, kind: input, shape index: {}]   ;;  %s23_s1 = inlined_call_operand.vmem [shape: f32[8,8], index: 1, kind: output, shape index: {}]  }
   0x1   :  { %v4_v0 = vld [vmem:[%s22_s0] ss:$0 sm:$0xff] }
   0x2   :  { %5 = vst [vmem:[%s23_s1] sm:$0xff] %v4_v0 }

// kernel: tile.109
= control target key start
LH: loop header
LB: loop body
LE: loop exit
PB: predicated region body
PF: predicated region fallthrough
CT: control target
= control target key end

     0   :  { %s67_s10 = smov 56   ;;  %s68_s11 = smov 40   ;;  %vm3_vm0 = vcmask 64512   ;;  %vm9_vm1 = vcmask 523712   ;;  %vm15_vm2 = vcmask 458112   ;;  %vm21_vm3 = vcmask 392512   ;;  %s111_s0 = inlined_call_operand.vmem [shape: f32[8,8], index: 0, kind: input, shape index: {}]   ;;  %s112_s1 = inlined_call_operand.vmem [shape: f32[1,64], index: 1, kind: output, shape index: {}]  }
   0x1   :  { %v53_v0 = vld [vmem:[%s111_s0 + $0x7] sm:$0x1]   ;;  %v55_v1 = vld [vmem:[%s111_s0 + $0x5] sm:$0x1]   ;;  %v57_v2 = vld [vmem:[%s111_s0 + $0x3] sm:$0x1]  }
   0x2   :  { %7 = vrot.lane.b32.xlu0 %v53_v0, %s67_s10  ;;  %19 = vrot.lane.b32.xlu1 %v55_v1, %s68_s11  ;;  %s69_s14 = smov 24   ;;  %v54_v3 = vld [vmem:[%s111_s0 + $0x6] sm:$0x1]   ;;  %v56_v4 = vld [vmem:[%s111_s0 + $0x4] sm:$0x1]   ;;  %s70_s21 = smov 48  }
   0x3   :  { %31 = vrot.lane.b32.xlu2 %v57_v2, %s69_s14  ;;  %v58_v5 = vld [vmem:[%s111_s0 + $0x2] sm:$0x1]   ;;  %s71_s22 = smov 32   ;;  %s72_s23 = smov 16   ;;  %v59_v6 = vld [vmem:[%s111_s0 + $0x1] sm:$0x1]  }
   0x4   :  { %s73_s26 = smov 8   ;;  %v2_v7 = vld [vmem:[%s111_s0] sm:$0x1]   ;;  %vm27_vm4 = vcmask 326912   ;;  %vm33_vm5 = vcmask 261312   ;;  %vm39_vm6 = vcmask 195712  }
   0x5   :  { %4 = vst.msk [vmem:[#allocation0] sm:$0x1] %vm3_vm0, %v2_v7   ;;  %vm45_vm7 = vcmask 130112  }
   0xa   :  { %13 = vrot.lane.b32.xlu0 %v54_v3, %s70_s21  ;;  %25 = vrot.lane.b32.xlu1 %v56_v4, %s71_s22 }
   0xb   :  { %37 = vrot.lane.b32.xlu2 %v58_v5, %s72_s23 }
  0x12   :  { %43 = vrot.lane.b32.xlu0 %v59_v6, %s73_s26 }
  0x5d   :  { %v32_v8 = vpop.permute.xlu2 %31  }
  0x65   :  { %v38_v9 = vpop.permute.xlu2 %37  }
  0x74   :  { %v8_v10 = vpop.permute.xlu0 %7   ;;  %v20_v11 = vpop.permute.xlu1 %19  }
  0x75   :  { %10 = vst.msk [vmem:[#allocation0] sm:$0x1] %vm9_vm1, %v8_v10  }
  0x7c   :  { %v14_v12 = vpop.permute.xlu0 %13   ;;  %v26_v13 = vpop.permute.xlu1 %25  }
  0x7d   :  { %16 = vst.msk [vmem:[#allocation0] sm:$0x1] %vm15_vm2, %v14_v12  }
  0x7e   :  { %22 = vst.msk [vmem:[#allocation0] sm:$0x1] %vm21_vm3, %v20_v11  }
  0x7f   :  { %28 = vst.msk [vmem:[#allocation0] sm:$0x1] %vm27_vm4, %v26_v13  }
  0x80   :  { %34 = vst.msk [vmem:[#allocation0] sm:$0x1] %vm33_vm5, %v32_v8  }
  0x81   :  { %40 = vst.msk [vmem:[#allocation0] sm:$0x1] %vm39_vm6, %v38_v9  }
  0x84   :  { %v44_v14 = vpop.permute.xlu0 %43  }
  0x85   :  { %46 = vst.msk [vmem:[#allocation0] sm:$0x1] %vm45_vm7, %v44_v14  }
  0x8c   :  { %v49_v15 = vld [vmem:[#allocation0] sm:$0x1] }
  0x8d   :  { %52 = vst [vmem:[%s112_s1] sm:$0x1] %v49_v15 }

// kernel: unet_forward.11
= control target key start
LH: loop header
LB: loop body
LE: loop exit
PB: predicated region body
PF: predicated region fallthrough
CT: control target
= control target key end

     0   :  { %s1725_s18 = smov 0   ;;  %s1997_s0 = inlined_call_operand.vmem [shape: bf16[2,8,256], index: 0, kind: input, shape index: {}]   ;;  %s1998_s1 = inlined_call_operand.vmem [shape: bf16[3,320,64], index: 1, kind: input, shape index: {}]   ;;  %s1999_s2 = inlined_call_operand.vmem [shape: f32[1,64], index: 2, kind: input, shape index: {}]   ;;  %s2000_s3 = inlined_call_operand.vmem [shape: bf16[3,80,64], index: 3, kind: input, shape index: {}]   ;;  %s2001_s4 = inlined_call_operand.vmem [shape: f32[1,64], index: 4, kind: input, shape index: {}]   ;;  %s2002_s5 = inlined_call_operand.vmem [shape: f32[2,8,64], index: 5, kind: output, shape index: {}]  }
   0x1 LB: > { %s1179_s19 = sadd.s32 4294967295, %s1690_s18   ;;  %p1183_p0 = scmp.ge.s32.totalorder %s1690_s18, 1  ;;  %s1690_s18 = sphi %s1725_s18, %s15_s18  }
   0x2   : > { %p187_p1 = scmp.lt.s32.totalorder %s1690_s18, 3 }
   0x4   : > { %p188_p2 = pnand %p1183_p0, %p187_p1 }
   0x5   : > { %p214_p3 = scmp.lt.s32.totalorder (!%p188_p2), %s1179_s19, 1  ;;  %s1693_s23 = smov (!%p188_p2), 32  }
   0x6   : > { %191 = sbr.rel (%p188_p2) target bundleno = 587 (0x24b), region = 40  ;;  %s1694_s8 = smov (!%p188_p2), 8  }
   0xb   : > { %v1603_v0 = vld [vmem:[%s1998_s1 + $0x38] sm:$0xff]  ;;  %v1692_v3 = vmov 0.0   ;;  %s2004_s19 = smov (!%p214_p3, %s1179_s19), 1  ;;  %v1602_v4 = vld [vmem:[%s1998_s1 + $0x30] sm:$0xff]  ;;  %v1601_v9 = vld [vmem:[%s1998_s1 + $0x28] sm:$0xff]  ;;  %vm226_vm0 = vcmask 523264  }
   0xc   : > { %v1631_v1 = vld [vmem:[%s1998_s1 + $0x118] sm:$0xff]  ;;  %224 = vst [vmem:[#allocation2] sm:$0xff] %v1692_v3  ;;  %662 = vmatpush.bf16.msra.mxu3 %v1603_v0  ;;  %v1630_v5 = vld [vmem:[%s1998_s1 + $0x110] sm:$0xff]  ;;  %s1595_s7 = sshll.u32 %s2004_s19, 3  ;;  %v1629_v11 = vld [vmem:[%s1998_s1 + $0x108] sm:$0xff]  ;;  %vm230_vm1 = vcmask 517120  }
   0xd   : > { %v1623_v2 = vld [vmem:[%s1998_s1 + $0xd8] sm:$0xff]  ;;  %228 = vst [vmem:[#allocation2 + $0x18] sm:$0x3] %v1692_v3  ;;  %513 = vmatpush.bf16.msra.mxu1 %v1631_v1  ;;  %v1622_v6 = vld [vmem:[%s1998_s1 + $0xd0] sm:$0xff]  ;;  %s218_s12 = scalar_lea.vmem %s1997_s0, %s1595_s7  ;;  %v1621_v12 = vld [vmem:[%s1998_s1 + $0xc8] sm:$0xff]  ;;  %vm248_vm2 = vcmask 1047809   ;;  %s222_s27 = scalar_lea.vmem %s2002_s5, %s1595_s7 }
   0xe   : > { %500 = vmatpush.bf16.msra.mxu0 %v1623_v2  ;;  %225 = vst [vmem:[#allocation2 + $0x8] sm:$0xff] %v1692_v3  ;;  %v1635_v7 = vld [vmem:[%s1998_s1 + $0x138] sm:$0xff]  ;;  %v232_v8 = vld [vmem:[%s218_s12] sm:$0xff]  ;;  %v1598_v21 = vld [vmem:[%s1998_s1 + $0x10] sm:$0xff]  ;;  %vm253_vm3 = vcmask 1040640   ;;  %vm243_vm4 = vcmask 261120  }
   0xf   : > { %229 = vst [vmem:[#allocation2 + $0x20] sm:$0x3] %v1692_v3  ;;  %530 = vmatpush.bf16.msra.mxu2 %v1635_v7  ;;  %v233_v10 = vunpack.c.l.bf16 %v232_v8  ;;  %v1600_v14 = vld [vmem:[%s1998_s1 + $0x20] sm:$0xff]  ;;  %v234_v15 = vunpack.c.h.bf16 %v232_v8  ;;  %v1599_v18 = vld [vmem:[%s1998_s1 + $0x18] sm:$0xff]  ;;  %v1597_v22 = vld [vmem:[%s1998_s1 + $0x8] sm:$0xff]  ;;  %vm251_vm5 = vcmask 261121  }
  0x10   : > { %663 = vmatpush.bf16.msra.mxu3 %v1602_v4  ;;  %v1628_v16 = vld [vmem:[%s1998_s1 + $0x100] sm:$0xff]  ;;  %v1627_v20 = vld [vmem:[%s1998_s1 + $0xf8] sm:$0xff]  ;;  %v1634_v25 = vld [vmem:[%s1998_s1 + $0x130] sm:$0xff]  ;;  %227 = vst.msk [vmem:[#allocation2 + $0x10] sm:$0xff] %vm226_vm0, %v1692_v3  ;;  %vm256_vm6 = vcmask 253952   ;;  %vm930_vm7 = vcmask 654336  }
  0x11   : > { %514 = vmatpush.bf16.msra.mxu1 %v1630_v5  ;;  %v237_v13 = vrot.slane %v233_v10, 7  ;;  %v1620_v17 = vld [vmem:[%s1998_s1 + $0xc0] sm:$0xff]  ;;  %v238_v19 = vrot.slane %v234_v15, 7  ;;  %v1615_v24 = vld [vmem:[%s1998_s1 + $0x98] sm:$0xff]  ;;  %v1626_v27 = vld [vmem:[%s1998_s1 + $0xf0] sm:$0xff]  ;;  %vm932_vm8 = vcmask 648192  }
  0x12   : > { %501 = vmatpush.bf16.msra.mxu0 %v1622_v6  ;;  %v1596_v23 = vld [vmem:[%s1998_s1] sm:$0xff]  ;;  %v1619_v26 = vld [vmem:[%s1998_s1 + $0xb8] sm:$0xff]  ;;  %v1614_v28 = vld [vmem:[%s1998_s1 + $0x90] sm:$0xff]  ;;  %231 = vst.msk [vmem:[#allocation2 + $0x28] sm:$0x3] %vm230_vm1, %v1692_v3  ;;  %vm938_vm10 = vcmask 588864  }
  0x13   : > { %239 = vrot.lane.b32.xlu0 %v237_v13, %s1693_s23  ;;  %531 = vmatpush.bf16.msra.mxu2 %v1634_v25  ;;  %v1633_v29 = vld [vmem:[%s1998_s1 + $0x128] sm:$0xff]  ;;  %v1618_v30 = vld [vmem:[%s1998_s1 + $0xb0] sm:$0xff]  ;;  %v1632_v33 = vld [vmem:[%s1998_s1 + $0x120] sm:$0xff]  ;;  %931 = vst.msk [vmem:[#allocation3] sm:$0xff] %vm930_vm7, %v1692_v3 }
  0x14   : > { %664 = vmatpush.bf16.msra.mxu3 %v1601_v9  ;;  %v1625_v31 = vld [vmem:[%s1998_s1 + $0xe8] sm:$0xff]  ;;  %v1624_v35 = vld [vmem:[%s1998_s1 + $0xe0] sm:$0xff]  ;;  %v1611_v36 = vld [vmem:[%s1998_s1 + $0x78] sm:$0xff]  ;;  %933 = vst.msk [vmem:[#allocation3 + $0x8] sm:$0x3] %vm932_vm8, %v1692_v3 }
  0x15   : > { %515 = vmatpush.bf16.msra.mxu1 %v1629_v11  ;;  %v1613_v32 = vld [vmem:[%s1998_s1 + $0x88] sm:$0xff]  ;;  %v1612_v37 = vld [vmem:[%s1998_s1 + $0x80] sm:$0xff]  ;;  %v1643_v38 = vld [vmem:[%s1998_s1 + $0x178] sm:$0xff] }
  0x16   : > { %502 = vmatpush.bf16.msra.mxu0 %v1621_v12  ;;  %v1617_v34 = vld [vmem:[%s1998_s1 + $0xa8] sm:$0xff]  ;;  %v1616_v39 = vld [vmem:[%s1998_s1 + $0xa0] sm:$0xff]  ;;  %v1610_v40 = vld [vmem:[%s1998_s1 + $0x70] sm:$0xff] }
  0x17   : > { %532 = vmatpush.bf16.msra.mxu2 %v1633_v29  ;;  %v1642_v41 = vld [vmem:[%s1998_s1 + $0x170] sm:$0xff]  ;;  %v1609_v42 = vld [vmem:[%s1998_s1 + $0x68] sm:$0xff]  ;;  %v1655_v43 = vld [vmem:[%s1998_s1 + $0x1d8] sm:$0xff] }
  0x18   : > { %665 = vmatpush.bf16.msra.mxu3 %v1600_v14  ;;  %v1641_v44 = vld [vmem:[%s1998_s1 + $0x168] sm:$0xff]  ;;  %v1654_v45 = vld [vmem:[%s1998_s1 + $0x1d0] sm:$0xff]  ;;  %v1608_v46 = vld [vmem:[%s1998_s1 + $0x60] sm:$0xff] }
  0x19   : > { %516 = vmatpush.bf16.msra.mxu1 %v1628_v16  ;;  %v1640_v47 = vld [vmem:[%s1998_s1 + $0x160] sm:$0xff]  ;;  %v1607_v48 = vld [vmem:[%s1998_s1 + $0x58] sm:$0xff]  ;;  %v1653_v49 = vld [vmem:[%s1998_s1 + $0x1c8] sm:$0xff] }
  0x1a   : > { %503 = vmatpush.bf16.msra.mxu0 %v1620_v17  ;;  %v1639_v50 = vld [vmem:[%s1998_s1 + $0x158] sm:$0xff]  ;;  %v1652_v51 = vld [vmem:[%s1998_s1 + $0x1c0] sm:$0xff]  ;;  %v1606_v52 = vld [vmem:[%s1998_s1 + $0x50] sm:$0xff] }
  0x1b   : > { %241 = vrot.lane.b32.xlu0 %v238_v19, %s1693_s23  ;;  %533 = vmatpush.bf16.msra.mxu2 %v1632_v33  ;;  %v1638_v53 = vld [vmem:[%s1998_s1 + $0x150] sm:$0xff]  ;;  %v1605_v55 = vld [vmem:[%s1998_s1 + $0x48] sm:$0xff]  ;;  %v1604_v57 = vld [vmem:[%s1998_s1 + $0x40] sm:$0xff] }
  0x1c   : > { %666 = vmatpush.bf16.msra.mxu3 %v1599_v18  ;;  %v1637_v56 = vld [vmem:[%s1998_s1 + $0x148] sm:$0xff]  ;;  %v1636_v58 = vld [vmem:[%s1998_s1 + $0x140] sm:$0xff]  ;;  %v1651_v61 = vld [vmem:[%s1998_s1 + $0x1b8] sm:$0xff] }
  0x1d   : > { %517 = vmatpush.bf16.msra.mxu1 %v1627_v20  ;;  %v1650_v4 = vld [vmem:[%s1998_s1 + $0x1b0] sm:$0xff]  ;;  %v1649_v9 = vld [vmem:[%s1998_s1 + $0x1a8] sm:$0xff]  ;;  %v1648_v15 = vld [vmem:[%s1998_s1 + $0x1a0] sm:$0xff] }
  0x1e   : > { %504 = vmatpush.bf16.msra.mxu0 %v1619_v26  ;;  %v1645_v33 = vld [vmem:[%s1998_s1 + $0x188] sm:$0xff]  ;;  %v1668_v3 = vld [vmem:[%s2000_s3 + $0x60] sm:$0xff] }
  0x1f   : > { %675 = vmatpush.bf16.msrb.mxu2 %v1611_v36 }
  0x20   : > { %667 = vmatpush.bf16.msra.mxu3 %v1598_v21 }
  0x21   : > { %518 = vmatpush.bf16.msra.mxu1 %v1626_v27 }
  0x22   : > { %505 = vmatpush.bf16.msra.mxu0 %v1618_v30  ;;  %v1646_v30 = vld [vmem:[%s1998_s1 + $0x190] sm:$0xff] }
  0x23   : > { %676 = vmatpush.bf16.msrb.mxu2 %v1610_v40 }
  0x24   : > { %668 = vmatpush.bf16.msra.mxu3 %v1597_v22 }
  0x25   : > { %519 = vmatpush.bf16.msra.mxu1 %v1625_v31 }
  0x26   : > { %506 = vmatpush.bf16.msra.mxu0 %v1617_v34 }
  0x27   : > { %677 = vmatpush.bf16.msrb.mxu2 %v1609_v42 }
  0x28   : > { %669 = vmatpush.bf16.msra.mxu3 %v1596_v23 }
  0x29   : > { %520 = vmatpush.bf16.msra.mxu1 %v1624_v35 }
  0x2a   : > { %507 = vmatpush.bf16.msra.mxu0 %v1616_v39 }
  0x2b   : > { %678 = vmatpush.bf16.msrb.mxu2 %v1608_v46 }
  0x2c   : > { %692 = vmatpush.bf16.msrb.mxu3 %v1615_v24  ;;  %v1647_v24 = vld [vmem:[%s1998_s1 + $0x198] sm:$0xff] }
  0x2d   : > { %882 = vmatpush.bf16.msrb.mxu1 %v1643_v38  ;;  %v1644_v38 = vld [vmem:[%s1998_s1 + $0x180] sm:$0xff] }
  0x2e   : > { %912 = vmatpush.bf16.msrb.mxu0 %v1655_v43 }
  0x2f   : > { %679 = vmatpush.bf16.msrb.mxu2 %v1607_v48 }
  0x30   : > { %693 = vmatpush.bf16.msrb.mxu3 %v1614_v28 }
  0x31   : > { %883 = vmatpush.bf16.msrb.mxu1 %v1642_v41 }
  0x32   : > { %913 = vmatpush.bf16.msrb.mxu0 %v1654_v45 }
  0x33   : > { %680 = vmatpush.bf16.msrb.mxu2 %v1606_v52  ;;  %v1670_v52 = vld [vmem:[%s2000_s3 + $0x70] sm:$0xff] }
  0x34   : > { %694 = vmatpush.bf16.msrb.mxu3 %v1613_v32 }
  0x35   : > { %884 = vmatpush.bf16.msrb.mxu1 %v1641_v44 }
  0x36   : > { %914 = vmatpush.bf16.msrb.mxu0 %v1653_v49 }
  0x37   : > { %681 = vmatpush.bf16.msrb.mxu2 %v1605_v55 }
  0x38   : > { %695 = vmatpush.bf16.msrb.mxu3 %v1612_v37 }
  0x39   : > { %885 = vmatpush.bf16.msrb.mxu1 %v1640_v47 }
  0x3a   : > { %915 = vmatpush.bf16.msrb.mxu0 %v1652_v51  ;;  %v1660_v51 = vld [vmem:[%s2000_s3 + $0x20] sm:$0xff] }
  0x3b   : > { %682 = vmatpush.bf16.msrb.mxu2 %v1604_v57 }
  0x3d   : > { %886 = vmatpush.bf16.msrb.mxu1 %v1639_v50  ;;  %v1665_v50 = vld [vmem:[%s2000_s3 + $0x48] sm:$0xff] }
  0x41   : > { %887 = vmatpush.bf16.msrb.mxu1 %v1638_v53  ;;  %v1664_v53 = vld [vmem:[%s2000_s3 + $0x40] sm:$0xff] }
  0x45   : > { %888 = vmatpush.bf16.msrb.mxu1 %v1637_v56  ;;  %v1669_v56 = vld [vmem:[%s2000_s3 + $0x68] sm:$0xff] }
  0x49   : > { %889 = vmatpush.bf16.msrb.mxu1 %v1636_v58 }
  0x85   : > { %v240_v54 = vpop.permute.xlu0 %239 }
  0x86   : > { %249 = vst.msk [vmem:[#allocation2] sm:$0xfe] %vm248_vm2, %v240_v54 }
  0x87   : > { %254 = vst.msk [vmem:[#allocation2 + $0x18] sm:$0x1] %vm253_vm3, %v240_v54 }
  0x8d   : > { %v242_v59 = vpop.permute.xlu0 %241  ;;  %v258_v60 = vld [vmem:[#allocation2] sm:$0xff] }
  0x8e   : > { %v304_v62 = vld [vmem:[#allocation2] sm:$0xfe]  ;;  %v244_v63 = vsel %vm243_vm4, %v240_v54, %v242_v59  ;;  %252 = vst.msk [vmem:[#allocation2 + $0x10] sm:$0xfe] %vm251_vm5, %v242_v59  ;;  %v261_v0 = vpack.c.bf16 %v258_v60, %v258_v60  ;;  %v307_v1 = vld [vmem:[#allocation2 + $0x18] sm:$0x1] }
  0x8f   : > { %250 = vst [vmem:[#allocation2 + $0x8] sm:$0xfe] %v244_v63  ;;  %v310_v2 = vpack.c.bf16 %v307_v1, %v304_v62  ;;  %v701_v34 = vld [vmem:[#allocation2] sm:$0xfc]  ;;  %v704_v35 = vld [vmem:[#allocation2 + $0x18] sm:$0x3] }
  0x90   : > { %255 = vst [vmem:[#allocation2 + $0x20] sm:$0x1] %v244_v63  ;;  %670 = vmatmul.bf16.vlgmr.msra.gmra.mxu3 %v261_v0  ;;  %v707_v39 = vpack.c.bf16 %v704_v35, %v701_v34  ;;  %v1659_v54 = vld [vmem:[%s2000_s3 + $0x18] sm:$0xff] }
  0x91   : > { %257 = vst.msk [vmem:[#allocation2 + $0x28] sm:$0x1] %vm256_vm6, %v242_v59  ;;  %895 = vmatpush.bf16.msra.mxu3 %v1651_v61  ;;  %v357_v5 = vshll.u32 %v310_v2, 16  ;;  %v355_v6 = vshrl.u32 %v310_v2, 16  ;;  %v1663_v60 = vld [vmem:[%s2000_s3 + $0x38] sm:$0xff]  ;;  %v1658_v61 = vld [vmem:[%s2000_s3 + $0x10] sm:$0xff] }
  0x92   : > { %v754_v42 = vrot.slane %v707_v39, 1 }
  0x93   : > { %v359_v7 = vrot.slane %v357_v5, 1 }
  0x95   : > { %896 = vmatpush.bf16.msra.mxu3 %v1650_v4  ;;  %v360_v8 = vor.u32 %v359_v7, %v355_v6  ;;  %v306_v10 = vld [vmem:[#allocation2 + $0x10] sm:$0xfe] }
  0x96   : > { %v305_v11 = vld [vmem:[#allocation2 + $0x8] sm:$0xfe]  ;;  %v260_v20 = vld [vmem:[#allocation2 + $0x10] sm:$0xff] }
  0x97   : > { %508 = vmatmul.bf16.vlgmr.msra.gmra.mxu0 %v360_v8  ;;  %v308_v12 = vld [vmem:[#allocation2 + $0x20] sm:$0x1]  ;;  %v263_v26 = vpack.c.bf16 %v260_v20, %v260_v20  ;;  %v703_v27 = vld [vmem:[#allocation2 + $0x10] sm:$0xfc]  ;;  %v702_v36 = vld [vmem:[#allocation2 + $0x8] sm:$0xfc] }
  0x98   : > { %v309_v13 = vld [vmem:[#allocation2 + $0x28] sm:$0x1]  ;;  %v311_v14 = vpack.c.bf16 %v308_v12, %v305_v11  ;;  %v705_v37 = vld [vmem:[#allocation2 + $0x20] sm:$0x3]  ;;  %1047 = vmatpush.bf16.msra.mxu0 %v1660_v51  ;;  %v1662_v20 = vld [vmem:[%s2000_s3 + $0x30] sm:$0xff] }
  0x99   : > { %897 = vmatpush.bf16.msra.mxu3 %v1649_v9  ;;  %v312_v16 = vpack.c.bf16 %v309_v13, %v306_v10  ;;  %v706_v28 = vld [vmem:[#allocation2 + $0x28] sm:$0x3]  ;;  %v708_v40 = vpack.c.bf16 %v705_v37, %v702_v36  ;;  %v1682_v13 = vld [vmem:[%s1999_s2] ss:$0 sm:$0xff] }
  0x9a   : > { %v364_v17 = vshll.u32 %v311_v14, 16  ;;  %v362_v21 = vshrl.u32 %v311_v14, 16  ;;  %v709_v31 = vpack.c.bf16 %v706_v28, %v703_v27  ;;  %v259_v41 = vld [vmem:[#allocation2 + $0x8] sm:$0xff]  ;;  %v1683_v37 = vld [vmem:[%s2001_s4] ss:$0 sm:$0xff] }
  0x9b   : > { %v369_v18 = vshrl.u32 %v312_v16, 16  ;;  %v371_v19 = vshll.u32 %v312_v16, 16  ;;  %v755_v43 = vrot.slane %v708_v40, 1  ;;  %v262_v44 = vpack.c.bf16 %v259_v41, %v259_v41 }
  0x9c   : > { %v366_v22 = vrot.slane %v364_v17, 1  ;;  %v756_v32 = vrot.slane %v709_v31, 1  ;;  %1048 = vmatpush.bf16.msra.mxu0 %v1659_v54 }
  0x9d   : > { %898 = vmatpush.bf16.msra.mxu3 %v1648_v15  ;;  %v373_v23 = vrot.slane %v371_v19, 1 }
  0x9e   : > { %v367_v25 = vor.u32 %v366_v22, %v362_v21  ;;  %v1657_v21 = vld [vmem:[%s2000_s3 + $0x8] sm:$0xff]  ;;  %v1667_v22 = vld [vmem:[%s2000_s3 + $0x58] sm:$0xff] }
  0x9f   : > { %v374_v29 = vor.u32 %v373_v23, %v369_v18  ;;  %v1661_v23 = vld [vmem:[%s2000_s3 + $0x28] sm:$0xff] }
  0xa0   : > { %521 = vmatmul.bf16.vlgmr.msra.gmra.mxu1 %v367_v25  ;;  %1388 = vmatmul.msk.bf16.vlgmr.msrb.gmra.mxu3 %vm226_vm0, %v263_v26  ;;  %v1666_v25 = vld [vmem:[%s2000_s3 + $0x50] sm:$0xff] }
  0xa1   : > { %1307 = vmatmul.msk.bf16.vlgmr.msra.gmra.mxu2 %vm226_vm0, %v374_v29  ;;  %899 = vmatpush.bf16.msra.mxu3 %v1647_v24  ;;  %v1656_v24 = vld [vmem:[%s2000_s3] sm:$0xff] }
  0xa2   : > { %1001 = vmatpush.bf16.msra.mxu2 %v1665_v50  ;;  %1106 = vmatpush.bf16.msra.mxu1 %v1670_v52 }
  0xa3   : > { %1049 = vmatpush.bf16.msra.mxu0 %v1658_v61 }
  0xa5   : > { %900 = vmatpush.bf16.msra.mxu3 %v1646_v30 }
  0xa6   : > { %1002 = vmatpush.bf16.msra.mxu2 %v1664_v53  ;;  %1107 = vmatpush.bf16.msra.mxu1 %v1669_v56 }
  0xa7   : > { %1509 = vmatmul.msk.bf16.vlgmr.msrb.gmra.mxu0 %vm226_vm0, %v756_v32 }
  0xa8   : > { %1050 = vmatpush.bf16.msra.mxu0 %v1657_v21 }
  0xa9   : > { %901 = vmatpush.bf16.msra.mxu3 %v1645_v33 }
  0xaa   : > { %1003 = vmatpush.bf16.msra.mxu2 %v1663_v60  ;;  %1108 = vmatpush.bf16.msra.mxu1 %v1668_v3 }
  0xac   : > { %1051 = vmatpush.bf16.msra.mxu0 %v1656_v24 }
  0xad   : > { %902 = vmatpush.bf16.msra.mxu3 %v1644_v38 }
  0xae   : > { %1004 = vmatpush.bf16.msra.mxu2 %v1662_v20  ;;  %1109 = vmatpush.bf16.msra.mxu1 %v1667_v22 }
  0xb0   : > { %890 = vmatmul.bf16.vlgmr.msrb.gmra.mxu1 %v754_v42  ;;  %903 = vmatmul.bf16.vlgmr.msra.gmra.mxu3 %v755_v43 }
  0xb1   : > { %683 = vmatmul.bf16.vlgmr.msrb.gmra.mxu2 %v262_v44 }
  0xb2   : > { %1005 = vmatpush.bf16.msra.mxu2 %v1661_v23  ;;  %1110 = vmatpush.bf16.msra.mxu1 %v1666_v25 }
 0x113   : > { %v671_v45 = vpop.f32.mrf.mxu3 }
 0x114   : > { %v509_v46 = vpop.f32.mrf.mxu0 }
 0x11b   : > { %v673_v47 = vpop.f32.mrf.mxu3 }
 0x11c   : > { %v511_v48 = vpop.f32.mrf.mxu0 }
 0x11d   : > { %v522_v49 = vpop.f32.mrf.mxu1 }
 0x11e   : > { %v523_v1 = vadd.f32 %v522_v49, %v509_v46 }
 0x123   : > { %v697_v55 = vpop.f32.mrf.mxu3 }
 0x124   : > { %v535_v57 = vpop.f32.mrf.mxu2  ;;  %v917_v58 = vpop.f32.mrf.mxu0 }
 0x125   : > { %v524_v59 = vpop.f32.mrf.mxu1  ;;  %v536_v4 = vadd.f32 %v535_v57, %v523_v1 }
 0x127   : > { %v672_v5 = vadd.f32 %v671_v45, %v536_v4 }
 0x12b   : > { %v699_v62 = vpop.f32.mrf.mxu3 }
 0x12c   : > { %v537_v63 = vpop.f32.mrf.mxu2  ;;  %v919_v0 = vpop.f32.mrf.mxu0 }
 0x12d   : > { %v891_v2 = vpop.f32.mrf.mxu1 }
 0x133   : > { %v904_v6 = vpop.f32.mrf.mxu3 }
 0x134   : > { %v684_v7 = vpop.f32.mrf.mxu2  ;;  %v905_v8 = vadd.f32 %v904_v6, %v891_v2 }
 0x135   : > { %v685_v9 = vadd.f32 %v684_v7, %v672_v5  ;;  %v893_v10 = vpop.f32.mrf.mxu1 }
 0x136   : > { %v918_v11 = vadd.f32 %v917_v58, %v905_v8 }
 0x137   : > { %v698_v12 = vadd.f32 %v697_v55, %v685_v9 }
 0x139   : > { %v921_v14 = vadd.f32 %v918_v11, %v698_v12 }
 0x13b   : > { %v906_v15 = vpop.f32.mrf.mxu3  ;;  %v926_v16 = vadd.f32 %v1682_v13, %v921_v14 }
 0x13c   : > { %v686_v17 = vpop.f32.mrf.mxu2 }
 0x13d   : > { %vm927_vm9 = vcmp.ge.f32.partialorder %v926_v16, 0.0  ;;  %v928_v18 = vmul.f32 0.01, %v926_v16 }
 0x13f   : > { %v929_v19 = vsel %vm927_vm9, %v926_v16, %v928_v18 }
 0x140   : > { %935 = vrot.lane.b32.xlu1 %v929_v19, %s1694_s8 }
 0x1b2   : > { %v936_v26 = vpop.permute.xlu1 %935 }
 0x1b3   : > { %939 = vst.msk [vmem:[#allocation3 + $0x1] sm:$0xff] %vm938_vm10, %v936_v26 }
 0x1ba   : > { %v952_v27 = vld [vmem:[#allocation3 + $0x1] sm:$0xff] }
 0x1bb   : > { %v940_v28 = vld [vmem:[#allocation3] sm:$0xff]  ;;  %v953_v30 = vpack.c.bf16 %v952_v27, %v952_v27 }
 0x1bc   : > { %v1057_v29 = vld [vmem:[#allocation3 + $0x2] sm:$0xff]  ;;  %v941_v31 = vpack.c.bf16 %v940_v28, %v940_v28 }
 0x1bd   : > { %v1058_v32 = vpack.c.bf16 %v1057_v29, %v1057_v29  ;;  %1540 = vmatmul.msk.bf16.vlgmr.msra.gmra.mxu2 %vm930_vm7, %v953_v30 }
 0x1be   : > { %1561 = vmatmul.msk.bf16.vlgmr.msra.gmra.mxu0 %vm930_vm7, %v941_v31 }
 0x1bf   : > { %1592 = vmatmul.msk.bf16.vlgmr.msra.gmra.mxu1 %vm930_vm7, %v1058_v32 }
 0x23b   : > { %v1053_v33 = vpop.f32.mrf.mxu0 }
 0x23c   : > { %v1112_v34 = vpop.f32.mrf.mxu1 }
 0x240   : > { %v1007_v35 = vpop.f32.mrf.mxu2 }
 0x241   : > { %v1054_v36 = vadd.f32 %v1053_v33, %v1007_v35 }
 0x243   : > { %v1055_v38 = vpop.f32.mrf.mxu0  ;;  %v1116_v39 = vadd.f32 %v1112_v34, %v1054_v36 }
 0x244   : > { %v1114_v40 = vpop.f32.mrf.mxu1 }
 0x245   : > { %v1121_v41 = vadd.f32 %v1683_v37, %v1116_v39 }
 0x247   : > { %vm1122_vm11 = vcmp.ge.f32.partialorder %v1121_v41, 0.0  ;;  %v1123_v42 = vmul.f32 0.01, %v1121_v41 }
 0x248   : > { %v1009_v43 = vpop.f32.mrf.mxu2 }
 0x249   : > { %v1124_v44 = vsel %vm1122_vm11, %v1121_v41, %v1123_v42 }
 0x24a   : > { %1125 = vst.msk [vmem:[%s222_s27] sm:$0xff] %vm226_vm0, %v1124_v44 }
 0x24b PF: > { %s15_s18 = sadd.s32 1, %s1690_s18  }
 0x24c   : > { %p12_p4 = scmp.ge.s32.totalorder %s15_s18, 4  }
 0x24e   :  { %14 = sbr.rel (!%p12_p4) target bundleno = 1 (0x1), region = 74 }

// kernel: unet_forward.12
= control target key start
LH: loop header
LB: loop body
LE: loop exit
PB: predicated region body
PF: predicated region fallthrough
CT: control target
= control target key end

     0   :  { %s2035_s18 = smov 0   ;;  %s2364_s0 = inlined_call_operand.vmem [shape: bf16[2,16,256], index: 0, kind: input, shape index: {}]   ;;  %s2365_s1 = inlined_call_operand.vmem [shape: bf16[3,288,128], index: 1, kind: input, shape index: {}]   ;;  %s2366_s2 = inlined_call_operand.vmem [shape: f32[1,128], index: 2, kind: input, shape index: {}]   ;;  %s2367_s3 = inlined_call_operand.vmem [shape: bf16[3,144,128], index: 3, kind: input, shape index: {}]   ;;  %s2368_s4 = inlined_call_operand.vmem [shape: f32[1,128], index: 4, kind: input, shape index: {}]   ;;  %s2369_s5 = inlined_call_operand.vmem [shape: f32[2,16,128], index: 5, kind: output, shape index: {}]  }
   0x1 LB: > { %s1439_s19 = sadd.s32 4294967295, %s2000_s18   ;;  %p1443_p0 = scmp.ge.s32.totalorder %s2000_s18, 1  ;;  %s2000_s18 = sphi %s2035_s18, %s15_s18  }
   0x2   : > { %p187_p1 = scmp.lt.s32.totalorder %s2000_s18, 3 }
   0x4   : > { %p188_p2 = pnand %p1443_p0, %p187_p1 }
   0x5   : > { %p215_p3 = scmp.lt.s32.totalorder (!%p188_p2), %s1439_s19, 1  ;;  %s2002_s29 = smov (!%p188_p2), 16  }
   0x6   : > { %191 = sbr.rel (%p188_p2) target bundleno = 642 (0x282), region = 40  ;;  %s2004_s30 = smov (!%p188_p2), 8  }
   0xb   : > { %v1923_v0 = vld [vmem:[%s2365_s1 + $0x108] sm:$0xff]  ;;  %v1905_v1 = vld [vmem:[%s2365_s1 + $0x78] sm:$0xff]  ;;  %s2371_s19 = smov (!%p215_p3, %s1439_s19), 1  ;;  %v1922_v3 = vld [vmem:[%s2365_s1 + $0x100] sm:$0xff]  ;;  %vm247_vm0 = vcmask 1040384   ;;  %v2003_v32 = vmov 0.0  }
   0xc   : > { %v1925_v2 = vld [vmem:[%s2365_s1 + $0x118] sm:$0xff]  ;;  %551 = vmatpush.bf16.msra.mxu1 %v1923_v0  ;;  %704 = vmatpush.bf16.msra.mxu2 %v1905_v1  ;;  %v1904_v4 = vld [vmem:[%s2365_s1 + $0x70] sm:$0xff]  ;;  %v1915_v5 = vld [vmem:[%s2365_s1 + $0xc8] sm:$0xff]  ;;  %s1888_s9 = sshll.u32 %s2371_s19, 4  ;;  %226 = vst [vmem:[#allocation2] sm:$0xff] %v2003_v32  ;;  %vm266_vm1 = vcmask 130048  }
   0xd   : > { %571 = vmatpush.bf16.msra.mxu3 %v1925_v2  ;;  %v1924_v6 = vld [vmem:[%s2365_s1 + $0x110] sm:$0xff]  ;;  %537 = vmatpush.bf16.msra.mxu0 %v1915_v5  ;;  %v1897_v7 = vld [vmem:[%s2365_s1 + $0x38] sm:$0xff]  ;;  %v1914_v8 = vld [vmem:[%s2365_s1 + $0xc0] sm:$0xff]  ;;  %s219_s16 = scalar_lea.vmem %s2364_s0, %s1888_s9  ;;  %227 = vst [vmem:[#allocation2 + $0x8] sm:$0xff] %v2003_v32  ;;  %vm235_vm2 = vcmask 254976   ;;  %vm228_vm3 = vcmask 261120   ;;  %s224_s15 = scalar_lea.vmem %s2369_s5, %s1888_s9 }
   0xe   : > { %v1921_v9 = vld [vmem:[%s2365_s1 + $0xf8] sm:$0xff]  ;;  %v237_v10 = vld [vmem:[%s219_s16] sm:$0xff]  ;;  %v238_v11 = vld [vmem:[%s219_s16 + $0x8] sm:$0xff]  ;;  %230 = vst [vmem:[#allocation2 + $0x18] sm:$0xff] %v2003_v32  ;;  %vm284_vm4 = vcmask 1047680   ;;  %vm279_vm5 = vcmask 1047681  }
   0xf   : > { %v1903_v12 = vld [vmem:[%s2365_s1 + $0x68] sm:$0xff]  ;;  %v240_v13 = vunpack.c.h.bf16 %v237_v10  ;;  %v242_v14 = vunpack.c.h.bf16 %v238_v11  ;;  %v239_v15 = vunpack.c.l.bf16 %v237_v10  ;;  %v241_v16 = vunpack.c.l.bf16 %v238_v11  ;;  %v1896_v17 = vld [vmem:[%s2365_s1 + $0x30] sm:$0xff]  ;;  %v1902_v25 = vld [vmem:[%s2365_s1 + $0x60] sm:$0xff]  ;;  %233 = vst [vmem:[#allocation2 + $0x30] sm:$0x3] %v2003_v32 }
  0x10   : > { %552 = vmatpush.bf16.msra.mxu1 %v1922_v3  ;;  %705 = vmatpush.bf16.msra.mxu2 %v1904_v4  ;;  %v1920_v24 = vld [vmem:[%s2365_s1 + $0xf0] sm:$0xff]  ;;  %v1919_v28 = vld [vmem:[%s2365_s1 + $0xe8] sm:$0xff]  ;;  %v1901_v29 = vld [vmem:[%s2365_s1 + $0x58] sm:$0xff]  ;;  %234 = vst [vmem:[#allocation2 + $0x38] sm:$0x3] %v2003_v32  ;;  %vm282_vm6 = vcmask 130049  }
  0x11   : > { %572 = vmatpush.bf16.msra.mxu3 %v1924_v6  ;;  %538 = vmatpush.bf16.msra.mxu0 %v1914_v8  ;;  %v249_v18 = vrot.slane %v240_v13, 7  ;;  %v252_v19 = vrot.slane %v242_v14, 7  ;;  %v248_v20 = vrot.slane %v239_v15, 7  ;;  %v250_v21 = vrot.slane %v241_v16, 7  ;;  %v1913_v30 = vld [vmem:[%s2365_s1 + $0xb8] sm:$0xff]  ;;  %v1918_v31 = vld [vmem:[%s2365_s1 + $0xe0] sm:$0xff] }
  0x12   : > { %v1900_v33 = vld [vmem:[%s2365_s1 + $0x50] sm:$0xff]  ;;  %v1895_v34 = vld [vmem:[%s2365_s1 + $0x28] sm:$0xff]  ;;  %v1917_v36 = vld [vmem:[%s2365_s1 + $0xd8] sm:$0xff]  ;;  %966 = vst [vmem:[#allocation3] sm:$0xff] %v2003_v32  ;;  %vm291_vm7 = vcmask 122880   ;;  %vm288_vm8 = vcmask 1040512  }
  0x13   : > { %v253_v22 = vsel %vm247_vm0, %v249_v18, %v252_v19  ;;  %v251_v23 = vsel %vm247_vm0, %v248_v20, %v250_v21  ;;  %v1912_v35 = vld [vmem:[%s2365_s1 + $0xb0] sm:$0xff]  ;;  %v1899_v37 = vld [vmem:[%s2365_s1 + $0x48] sm:$0xff]  ;;  %v1894_v38 = vld [vmem:[%s2365_s1 + $0x20] sm:$0xff]  ;;  %967 = vst.msk [vmem:[#allocation3 + $0x8] sm:$0xff] %vm266_vm1, %v2003_v32  ;;  %vm387_vm9 = vsmask.f32 7424 }
  0x14   : > { %553 = vmatpush.bf16.msra.mxu1 %v1921_v9  ;;  %706 = vmatpush.bf16.msra.mxu2 %v1903_v12  ;;  %v1982_v26 = vpack.i.bf16 %v253_v22, %v249_v18  ;;  %v1987_v27 = vpack.i.bf16 %v251_v23, %v248_v20  ;;  %968 = vst [vmem:[#allocation3 + $0x10] sm:$0xff] %v2003_v32  ;;  %v1911_v39 = vld [vmem:[%s2365_s1 + $0xa8] sm:$0xff]  ;;  %v1916_v40 = vld [vmem:[%s2365_s1 + $0xd0] sm:$0xff]  ;;  %v1933_v41 = vld [vmem:[%s2365_s1 + $0x158] sm:$0xff]  ;;  %vm787_vm10 = vcmask 1046528   ;;  %vm971_vm13 = vcmask 123904  }
  0x15   : > { %690 = vmatpush.bf16.msrb.mxu3 %v1897_v7  ;;  %539 = vmatpush.bf16.msra.mxu0 %v1913_v30  ;;  %969 = vst.msk [vmem:[#allocation3 + $0x18] sm:$0xff] %vm266_vm1, %v2003_v32  ;;  %v1898_v42 = vld [vmem:[%s2365_s1 + $0x40] sm:$0xff]  ;;  %v1893_v43 = vld [vmem:[%s2365_s1 + $0x18] sm:$0xff]  ;;  %v1932_v45 = vld [vmem:[%s2365_s1 + $0x150] sm:$0xff]  ;;  %vm987_vm14 = vcmask 1047617   ;;  %vm989_vm15 = vcmask 64513  }
  0x16   : > { %1983 = vrot.lane.b32.xlu0 %v1982_v26, %s2002_s29  ;;  %1988 = vrot.lane.b32.xlu1 %v1987_v27, %s2002_s29  ;;  %970 = vst [vmem:[#allocation3 + $0x20] sm:$0x3] %v2003_v32  ;;  %v1910_v44 = vld [vmem:[%s2365_s1 + $0xa0] sm:$0xff]  ;;  %v1892_v46 = vld [vmem:[%s2365_s1 + $0x10] sm:$0xff] }
  0x17   : > { %236 = vst.msk [vmem:[#allocation2 + $0x40] sm:$0x3] %vm235_vm2, %v2003_v32  ;;  %v1909_v47 = vld [vmem:[%s2365_s1 + $0x98] sm:$0xff]  ;;  %v1931_v48 = vld [vmem:[%s2365_s1 + $0x148] sm:$0xff]  ;;  %v1908_v51 = vld [vmem:[%s2365_s1 + $0x90] sm:$0xff]  ;;  %vm993_vm2 = vcmask 64512  }
  0x18   : > { %554 = vmatpush.bf16.msra.mxu1 %v1920_v24  ;;  %707 = vmatpush.bf16.msra.mxu2 %v1902_v25  ;;  %229 = vst.msk [vmem:[#allocation2 + $0x10] sm:$0xff] %vm228_vm3, %v2003_v32  ;;  %v1891_v49 = vld [vmem:[%s2365_s1 + $0x8] sm:$0xff]  ;;  %v1930_v52 = vld [vmem:[%s2365_s1 + $0x140] sm:$0xff]  ;;  %v1929_v54 = vld [vmem:[%s2365_s1 + $0x138] sm:$0xff] }
  0x19   : > { %691 = vmatpush.bf16.msrb.mxu3 %v1896_v17  ;;  %540 = vmatpush.bf16.msra.mxu0 %v1912_v35  ;;  %232 = vst.msk [vmem:[#allocation2 + $0x28] sm:$0xff] %vm228_vm3, %v2003_v32  ;;  %v1943_v50 = vld [vmem:[%s2365_s1 + $0x1a8] sm:$0xff]  ;;  %v1890_v53 = vld [vmem:[%s2365_s1] sm:$0xff]  ;;  %v1928_v56 = vld [vmem:[%s2365_s1 + $0x130] sm:$0xff] }
  0x1a   : > { %v1942_v55 = vld [vmem:[%s2365_s1 + $0x1a0] sm:$0xff]  ;;  %v1907_v59 = vld [vmem:[%s2365_s1 + $0x88] sm:$0xff]  ;;  %972 = vst.msk [vmem:[#allocation3 + $0x28] sm:$0x3] %vm971_vm13, %v2003_v32 }
  0x1b   : > { %v1927_v0 = vld [vmem:[%s2365_s1 + $0x128] sm:$0xff]  ;;  %v1906_v1 = vld [vmem:[%s2365_s1 + $0x80] sm:$0xff] }
  0x1c   : > { %555 = vmatpush.bf16.msra.mxu1 %v1919_v28  ;;  %708 = vmatpush.bf16.msra.mxu2 %v1901_v29  ;;  %v1926_v4 = vld [vmem:[%s2365_s1 + $0x120] sm:$0xff] }
  0x1d   : > { %692 = vmatpush.bf16.msrb.mxu3 %v1895_v34  ;;  %541 = vmatpush.bf16.msra.mxu0 %v1911_v39  ;;  %v1956_v32 = vld [vmem:[%s2367_s3 + $0x60] sm:$0xff] }
  0x1e   : > { %264 = vrot.lane.b32.xlu0 %v252_v19, %s2002_s29  ;;  %262 = vrot.lane.b32.xlu1 %v250_v21, %s2002_s29 }
  0x20   : > { %556 = vmatpush.bf16.msra.mxu1 %v1918_v31  ;;  %709 = vmatpush.bf16.msra.mxu2 %v1900_v33 }
  0x21   : > { %693 = vmatpush.bf16.msrb.mxu3 %v1894_v38  ;;  %542 = vmatpush.bf16.msra.mxu0 %v1910_v44 }
  0x24   : > { %557 = vmatpush.bf16.msra.mxu1 %v1917_v36  ;;  %710 = vmatpush.bf16.msra.mxu2 %v1899_v37 }
  0x25   : > { %694 = vmatpush.bf16.msrb.mxu3 %v1893_v43  ;;  %543 = vmatpush.bf16.msra.mxu0 %v1909_v47 }
  0x28   : > { %558 = vmatpush.bf16.msra.mxu1 %v1916_v40  ;;  %711 = vmatpush.bf16.msra.mxu2 %v1898_v42  ;;  %v1941_v42 = vld [vmem:[%s2365_s1 + $0x198] sm:$0xff] }
  0x29   : > { %695 = vmatpush.bf16.msrb.mxu3 %v1892_v46  ;;  %544 = vmatpush.bf16.msra.mxu0 %v1908_v51  ;;  %v1940_v51 = vld [vmem:[%s2365_s1 + $0x190] sm:$0xff] }
  0x2c   : > { %910 = vmatpush.bf16.msrb.mxu1 %v1933_v41  ;;  %944 = vmatpush.bf16.msrb.mxu2 %v1943_v50 }
  0x2d   : > { %696 = vmatpush.bf16.msrb.mxu3 %v1891_v49  ;;  %724 = vmatpush.bf16.msrb.mxu0 %v1907_v59 }
  0x30   : > { %911 = vmatpush.bf16.msrb.mxu1 %v1932_v45  ;;  %945 = vmatpush.bf16.msrb.mxu2 %v1942_v55 }
  0x31   : > { %697 = vmatpush.bf16.msrb.mxu3 %v1890_v53  ;;  %725 = vmatpush.bf16.msrb.mxu0 %v1906_v1  ;;  %v1937_v1 = vld [vmem:[%s2365_s1 + $0x178] sm:$0xff] }
  0x34   : > { %912 = vmatpush.bf16.msrb.mxu1 %v1931_v48 }
  0x38   : > { %913 = vmatpush.bf16.msrb.mxu1 %v1930_v52 }
  0x3c   : > { %914 = vmatpush.bf16.msrb.mxu1 %v1929_v54  ;;  %v1939_v54 = vld [vmem:[%s2365_s1 + $0x188] sm:$0xff] }
  0x40   : > { %915 = vmatpush.bf16.msrb.mxu1 %v1928_v56 }
  0x44   : > { %916 = vmatpush.bf16.msrb.mxu1 %v1927_v0 }
  0x48   : > { %917 = vmatpush.bf16.msrb.mxu1 %v1926_v4 }
  0x88   : > { %v1984_v57 = vpop.permute.xlu0 %1983  ;;  %v1989_v58 = vpop.permute.xlu1 %1988 }
  0x89   : > { %v1986_v60 = vunpack.i.h.bf16 %v1984_v57  ;;  %v1985_v61 = vunpack.i.l.bf16 %v1984_v57  ;;  %v1991_v62 = vunpack.i.h.bf16 %v1989_v58  ;;  %v1990_v63 = vunpack.i.l.bf16 %v1989_v58 }
  0x8b   : > { %v2206_v2 = vsel %vm266_vm1, %v1991_v62, %v1986_v60  ;;  %285 = vst.msk [vmem:[#allocation2 + $0x18] sm:$0xff] %vm284_vm4, %v1991_v62  ;;  %v267_v3 = vsel %vm266_vm1, %v1990_v63, %v1985_v61  ;;  %vm997_vm4 = vcmask 57344  }
  0x8c   : > { %280 = vst.msk [vmem:[#allocation2] sm:$0xfe] %vm279_vm5, %v1990_v63 }
  0x8d   : > { %281 = vst [vmem:[#allocation2 + $0x8] sm:$0xfe] %v267_v3 }
  0x8e   : > { %283 = vst.msk [vmem:[#allocation2 + $0x10] sm:$0xfe] %vm282_vm6, %v1985_v61 }
  0x8f   : > { %287 = vst.msk [vmem:[#allocation2 + $0x28] sm:$0xff] %vm266_vm1, %v1986_v60  ;;  %v1938_v60 = vld [vmem:[%s2365_s1 + $0x180] sm:$0xff] }
  0x90   : > { %v265_v5 = vpop.permute.xlu0 %264  ;;  %v263_v6 = vpop.permute.xlu1 %262 }
  0x91   : > { %292 = vst.msk [vmem:[#allocation2 + $0x40] sm:$0x1] %vm291_vm7, %v265_v5  ;;  %v269_v7 = vsel %vm266_vm1, %v263_v6, %v265_v5 }
  0x92   : > { %289 = vst.msk [vmem:[#allocation2 + $0x30] sm:$0x1] %vm288_vm8, %v263_v6  ;;  %v2214_v8 = vld [vmem:[#allocation2 + $0x18] sm:$0xff]  ;;  %v1936_v6 = vld [vmem:[%s2365_s1 + $0x170] sm:$0xff] }
  0x93   : > { %290 = vst [vmem:[#allocation2 + $0x38] sm:$0x1] %v269_v7  ;;  %v338_v9 = vld [vmem:[#allocation2] sm:$0xfe] }
  0x94   : > { %v294_v10 = vld [vmem:[#allocation2 + $0x8] sm:$0xff]  ;;  %v344_v12 = vpack.c.bf16 %v2214_v8, %v338_v9  ;;  %v732_v55 = vld [vmem:[#allocation2] sm:$0xfc] }
  0x95   : > { %v339_v11 = vld [vmem:[#allocation2 + $0x8] sm:$0xfe]  ;;  %v300_v13 = vpack.c.bf16 %v2206_v2, %v294_v10  ;;  %v340_v15 = vld [vmem:[#allocation2 + $0x10] sm:$0xfe]  ;;  %v738_v58 = vpack.c.bf16 %v2214_v8, %v732_v55  ;;  %v293_v61 = vld [vmem:[#allocation2] sm:$0xff] }
  0x96   : > { %v345_v14 = vpack.c.bf16 %v2206_v2, %v339_v11  ;;  %v391_v16 = vshll.u32 %v344_v12, 16  ;;  %v2219_v17 = vld [vmem:[#allocation2 + $0x28] sm:$0xff]  ;;  %v389_v18 = vshrl.u32 %v344_v12, 16  ;;  %v734_v43 = vld [vmem:[#allocation2 + $0x10] sm:$0xfc]  ;;  %v299_v3 = vpack.c.bf16 %v2214_v8, %v293_v61  ;;  %v1934_v12 = vld [vmem:[%s2365_s1 + $0x160] sm:$0xff] }
  0x97   : > { %712 = vmatmul.bf16.vlgmr.msra.gmra.mxu2 %v300_v13  ;;  %v346_v20 = vpack.c.bf16 %v2219_v17, %v340_v15  ;;  %v740_v50 = vpack.c.bf16 %v2219_v17, %v734_v43  ;;  %v295_v62 = vld [vmem:[#allocation2 + $0x10] sm:$0xff]  ;;  %v788_v63 = vrot.slane %v738_v58, 1  ;;  %v1935_v9 = vld [vmem:[%s2365_s1 + $0x168] sm:$0xff]  ;;  %v1992_v43 = vld [vmem:[%s2366_s2] ss:$0 sm:$0xff] }
  0x98   : > { %v343_v19 = vld [vmem:[#allocation2 + $0x40] sm:$0x1]  ;;  %v403_v21 = vshll.u32 %v345_v14, 16  ;;  %v393_v23 = vrot.slane %v391_v16, 1  ;;  %v401_v38 = vshrl.u32 %v345_v14, 16  ;;  %v301_v4 = vpack.c.bf16 %v2219_v17, %v295_v62 }
  0x99   : > { %v341_v22 = vld [vmem:[#allocation2 + $0x30] sm:$0x1]  ;;  %v349_v24 = vpack.c.bf16 %v343_v19, %v343_v19  ;;  %v415_v26 = vshll.u32 %v346_v20, 16  ;;  %v413_v34 = vshrl.u32 %v346_v20, 16  ;;  %v737_v36 = vld [vmem:[#allocation2 + $0x40] sm:$0x3] }
  0x9a   : > { %v347_v25 = vpack.c.bf16 %v341_v22, %v341_v22  ;;  %v342_v27 = vld [vmem:[#allocation2 + $0x38] sm:$0x1]  ;;  %v405_v30 = vrot.slane %v403_v21, 1  ;;  %v394_v31 = vor.u32 %v393_v23, %v389_v18  ;;  %v743_v46 = vpack.c.bf16 %v737_v36, %v737_v36  ;;  %v735_v56 = vld [vmem:[#allocation2 + $0x30] sm:$0x3] }
  0x9b   : > { %v420_v28 = vshll.u32 %v349_v24, 16  ;;  %v348_v29 = vpack.c.bf16 %v342_v27, %v342_v27  ;;  %v417_v35 = vrot.slane %v415_v26, 1  ;;  %v794_v53 = vrot.slane %v740_v50, 1  ;;  %v736_v7 = vld [vmem:[#allocation2 + $0x38] sm:$0x3] }
  0x9c   : > { %v396_v33 = vshll.u32 %v347_v25, 16  ;;  %v406_v44 = vor.u32 %v405_v30, %v401_v38  ;;  %v795_v52 = vrot.slane %v743_v46, 1  ;;  %v741_v59 = vpack.c.bf16 %v735_v56, %v735_v56  ;;  %v733_v8 = vld [vmem:[#allocation2 + $0x8] sm:$0xfc]  ;;  %v1951_v25 = vld [vmem:[%s2367_s3 + $0x38] sm:$0xff] }
  0x9d   : > { %v422_v37 = vrot.slane %v420_v28, 1  ;;  %v408_v39 = vshll.u32 %v348_v29, 16  ;;  %v418_v41 = vor.u32 %v417_v35, %v413_v34  ;;  %v742_v10 = vpack.c.bf16 %v736_v7, %v736_v7  ;;  %v1950_v28 = vld [vmem:[%s2367_s3 + $0x30] sm:$0xff]  ;;  %v1949_v30 = vld [vmem:[%s2367_s3 + $0x28] sm:$0xff]  ;;  %v1959_v7 = vld [vmem:[%s2367_s3 + $0x78] sm:$0xff] }
  0x9e   : > { %v398_v40 = vrot.slane %v396_v33, 1  ;;  %v796_v57 = vsel %vm787_vm10, %v794_v53, %v795_v52  ;;  %v789_v0 = vrot.slane %v741_v59, 1  ;;  %v739_v11 = vpack.c.bf16 %v2206_v2, %v733_v8  ;;  %v1958_v8 = vld [vmem:[%s2367_s3 + $0x70] sm:$0xff] }
  0x9f   : > { %v410_v45 = vrot.slane %v408_v39, 1  ;;  %v423_v48 = vsel %vm387_vm9, %v418_v41, %v422_v37  ;;  %v792_v13 = vrot.slane %v742_v10, 1  ;;  %v1957_v10 = vld [vmem:[%s2367_s3 + $0x68] sm:$0xff] }
  0xa0   : > { %v399_v47 = vsel %vm387_vm9, %v394_v31, %v398_v40  ;;  %1556 = vmatmul.msk.bf16.vlgmr.msra.gmra.mxu3 %vm228_vm3, %v423_v48  ;;  %v790_v5 = vsel %vm787_vm10, %v788_v63, %v789_v0  ;;  %v791_v14 = vrot.slane %v739_v11, 1  ;;  %v1948_v63 = vld [vmem:[%s2367_s3 + $0x20] sm:$0xff]  ;;  %v1947_v0 = vld [vmem:[%s2367_s3 + $0x18] sm:$0xff] }
  0xa1   : > { %545 = vmatmul.bf16.vlgmr.msra.gmra.mxu0 %v399_v47  ;;  %v411_v49 = vsel %vm387_vm9, %v406_v44, %v410_v45  ;;  %924 = vmatpush.bf16.msra.mxu3 %v1941_v42 }
  0xa2   : > { %559 = vmatmul.bf16.vlgmr.msra.gmra.mxu1 %v411_v49  ;;  %v793_v15 = vsel %vm787_vm10, %v791_v14, %v792_v13  ;;  %v1955_v13 = vld [vmem:[%s2367_s3 + $0x58] sm:$0xff]  ;;  %v1968_v14 = vld [vmem:[%s2367_s3 + $0xc0] sm:$0xff] }
  0xa3   : > { %1217 = vmatpush.bf16.msra.mxu1 %v1951_v25  ;;  %v1970_v25 = vld [vmem:[%s2367_s3 + $0xd0] sm:$0xff] }
  0xa5   : > { %925 = vmatpush.bf16.msra.mxu3 %v1940_v51 }
  0xa7   : > { %1738 = vmatmul.msk.bf16.vlgmr.msrb.gmra.mxu2 %vm228_vm3, %v796_v57  ;;  %1218 = vmatpush.bf16.msra.mxu1 %v1950_v28  ;;  %v1963_v28 = vld [vmem:[%s2367_s3 + $0x98] sm:$0xff] }
  0xa9   : > { %926 = vmatpush.bf16.msra.mxu3 %v1939_v54 }
  0xab   : > { %1219 = vmatpush.bf16.msra.mxu1 %v1949_v30 }
  0xad   : > { %927 = vmatpush.bf16.msra.mxu3 %v1938_v60 }
  0xaf   : > { %1220 = vmatpush.bf16.msra.mxu1 %v1948_v63 }
  0xb0   : > { %698 = vmatmul.bf16.vlgmr.msrb.gmra.mxu3 %v299_v3  ;;  %v1960_v3 = vld [vmem:[%s2367_s3 + $0x80] sm:$0xff] }
  0xb1   : > { %1629 = vmatmul.msk.bf16.vlgmr.msrb.gmra.mxu0 %vm228_vm3, %v301_v4  ;;  %928 = vmatpush.bf16.msra.mxu3 %v1937_v1  ;;  %v1946_v1 = vld [vmem:[%s2367_s3 + $0x10] sm:$0xff]  ;;  %v1945_v4 = vld [vmem:[%s2367_s3 + $0x8] sm:$0xff]  ;;  %vm995_vm3 = vcmask 1040448  }
  0xb2   : > { %918 = vmatmul.bf16.vlgmr.msrb.gmra.mxu1 %v790_v5  ;;  %v1952_v5 = vld [vmem:[%s2367_s3 + $0x40] sm:$0xff]  ;;  %1132 = vmatpush.bf16.msra.mxu0 %v1960_v3 }
  0xb3   : > { %1221 = vmatpush.bf16.msra.mxu1 %v1947_v0 }
  0xb5   : > { %929 = vmatpush.bf16.msra.mxu3 %v1936_v6  ;;  %v1944_v6 = vld [vmem:[%s2367_s3] sm:$0xff] }
  0xb6   : > { %1133 = vmatpush.bf16.msra.mxu0 %v1959_v7 }
  0xb7   : > { %1222 = vmatpush.bf16.msra.mxu1 %v1946_v1 }
  0xb9   : > { %930 = vmatpush.bf16.msra.mxu3 %v1935_v9  ;;  %v1961_v9 = vld [vmem:[%s2367_s3 + $0x88] sm:$0xff] }
  0xba   : > { %1153 = vmatpush.bf16.msra.mxu2 %v1961_v9  ;;  %1134 = vmatpush.bf16.msra.mxu0 %v1958_v8 }
  0xbb   : > { %1223 = vmatpush.bf16.msra.mxu1 %v1945_v4 }
  0xbd   : > { %931 = vmatpush.bf16.msra.mxu3 %v1934_v12  ;;  %v1969_v12 = vld [vmem:[%s2367_s3 + $0xc8] sm:$0xff] }
  0xbe   : > { %1135 = vmatpush.bf16.msra.mxu0 %v1957_v10  ;;  %1340 = vmatpush.bf16.msrb.mxu2 %v1969_v12 }
  0xbf   : > { %1224 = vmatpush.bf16.msra.mxu1 %v1944_v6 }
  0xc0   : > { %932 = vmatmul.bf16.vlgmr.msra.gmra.mxu3 %v793_v15  ;;  %v1954_v15 = vld [vmem:[%s2367_s3 + $0x50] sm:$0xff] }
  0xc1   : > { %1238 = vmatpush.bf16.msrb.mxu3 %v1952_v5 }
  0xc2   : > { %1136 = vmatpush.bf16.msra.mxu0 %v1956_v32  ;;  %1341 = vmatpush.bf16.msrb.mxu2 %v1968_v14 }
  0xc6   : > { %1137 = vmatpush.bf16.msra.mxu0 %v1955_v13 }
  0xca   : > { %1138 = vmatpush.bf16.msra.mxu0 %v1954_v15 }
 0x11a   : > { %v713_v19 = vpop.f32.mrf.mxu2 }
 0x11e   : > { %v546_v20 = vpop.f32.mrf.mxu0 }
 0x11f   : > { %v560_v18 = vpop.f32.mrf.mxu1 }
 0x120   : > { %v561_v24 = vadd.f32 %v560_v18, %v546_v20  ;;  %v1953_v18 = vld [vmem:[%s2367_s3 + $0x48] sm:$0xff] }
 0x121   : > { %1139 = vmatpush.bf16.msra.mxu0 %v1953_v18 }
 0x122   : > { %v715_v23 = vpop.f32.mrf.mxu2 }
 0x123   : > { %v574_v16 = vpop.f32.mrf.mxu3 }
 0x124   : > { %v575_v27 = vadd.f32 %v574_v16, %v561_v24  ;;  %v1967_v16 = vld [vmem:[%s2367_s3 + $0xb8] sm:$0xff] }
 0x125   : > { %1342 = vmatpush.bf16.msrb.mxu2 %v1967_v16  ;;  %1361 = vmatpush.bf16.msrb.mxu0 %v1970_v25 }
 0x126   : > { %v548_v2 = vpop.f32.mrf.mxu0 }
 0x127   : > { %v562_v22 = vpop.f32.mrf.mxu1 }
 0x128   : > { %v563_v33 = vadd.f32 %v562_v22, %v548_v2  ;;  %v1965_v22 = vld [vmem:[%s2367_s3 + $0xa8] sm:$0xff] }
 0x12a   : > { %v947_v34 = vpop.f32.mrf.mxu2 }
 0x12b   : > { %v576_v17 = vpop.f32.mrf.mxu3 }
 0x12c   : > { %v577_v38 = vadd.f32 %v576_v17, %v563_v33 }
 0x12e   : > { %v727_v36 = vpop.f32.mrf.mxu0 }
 0x12f   : > { %v919_v31 = vpop.f32.mrf.mxu1 }
 0x132   : > { %v949_v51 = vpop.f32.mrf.mxu2 }
 0x133   : > { %v699_v21 = vpop.f32.mrf.mxu3 }
 0x134   : > { %v700_v29 = vadd.f32 %v699_v21, %v575_v27  ;;  %v1964_v27 = vld [vmem:[%s2367_s3 + $0xa0] sm:$0xff] }
 0x136   : > { %v714_v35 = vadd.f32 %v713_v19, %v700_v29  ;;  %v729_v52 = vpop.f32.mrf.mxu0  ;;  %v1966_v19 = vld [vmem:[%s2367_s3 + $0xb0] sm:$0xff] }
 0x137   : > { %v921_v47 = vpop.f32.mrf.mxu1  ;;  %1343 = vmatpush.bf16.msrb.mxu2 %v1966_v19  ;;  %v1962_v29 = vld [vmem:[%s2367_s3 + $0x90] sm:$0xff] }
 0x138   : > { %v728_v40 = vadd.f32 %v727_v36, %v714_v35 }
 0x13b   : > { %v701_v26 = vpop.f32.mrf.mxu3  ;;  %1344 = vmatpush.bf16.msrb.mxu2 %v1965_v22 }
 0x13c   : > { %v702_v41 = vadd.f32 %v701_v26, %v577_v38 }
 0x13e   : > { %v716_v45 = vadd.f32 %v715_v23, %v702_v41 }
 0x13f   : > { %1345 = vmatpush.bf16.msrb.mxu2 %v1964_v27 }
 0x140   : > { %v730_v53 = vadd.f32 %v729_v52, %v716_v45 }
 0x143   : > { %v933_v37 = vpop.f32.mrf.mxu3  ;;  %1346 = vmatpush.bf16.msrb.mxu2 %v1963_v28 }
 0x144   : > { %v934_v39 = vadd.f32 %v933_v37, %v919_v31 }
 0x146   : > { %v948_v42 = vadd.f32 %v947_v34, %v934_v39 }
 0x147   : > { %1347 = vmatpush.bf16.msrb.mxu2 %v1962_v29 }
 0x148   : > { %v952_v44 = vadd.f32 %v948_v42, %v728_v40 }
 0x14a   : > { %v958_v46 = vadd.f32 %v1992_v43, %v952_v44 }
 0x14b   : > { %v935_v48 = vpop.f32.mrf.mxu3 }
 0x14c   : > { %v936_v49 = vadd.f32 %v935_v48, %v921_v47  ;;  %vm960_vm11 = vcmp.ge.f32.partialorder %v958_v46, 0.0  ;;  %v962_v50 = vmul.f32 0.01, %v958_v46 }
 0x14e   : > { %v950_v54 = vadd.f32 %v949_v51, %v936_v49  ;;  %v964_v55 = vsel %vm960_vm11, %v958_v46, %v962_v50 }
 0x14f   : > { %v975_v56 = vrot.slane %v964_v55, 7 }
 0x150   : > { %v953_v57 = vadd.f32 %v950_v54, %v730_v53 }
 0x151   : > { %978 = vrot.lane.b32.xlu2 %v975_v56, %s2004_s30 }
 0x152   : > { %v959_v58 = vadd.f32 %v1992_v43, %v953_v57 }
 0x154   : > { %vm961_vm12 = vcmp.ge.f32.partialorder %v959_v58, 0.0  ;;  %v963_v59 = vmul.f32 0.01, %v959_v58 }
 0x156   : > { %v965_v60 = vsel %vm961_vm12, %v959_v58, %v963_v59 }
 0x157   : > { %v976_v61 = vrot.slane %v965_v60, 7 }
 0x159   : > { %982 = vrot.lane.b32.xlu0 %v976_v61, %s2004_s30  ;;  %v977_v62 = vsel %vm247_vm0, %v975_v56, %v976_v61  ;;  %vm991_vm0 = vcmask 1047616  }
 0x15a   : > { %980 = vrot.lane.b32.xlu2 %v977_v62, %s2004_s30 }
 0x1ab   : > { %v979_v11 = vpop.permute.xlu2 %978 }
 0x1ac   : > { %988 = vst.msk [vmem:[#allocation3] sm:$0xfe] %vm987_vm14, %v979_v11 }
 0x1ad   : > { %990 = vst.msk [vmem:[#allocation3 + $0x8] sm:$0xfe] %vm989_vm15, %v979_v11 }
 0x1b3   : > { %v999_v20 = vld [vmem:[#allocation3] sm:$0xff] }
 0x1b4   : > { %v981_v17 = vpop.permute.xlu2 %980  ;;  %v1000_v2 = vld [vmem:[#allocation3 + $0x8] sm:$0xff]  ;;  %v1023_v31 = vld [vmem:[#allocation3] sm:$0xfe] }
 0x1b5   : > { %992 = vst.msk [vmem:[#allocation3 + $0x10] sm:$0xff] %vm991_vm0, %v981_v17  ;;  %v1024_v34 = vld [vmem:[#allocation3 + $0x8] sm:$0xfe]  ;;  %v1245_v59 = vld [vmem:[#allocation3] sm:$0xfc] }
 0x1b6   : > { %994 = vst.msk [vmem:[#allocation3 + $0x18] sm:$0xff] %vm993_vm2, %v981_v17  ;;  %v1246_v58 = vld [vmem:[#allocation3 + $0x8] sm:$0xfc]  ;;  %v1993_v17 = vld [vmem:[%s2368_s4] ss:$0 sm:$0xff] }
 0x1bc   : > { %v1001_v21 = vld [vmem:[#allocation3 + $0x10] sm:$0xff] }
 0x1bd   : > { %v1003_v23 = vpack.c.bf16 %v1001_v21, %v999_v20  ;;  %v1002_v24 = vld [vmem:[#allocation3 + $0x18] sm:$0xff]  ;;  %v1027_v33 = vpack.c.bf16 %v1001_v21, %v1023_v31  ;;  %v1249_v61 = vpack.c.bf16 %v1001_v21, %v1245_v59 }
 0x1be   : > { %v1004_v26 = vpack.c.bf16 %v1002_v24, %v1000_v2  ;;  %v1028_v35 = vpack.c.bf16 %v1002_v24, %v1024_v34  ;;  %v1250_v60 = vpack.c.bf16 %v1002_v24, %v1246_v58 }
 0x1bf   : > { %1225 = vmatmul.bf16.vlgmr.msra.gmra.mxu1 %v1003_v23  ;;  %v1053_v36 = vshll.u32 %v1027_v33, 16  ;;  %v1051_v44 = vshrl.u32 %v1027_v33, 16  ;;  %v1276_v1 = vrot.slane %v1249_v61, 1 }
 0x1c0   : > { %1830 = vmatmul.msk.bf16.vlgmr.msrb.gmra.mxu3 %vm266_vm1, %v1004_v26  ;;  %v1065_v37 = vshll.u32 %v1028_v35, 16  ;;  %v1063_v46 = vshrl.u32 %v1028_v35, 16  ;;  %v1279_v0 = vrot.slane %v1250_v60, 1 }
 0x1c1   : > { %v1055_v40 = vrot.slane %v1053_v36, 1 }
 0x1c2   : > { %v1067_v43 = vrot.slane %v1065_v37, 1 }
 0x1c3   : > { %v1056_v48 = vor.u32 %v1055_v40, %v1051_v44 }
 0x1c4   : > { %v1068_v50 = vor.u32 %v1067_v43, %v1063_v46 }
 0x1cb   : > { %v983_v30 = vpop.permute.xlu0 %982 }
 0x1cc   : > { %996 = vst.msk [vmem:[#allocation3 + $0x20] sm:$0x1] %vm995_vm3, %v983_v30 }
 0x1cd   : > { %998 = vst.msk [vmem:[#allocation3 + $0x28] sm:$0x1] %vm997_vm4, %v983_v30 }
 0x1d3   : > { %v1025_v38 = vld [vmem:[#allocation3 + $0x20] sm:$0x1] }
 0x1d4   : > { %v1029_v39 = vpack.c.bf16 %v1025_v38, %v1025_v38  ;;  %v1026_v41 = vld [vmem:[#allocation3 + $0x28] sm:$0x1]  ;;  %v1247_v55 = vld [vmem:[#allocation3 + $0x20] sm:$0x3] }
 0x1d5   : > { %v1030_v42 = vpack.c.bf16 %v1026_v41, %v1026_v41  ;;  %v1248_v54 = vld [vmem:[#allocation3 + $0x28] sm:$0x3]  ;;  %v1251_v57 = vpack.c.bf16 %v1247_v55, %v1247_v55 }
 0x1d6   : > { %v1058_v45 = vshll.u32 %v1029_v39, 16  ;;  %v1252_v56 = vpack.c.bf16 %v1248_v54, %v1248_v54 }
 0x1d7   : > { %v1070_v47 = vshll.u32 %v1030_v42, 16  ;;  %v1277_v63 = vrot.slane %v1251_v57, 1 }
 0x1d8   : > { %v1060_v49 = vrot.slane %v1058_v45, 1  ;;  %v1280_v62 = vrot.slane %v1252_v56, 1 }
 0x1d9   : > { %v1072_v51 = vrot.slane %v1070_v47, 1  ;;  %v1278_v4 = vsel %vm787_vm10, %v1276_v1, %v1277_v63 }
 0x1da   : > { %v1061_v52 = vsel %vm387_vm9, %v1056_v48, %v1060_v49  ;;  %v1281_v3 = vsel %vm787_vm10, %v1279_v0, %v1280_v62 }
 0x1db   : > { %1140 = vmatmul.bf16.vlgmr.msra.gmra.mxu0 %v1061_v52  ;;  %v1073_v53 = vsel %vm387_vm9, %v1068_v50, %v1072_v51 }
 0x1dc   : > { %1793 = vmatmul.msk.bf16.vlgmr.msra.gmra.mxu2 %vm266_vm1, %v1073_v53 }
 0x1eb   : > { %1885 = vmatmul.msk.bf16.vlgmr.msrb.gmra.mxu0 %vm266_vm1, %v1281_v3 }
 0x1ec   : > { %1348 = vmatmul.bf16.vlgmr.msrb.gmra.mxu2 %v1278_v4 }
 0x23c   : > { %v1226_v10 = vpop.f32.mrf.mxu1 }
 0x243   : > { %v1240_v11 = vpop.f32.mrf.mxu3 }
 0x244   : > { %v1228_v19 = vpop.f32.mrf.mxu1 }
 0x24b   : > { %v1242_v22 = vpop.f32.mrf.mxu3 }
 0x258   : > { %v1141_v5 = vpop.f32.mrf.mxu0 }
 0x25f   : > { %v1155_v6 = vpop.f32.mrf.mxu2 }
 0x260   : > { %v1143_v7 = vpop.f32.mrf.mxu0  ;;  %v1156_v8 = vadd.f32 %v1155_v6, %v1141_v5 }
 0x262   : > { %v1227_v32 = vadd.f32 %v1226_v10, %v1156_v8 }
 0x264   : > { %v1241_v15 = vadd.f32 %v1240_v11, %v1227_v32 }
 0x267   : > { %v1157_v9 = vpop.f32.mrf.mxu2 }
 0x268   : > { %v1363_v12 = vpop.f32.mrf.mxu0  ;;  %v1158_v14 = vadd.f32 %v1157_v9, %v1143_v7 }
 0x26a   : > { %v1229_v20 = vadd.f32 %v1228_v19, %v1158_v14 }
 0x26c   : > { %v1243_v26 = vadd.f32 %v1242_v22, %v1229_v20 }
 0x26f   : > { %v1349_v13 = vpop.f32.mrf.mxu2 }
 0x270   : > { %v1364_v16 = vadd.f32 %v1363_v12, %v1349_v13  ;;  %v1365_v2 = vpop.f32.mrf.mxu0 }
 0x272   : > { %v1368_v18 = vadd.f32 %v1364_v16, %v1241_v15 }
 0x274   : > { %v1374_v21 = vadd.f32 %v1993_v17, %v1368_v18 }
 0x276   : > { %vm1376_vm1 = vcmp.ge.f32.partialorder %v1374_v21, 0.0  ;;  %v1378_v23 = vmul.f32 0.01, %v1374_v21 }
 0x277   : > { %v1351_v24 = vpop.f32.mrf.mxu2 }
 0x278   : > { %v1380_v25 = vsel %vm1376_vm1, %v1374_v21, %v1378_v23  ;;  %v1366_v27 = vadd.f32 %v1365_v2, %v1351_v24 }
 0x279   : > { %1382 = vst [vmem:[%s224_s15] sm:$0xff] %v1380_v25 }
 0x27a   : > { %v1369_v28 = vadd.f32 %v1366_v27, %v1243_v26 }
 0x27c   : > { %v1375_v29 = vadd.f32 %v1993_v17, %v1369_v28 }
 0x27e   : > { %vm1377_vm5 = vcmp.ge.f32.partialorder %v1375_v29, 0.0  ;;  %v1379_v30 = vmul.f32 0.01, %v1375_v29 }
 0x280   : > { %v1381_v31 = vsel %vm1377_vm5, %v1375_v29, %v1379_v30 }
 0x281   : > { %1383 = vst [vmem:[%s224_s15 + $0x8] sm:$0xff] %v1381_v31 }
 0x282 PF: > { %s15_s18 = sadd.s32 1, %s2000_s18  }
 0x283   : > { %p12_p4 = scmp.ge.s32.totalorder %s15_s18, 4  }
 0x285   :  { %14 = sbr.rel (!%p12_p4) target bundleno = 1 (0x1), region = 74 }

// kernel: unet_forward.13
= control target key start
LH: loop header
LB: loop body
LE: loop exit
PB: predicated region body
PF: predicated region fallthrough
CT: control target
= control target key end

     0   :  { %8 = vsyncpa [#allocation3], 0  ;;  %s639_s0 = inlined_call_operand.vmem [shape: bf16[2,16,128], index: 0, kind: input, shape index: {}]   ;;  %s640_s1 = inlined_call_operand.vmem [shape: bf16[128,16], index: 1, kind: input, shape index: {}]   ;;  %s641_s2 = inlined_call_operand.vmem [shape: f32[1,16], index: 2, kind: input, shape index: {}]   ;;  %s642_s3 = inlined_call_operand.hbm [shape: f32[2,16,16], index: 3, kind: output, shape index: {}]  }
   0x1   :  { %10 = vsyncpa [#allocation3 + $0x1], 0  ;;  %s527_s12 = smov 0   ;;  %s529_s13 = smov 0  }
   0x2   :  { %s531_s14 = smov 0   ;;  %s533_s15 = smov 0  }
   0x3 LB: > { %s548_s16 = sadd.s32 4294967295, %s503_s15   ;;  %s340_s17 = sadd.s32 4294967294, %s503_s15   ;;  %s503_s15 = sphi %s533_s15, %s648_s15   ;;  %s499_s14 = sphi %s531_s14, %s647_s14   ;;  %s495_s13 = sphi %s529_s13, %s646_s13   ;;  %s491_s12 = sphi %s527_s12, %s645_s12  }
   0x4   : > { %s552_s18 = sadd.s32 1, %s503_s15   ;;  %s91_s19 = sadd.s32 1, %s499_s14 }
   0x5   : > { %s88_s20 = ssub.s32 %s503_s15, %s552_s18  ;;  %p101_p0 = scmp.ne.s32.totalorder %s499_s14, %s495_s13 }
   0x6   : > { %p89_p1 = scmp.eq.s32.totalorder %s88_s20, 0  ;;  %p102_p2 = scmp.eq.s32.totalorder %s548_s16, 1 }
   0x7   : > { %p107_p3 = scmp.ne.s32.totalorder %s495_s13, %s491_s12  ;;  %p108_p4 = scmp.eq.s32.totalorder %s340_s17, 1 }
   0x8   : > { %s563_s21 = scalar_select %p89_p1, %s499_s14, %s91_s19  }
   0x9   : > { %p565_p5 = por %p102_p2, %p101_p0  ;;  %p569_p6 = por %p108_p4, %p107_p3 }
   0xa   : > { %p343_p7 = scmp.ge.s32.totalorder %s503_s15, 1  ;;  %p140_p8 = scmp.lt.s32.totalorder %s503_s15, 3 }
   0xc   : > { %p141_p9 = pnand %p343_p7, %p140_p8 }
   0xd   : > { %p164_p10 = scmp.lt.s32.totalorder (!%p141_p9), %s548_s16, 1  ;;  %s161_s27 = sand.u32 (!%p141_p9), 1, %s495_s13  }
   0xe   : > { %144 = sbr.rel (%p141_p9) target bundleno = 191 (0xbf), region = 32  ;;  %s344_s28 = sshll.u32 (!%p141_p9), %s161_s27, 4 }
   0xf   : > { %s398_s4 = sshll.u32 (!%p141_p9), %s548_s16, 4  ;;  %s163_s8 = scalar_lea.vmem (!%p141_p9), [#allocation2], %s344_s28 }
  0x10   : > { %s274_s7 = scalar_lea.hbm (!%p141_p9), %s642_s3, %s398_s4  ;;  %s263_s11 = scalar_lea.sflag (!%p141_p9), [#allocation3], %s161_s27 }
  0x11   : > { %s277_s10 = sshll.u32 (!%p141_p9), %s274_s7, 4  ;;  %s461_s24 = scalar_lea.hbm (!%p141_p9), %s642_s3, 32  ;;  %s278_s10 = int_to_ptr.hbm [resolvable:$true] %s277_s10 }
  0x13   : > { %v397_v0 = vld [vmem:[%s640_s1 + $0x38] sm:$0xff]  ;;  %v396_v1 = vld [vmem:[%s640_s1 + $0x30] sm:$0xff]  ;;  %v395_v2 = vld [vmem:[%s640_s1 + $0x28] sm:$0xff]  ;;  %s165_s9 = scalar_select %p164_p10, %s548_s16, 1  ;;  %vm259_vm0 = vcmask 130048  }
  0x14   : > { %245 = vmatpush.bf16.msra.mxu0 %v397_v0  ;;  %v394_v3 = vld [vmem:[%s640_s1 + $0x20] sm:$0xff]  ;;  %v393_v4 = vld [vmem:[%s640_s1 + $0x18] sm:$0xff]  ;;  %v392_v5 = vld [vmem:[%s640_s1 + $0x10] sm:$0xff] }
  0x15   : > { %v391_v6 = vld [vmem:[%s640_s1 + $0x8] sm:$0xff]  ;;  %s388_s17 = sshll.u32 %s165_s9, 3  ;;  %v390_v7 = vld [vmem:[%s640_s1] sm:$0xff]  ;;  %s275_s9 = sshll.u32 %s163_s8, 4  ;;  %s276_s9 = int_to_ptr.vmem [resolvable:$true] %s275_s9 }
  0x16   : > { %s168_s26 = scalar_lea.vmem %s639_s0, %s388_s17  ;;  %v440_v9 = vld [vmem:[%s641_s2] ss:$0 sm:$0xff]  ;;  %s455_s17 = sshra.s32 %s278_s10, 4  ;;  %s456_s17 = int_to_ptr.hbm [resolvable:$true] %s455_s17 }
  0x17   : > { %v389_v8 = vld [vmem:[%s168_s26] sm:$0xff]  ;;  %s457_s16 = scalar_lea.hbm %s456_s17, 16  ;;  %p462_p0 = scmp.lt.s32.totalorder %s456_s17, %s642_s3 }
  0x18   : > { %246 = vmatpush.bf16.msra.mxu0 %v396_v1  ;;  %p458_p11 = scmp.ne.s32.totalorder %s456_s17, %s457_s16  ;;  %p463_p1 = scmp.lt.s32.totalorder %s461_s24, %s457_s16 }
  0x1a   : > { %p459_p12 = pnand %p458_p11, %p565_p5  ;;  %p464_p2 = por %p463_p1, %p462_p0 }
  0x1c   : > { %247 = vmatpush.bf16.msra.mxu0 %v395_v2  ;;  %p460_p13 = pneg %p459_p12 }
  0x1e   : > { %p465_p3 = pnand %p464_p2, %p460_p13 }
  0x20   : > { %248 = vmatpush.bf16.msra.mxu0 %v394_v3 }
  0x24   : > { %249 = vmatpush.bf16.msra.mxu0 %v393_v4 }
  0x28   : > { %250 = vmatpush.bf16.msra.mxu0 %v392_v5 }
  0x2c   : > { %251 = vmatpush.bf16.msra.mxu0 %v391_v6 }
  0x30   : > { %252 = vmatpush.bf16.msra.mxu0 %v390_v7 }
  0x33   : > { %253 = vmatmul.bf16.vlgmr.msra.gmra.mxu0 %v389_v8 }
  0xb0   : > { %v254_v10 = vpop.f32.mrf.mxu0 }
  0xb1   : > { %v255_v11 = vadd.f32 %v440_v9, %v254_v10 }
  0xb3   : > { %260 = vst.msk [vmem:[%s163_s8] sm:$0xff] %vm259_vm0, %v255_v11 }
  0xb8   : > { %v256_v12 = vpop.f32.mrf.mxu0 }
  0xb9   : > { %v257_v13 = vadd.f32 %v440_v9, %v256_v12 }
  0xbb   : > { %261 = vst.msk [vmem:[%s163_s8 + $0x8] sm:$0xff] %vm259_vm0, %v257_v13 }
  0xbc   : > { %468 = shalt.err (!%p465_p3)
}
  0xbd   : > { %s505_s27 = smov 128   ;;  %s506_s28 = smov 8  }
  0xbe   : > { %399 = dma.vmem_to_hbm [thread:$0]  (%p565_p5), %s276_s9, 256, %s278_s10, %s263_s11, %s505_s27, %s505_s27, %s506_s28  }
  0xbf PF: > { %p405_p4 = scmp.ge.s32.totalorder %s503_s15, 2  ;;  %s292_s29 = sand.u32 1, %s491_s12  }
  0xc0   : > { %s293_s30 = scalar_lea.sflag [#allocation3], %s292_s29 }
  0xc1   : > { %p402_p7 = pnand %p405_p4, %p569_p6 }
  0xc3   : > { %p403_p8 = pneg %p402_p7 }
  0xc5   : > { %486 = dma.done.wait (%p403_p8), %s293_s30, 256  }
  0xc6   : > { %488 = vsyncadd (%p403_p8), %s293_s30, 4294967040  ;;  %p13_p9 = scmp.ge.s32.totalorder %s552_s18, 4   ;;  %s645_s12 = smov %s495_s13 }
  0xc7   : > { %s646_s13 = smov %s499_s14  ;;  %s647_s14 = smov %s563_s21 }
  0xc8   : > { %s648_s15 = smov %s552_s18  ;;  %15 = sbr.rel (!%p13_p9) target bundleno = 3 (0x3), region = 67 }
  0xcd   :  { %299 = vsyncpa [#allocation3], 1 }
  0xce   :  { %301 = vsyncpa [#allocation3 + $0x1], 1 }

</bundles_post_ra>
